<compile_context>
chip_gen: v5e
topology: v5e:2x2
jax: 0.10.0
libtpu: 0.0.40
codegen_flags: <defaults>
</compile_context>

<pallas_src>
import jax
import jax.numpy as jnp
from jax import lax
from jax.experimental import pallas as pl
from jax.experimental.pallas import tpu as pltpu

EMB_DIM = 64
HID_DIM = 128
VOCAB = 30522  # bert-base-uncased vocab size (synthetic table, deterministic init)


def gru_sent_kernel(x_ref, wih_f_ref, wih_b_ref, bif_ref, bib_ref,
                    whh_f_ref, whh_b_ref, bhn_f_ref, bhn_b_ref,
                    w1f_ref, w1b_ref, b1_ref, w2_ref, b2_ref,
                    out_ref, gif_ref, gib_ref):
    H = HID_DIM
    TB = x_ref.shape[0]           # T * BB rows, time-major within this batch block
    BB = out_ref.shape[0]         # batch rows handled by this grid step
    T = TB // BB

    # ---- Hoisted input projections (per direction, biases pre-folded) ------
    # One lane-dense (T*BB, E) @ (E, 3H) MXU call per direction instead of
    # 2*T tiny per-step calls.  b_ih + b_hr + b_hz are folded into bif / bib
    # on the host; only the r-gated b_hn remains inside the step.
    # TODO(synk): for serving-size T (>= ~64) tile this projection over T
    # chunks (pltpu.emit_pipeline) or store gi in bf16 so the scratch stays
    # inside v7x's 64 MiB VMEM.
    x = x_ref[...]
    gif_ref[...] = (jnp.dot(x, wih_f_ref[...], preferred_element_type=jnp.float32)
                    + bif_ref[...])
    gib_ref[...] = (jnp.dot(x, wih_b_ref[...], preferred_element_type=jnp.float32)
                    + bib_ref[...])

    # Hoist + pre-broadcast the only per-step bias once (avoids a per-step
    # (1,H)->(BB,H) broadcast_in_dim inside the unrolled loop).
    bhn_f = jnp.broadcast_to(bhn_f_ref[...], (BB, H))
    bhn_b = jnp.broadcast_to(bhn_b_ref[...], (BB, H))

    def gates(gi, gh, h, bhn):
        # PyTorch GRU cell, gate order [r, z, n]; b_ir+b_hr / b_iz+b_hz and
        # b_in are already inside gi, b_hn arrives via bhn (gated by r).
        r = jax.nn.sigmoid(gi[:, 0:H] + gh[:, 0:H])
        z = jax.nn.sigmoid(gi[:, H:2 * H] + gh[:, H:2 * H])
        n = jnp.tanh(gi[:, 2 * H:3 * H] + r * (gh[:, 2 * H:3 * H] + bhn))
        return (1.0 - z) * n + z * h

    def step(t, carry):
        h_f, h_b = carry
        # The two direction chains are independent until after the loop: issue
        # both (BB,H)@(H,3H) h-projections up front so the scheduler can
        # overlap one direction's MXU push with the other direction's EUP
        # gate math across the unrolled iterations (latency hiding).
        gh_f = jnp.dot(h_f, whh_f_ref[...], preferred_element_type=jnp.float32)
        gh_b = jnp.dot(h_b, whh_b_ref[...], preferred_element_type=jnp.float32)
        off_f = pl.multiple_of(t * BB, BB)               # fwd consumes time t
        off_b = pl.multiple_of((T - 1 - t) * BB, BB)     # bwd consumes time T-1-t
        gi_f = gif_ref[pl.ds(off_f, BB), :]              # (BB, 3H): only used columns loaded
        gi_b = gib_ref[pl.ds(off_b, BB), :]
        return (gates(gi_f, gh_f, h_f, bhn_f),
                gates(gi_b, gh_b, h_b, bhn_b))

    h0 = jnp.zeros((BB, H), jnp.float32)
    # Full unroll only while live ranges are small; cap otherwise so unrolled
    # gi slices / gh temps don't spill the 64-vreg file.
    unroll = T if T <= 16 else 4
    h_f, h_b = lax.fori_loop(0, T, step, (h0, h0), unroll=unroll)

    # ---- head: Linear(2H -> H) as split matmuls (no concat) -> ReLU ->
    #            Dropout(0.2) [identity at inference] -> Linear(H -> 1) as a
    #            VPU multiply + lane reduce (w2 passed as a (1, H) row) -------
    hid = (jnp.dot(h_f, w1f_ref[...], preferred_element_type=jnp.float32)
           + jnp.dot(h_b, w1b_ref[...], preferred_element_type=jnp.float32)
           + b1_ref[...])
    hid = jnp.maximum(hid, 0.0)
    out_ref[...] = jnp.sum(hid * w2_ref[...], axis=1, keepdims=True) + b2_ref[...]


def pack_params(params):
    """Host-side repacking of PyTorch-layout params into the kernel layout."""
    H = HID_DIM

    def fold(bih, bhh):
        # Fold the ungated hidden biases (b_hr, b_hz) into the precomputed
        # input projection; b_hn must stay in-step because it is gated by r.
        return bih + jnp.concatenate(
            [bhh[:, :2 * H], jnp.zeros((1, H), jnp.float32)], axis=1)

    return dict(
        emb=params["emb"],
        wih_f=params["wih_f"], wih_b=params["wih_b"],
        bif=fold(params["bih_f"], params["bhh_f"]),
        bib=fold(params["bih_b"], params["bhh_b"]),
        whh_f=params["whh_f"], whh_b=params["whh_b"],
        bhn_f=params["bhh_f"][:, 2 * H:], bhn_b=params["bhh_b"][:, 2 * H:],
        w1f=params["w1"][:H], w1b=params["w1"][H:],
        b1=params["b1"],
        w2r=params["w2"].T,          # (1, H) row for multiply+reduce
        b2=params["b2"])


def gru_sent_forward(ids, packed):
    """ids: (B, T) int32 -> (B,) logits."""
    B, T = ids.shape
    E, H = EMB_DIM, HID_DIM

    # Batch tile: BB rows per grid step.  The grid axis is "parallel" so v7x's
    # two TensorCores split the batch; BB also bounds the per-block gi scratch.
    BB = min(128, max(8, ((B + 7) // 8) * 8))
    B_pad = ((B + BB - 1) // BB) * BB
    n_blk = B_pad // BB

    # Padded rows point at token 0 (= zero embedding row).  They do NOT stay
    # zero through the GRU (the biases make h nonzero), but they are sliced
    # off below, so this is only a tiny amount of wasted compute.
    ids_pad = jnp.zeros((B_pad, T), ids.dtype).at[:B].set(ids)

    # Gather embeddings directly into per-block, time-major (T*BB, E) rows:
    # within block i, row t*BB + j holds (batch i*BB + j, time t).  No HBM
    # transpose of the embedded sequence.
    idx = ids_pad.reshape(n_blk, BB, T).transpose(0, 2, 1).reshape(n_blk, T * BB)
    x = jnp.take(packed["emb"], idx, axis=0).astype(jnp.float32)  # (n_blk, T*BB, E)

    def fixed(shape):
        nd = len(shape)
        return pl.BlockSpec(shape, lambda i: (0,) * nd)   # weights stay resident

    in_specs = [
        pl.BlockSpec((None, T * BB, E), lambda i: (i, 0, 0)),   # x (per batch block)
        fixed((E, 3 * H)), fixed((E, 3 * H)),                   # wih_f, wih_b
        fixed((1, 3 * H)), fixed((1, 3 * H)),                   # folded bif, bib
        fixed((H, 3 * H)), fixed((H, 3 * H)),                   # whh_f, whh_b
        fixed((1, H)), fixed((1, H)),                           # bhn_f, bhn_b
        fixed((H, H)), fixed((H, H)),                           # w1 split (fwd/bwd halves)
        fixed((1, H)),                                          # b1
        fixed((1, H)),                                          # w2 row
        fixed((1, 1)),                                          # b2
    ]

    out = pl.pallas_call(
        gru_sent_kernel,
        grid=(n_blk,),
        in_specs=in_specs,
        out_specs=pl.BlockSpec((None, BB, 1), lambda i: (i, 0, 0)),
        out_shape=jax.ShapeDtypeStruct((n_blk, BB, 1), jnp.float32),
        scratch_shapes=[pltpu.VMEM((T * BB, 3 * H), jnp.float32),   # gi forward
                        pltpu.VMEM((T * BB, 3 * H), jnp.float32)],  # gi backward
        compiler_params=pltpu.CompilerParams(
            dimension_semantics=("parallel",),
            # Explicit VMEM budget keeps the same config valid on v7x (64 MiB
            # physical / 32 MiB default scoped) as well as v5e/v6e.
            vmem_limit_bytes=32 * 1024 * 1024),
    )(x, packed["wih_f"], packed["wih_b"], packed["bif"], packed["bib"],
      packed["whh_f"], packed["whh_b"], packed["bhn_f"], packed["bhn_b"],
      packed["w1f"], packed["w1b"], packed["b1"], packed["w2r"], packed["b2"])

    return out.reshape(B_pad)[:B]   # drop batch padding, .squeeze(1)


def init_params(key):
    ks = jax.random.split(key, 16)
    H, E = HID_DIM, EMB_DIM

    def uni(k, shape, bound):
        return jax.random.uniform(k, shape, jnp.float32, -bound, bound)

    # Embedding: N(0,1), padding_idx=0 row zeroed.
    emb = jax.random.normal(ks[0], (VOCAB, E), jnp.float32)
    emb = emb.at[0].set(0.0)

    g = 1.0 / jnp.sqrt(jnp.float32(H))
    # GRU weights pre-transposed to (in_features, 3H), gate order [r, z, n].
    wih_f = uni(ks[1], (E, 3 * H), g)
    whh_f = uni(ks[2], (H, 3 * H), g)
    bih_f = uni(ks[3], (1, 3 * H), g)
    bhh_f = uni(ks[4], (1, 3 * H), g)
    wih_b = uni(ks[5], (E, 3 * H), g)
    whh_b = uni(ks[6], (H, 3 * H), g)
    bih_b = uni(ks[7], (1, 3 * H), g)
    bhh_b = uni(ks[8], (1, 3 * H), g)

    g1 = 1.0 / jnp.sqrt(jnp.float32(2 * H))
    w1 = uni(ks[9], (2 * H, H), g1)
    b1 = uni(ks[10], (1, H), g1)
    g2 = 1.0 / jnp.sqrt(jnp.float32(H))
    w2 = uni(ks[11], (H, 1), g2)
    b2 = uni(ks[12], (1, 1), g2)

    return dict(emb=emb,
                wih_f=wih_f, whh_f=whh_f, bih_f=bih_f, bhh_f=bhh_f,
                wih_b=wih_b, whh_b=whh_b, bih_b=bih_b, bhh_b=bhh_b,
                w1=w1, b1=b1, w2=w2, b2=b2)


def gru_sent_reference(ids, params):
    """Pure-JAX f32 reference (matches the PyTorch forward)."""
    H = HID_DIM
    emb = jnp.take(params["emb"], ids, axis=0)          # (B, T, E)
    x = jnp.transpose(emb, (1, 0, 2)).astype(jnp.float32)

    def cell(x_t, h, wih, whh, b_ih, b_hh):
        gi = x_t @ wih + b_ih
        gh = h @ whh + b_hh
        r = jax.nn.sigmoid(gi[:, :H] + gh[:, :H])
        z = jax.nn.sigmoid(gi[:, H:2 * H] + gh[:, H:2 * H])
        n = jnp.tanh(gi[:, 2 * H:] + r * gh[:, 2 * H:])
        return (1.0 - z) * n + z * h

    B = ids.shape[0]
    h0 = jnp.zeros((B, H), jnp.float32)
    h_f = lax.fori_loop(0, x.shape[0], lambda t, h: cell(
        x[t], h, params["wih_f"], params["whh_f"], params["bih_f"], params["bhh_f"]), h0)
    h_b = lax.fori_loop(0, x.shape[0], lambda t, h: cell(
        x[x.shape[0] - 1 - t], h, params["wih_b"], params["whh_b"],
        params["bih_b"], params["bhh_b"]), h0)
    h_cat = jnp.concatenate([h_f, h_b], axis=1)
    hid = jnp.maximum(h_cat @ params["w1"] + params["b1"], 0.0)
    return (hid @ params["w2"] + params["b2"])[:, 0]


if __name__ == "__main__":
    key = jax.random.PRNGKey(0)
    k_ids, k_par = jax.random.split(key)

    B, T = 2, 8
    ids = jax.random.randint(k_ids, (B, T), 0, VOCAB, dtype=jnp.int32)
    params = init_params(k_par)
    packed = pack_params(params)

    out = jax.block_until_ready(gru_sent_forward(ids, packed))
    ref = jax.block_until_ready(gru_sent_reference(ids, params))

    assert out.shape == (B,)
    assert jnp.allclose(out, ref, atol=1e-3, rtol=1e-3), (out, ref)

    print("KERNEL_OK")
</pallas_src>

<mosaic_0001>
module attributes {stable_mosaic.version = 11 : i64} {
  func.func @gru_sent_kernel(%arg0: i32, %arg1: memref<1x64x64xf32, #tpu.memory_space<vmem>>, %arg2: memref<64x384xf32, #tpu.memory_space<vmem>>, %arg3: memref<64x384xf32, #tpu.memory_space<vmem>>, %arg4: memref<1x384xf32, #tpu.memory_space<vmem>>, %arg5: memref<1x384xf32, #tpu.memory_space<vmem>>, %arg6: memref<128x384xf32, #tpu.memory_space<vmem>>, %arg7: memref<128x384xf32, #tpu.memory_space<vmem>>, %arg8: memref<1x128xf32, #tpu.memory_space<vmem>>, %arg9: memref<1x128xf32, #tpu.memory_space<vmem>>, %arg10: memref<128x128xf32, #tpu.memory_space<vmem>>, %arg11: memref<128x128xf32, #tpu.memory_space<vmem>>, %arg12: memref<1x128xf32, #tpu.memory_space<vmem>>, %arg13: memref<1x128xf32, #tpu.memory_space<vmem>>, %arg14: memref<1x1xf32, #tpu.memory_space<vmem>>, %arg15: memref<1x8x1xf32, #tpu.memory_space<vmem>>, %arg16: memref<64x384xf32, #tpu.memory_space<vmem>>, %arg17: memref<64x384xf32, #tpu.memory_space<vmem>>) attributes {dimension_semantics = [#tpu.dimension_semantics<parallel>], iteration_bounds = array<i64: 1>, scalar_prefetch = 0 : i64, scratch_operands = 2 : i64, tpu.core_type = #tpu.core_type<tc>, window_params = [{transform_indices = @transform_0, window_bounds = array<i64: 1, 64, 64>}, {pipeline_mode = #tpu.pipeline_mode<synchronous>, transform_indices = @transform_1, window_bounds = array<i64: 64, 384>}, {pipeline_mode = #tpu.pipeline_mode<synchronous>, transform_indices = @transform_2, window_bounds = array<i64: 64, 384>}, {pipeline_mode = #tpu.pipeline_mode<synchronous>, transform_indices = @transform_3, window_bounds = array<i64: 1, 384>}, {pipeline_mode = #tpu.pipeline_mode<synchronous>, transform_indices = @transform_4, window_bounds = array<i64: 1, 384>}, {pipeline_mode = #tpu.pipeline_mode<synchronous>, transform_indices = @transform_5, window_bounds = array<i64: 128, 384>}, {pipeline_mode = #tpu.pipeline_mode<synchronous>, transform_indices = @transform_6, window_bounds = array<i64: 128, 384>}, {pipeline_mode = #tpu.pipeline_mode<synchronous>, transform_indices = @transform_7, window_bounds = array<i64: 1, 128>}, {pipeline_mode = #tpu.pipeline_mode<synchronous>, transform_indices = @transform_8, window_bounds = array<i64: 1, 128>}, {pipeline_mode = #tpu.pipeline_mode<synchronous>, transform_indices = @transform_9, window_bounds = array<i64: 128, 128>}, {pipeline_mode = #tpu.pipeline_mode<synchronous>, transform_indices = @transform_10, window_bounds = array<i64: 128, 128>}, {pipeline_mode = #tpu.pipeline_mode<synchronous>, transform_indices = @transform_11, window_bounds = array<i64: 1, 128>}, {pipeline_mode = #tpu.pipeline_mode<synchronous>, transform_indices = @transform_12, window_bounds = array<i64: 1, 128>}, {pipeline_mode = #tpu.pipeline_mode<synchronous>, transform_indices = @transform_13, window_bounds = array<i64: 1, 1>}, {transform_indices = @transform_14, window_bounds = array<i64: 1, 8, 1>}]} {
    %c0 = arith.constant 0 : index
    %c0_0 = arith.constant 0 : index
    %c0_1 = arith.constant 0 : index
    %0 = vector.load %arg1[%c0, %c0_0, %c0_1] : memref<1x64x64xf32, #tpu.memory_space<vmem>>, vector<1x64x64xf32>
    %1 = vector.shape_cast %0 : vector<1x64x64xf32> to vector<64x64xf32>
    %c0_2 = arith.constant 0 : index
    %c0_3 = arith.constant 0 : index
    %2 = vector.load %arg2[%c0_2, %c0_3] : memref<64x384xf32, #tpu.memory_space<vmem>>, vector<64x384xf32>
    %cst = arith.constant dense<0.000000e+00> : vector<64x384xf32>
    %3 = tpu.matmul %1, %2, %cst {dimension_numbers = #tpu.dot_dimension_numbers<[1], [0], [0], [1], [0, 0, 1, 1], [], []>} : vector<64x64xf32>, vector<64x384xf32>, vector<64x384xf32> -> vector<64x384xf32>
    %c0_4 = arith.constant 0 : index
    %c0_5 = arith.constant 0 : index
    %4 = vector.load %arg4[%c0_4, %c0_5] : memref<1x384xf32, #tpu.memory_space<vmem>>, vector<1x384xf32>
    %5 = vector.broadcast %4 : vector<1x384xf32> to vector<64x384xf32>
    %6 = arith.addf %3, %5 : vector<64x384xf32>
    %c0_6 = arith.constant 0 : index
    %c0_7 = arith.constant 0 : index
    %7 = vector.load %arg16[%c0_6, %c0_7] : memref<64x384xf32, #tpu.memory_space<vmem>>, vector<64x384xf32>
    tpu.vector_store %arg16[%c0_6, %c0_7], %6 {strides = array<i32>} : memref<64x384xf32, #tpu.memory_space<vmem>>, vector<64x384xf32>,
    %c0_8 = arith.constant 0 : index
    %c0_9 = arith.constant 0 : index
    %8 = vector.load %arg3[%c0_8, %c0_9] : memref<64x384xf32, #tpu.memory_space<vmem>>, vector<64x384xf32>
    %cst_10 = arith.constant dense<0.000000e+00> : vector<64x384xf32>
    %9 = tpu.matmul %1, %8, %cst_10 {dimension_numbers = #tpu.dot_dimension_numbers<[1], [0], [0], [1], [0, 0, 1, 1], [], []>} : vector<64x64xf32>, vector<64x384xf32>, vector<64x384xf32> -> vector<64x384xf32>
    %c0_11 = arith.constant 0 : index
    %c0_12 = arith.constant 0 : index
    %10 = vector.load %arg5[%c0_11, %c0_12] : memref<1x384xf32, #tpu.memory_space<vmem>>, vector<1x384xf32>
    %11 = vector.broadcast %10 : vector<1x384xf32> to vector<64x384xf32>
    %12 = arith.addf %9, %11 : vector<64x384xf32>
    %c0_13 = arith.constant 0 : index
    %c0_14 = arith.constant 0 : index
    %13 = vector.load %arg17[%c0_13, %c0_14] : memref<64x384xf32, #tpu.memory_space<vmem>>, vector<64x384xf32>
    tpu.vector_store %arg17[%c0_13, %c0_14], %12 {strides = array<i32>} : memref<64x384xf32, #tpu.memory_space<vmem>>, vector<64x384xf32>,
    %c0_15 = arith.constant 0 : index
    %c0_16 = arith.constant 0 : index
    %14 = vector.load %arg8[%c0_15, %c0_16] : memref<1x128xf32, #tpu.memory_space<vmem>>, vector<1x128xf32>
    %15 = vector.shape_cast %14 : vector<1x128xf32> to vector<1x128xf32>
    %16 = vector.broadcast %15 : vector<1x128xf32> to vector<8x128xf32>
    %c0_17 = arith.constant 0 : index
    %c0_18 = arith.constant 0 : index
    %17 = vector.load %arg9[%c0_17, %c0_18] : memref<1x128xf32, #tpu.memory_space<vmem>>, vector<1x128xf32>
    %18 = vector.shape_cast %17 : vector<1x128xf32> to vector<1x128xf32>
    %19 = vector.broadcast %18 : vector<1x128xf32> to vector<8x128xf32>
    %cst_19 = arith.constant 0.000000e+00 : f32
    %20 = vector.broadcast %cst_19 : f32 to vector<8x128xf32>
    %c0_i32 = arith.constant 0 : i32
    %c0_20 = arith.constant 0 : index
    %c0_21 = arith.constant 0 : index
    %21 = vector.load %arg6[%c0_20, %c0_21] : memref<128x384xf32, #tpu.memory_space<vmem>>, vector<128x384xf32>
    %cst_22 = arith.constant dense<0.000000e+00> : vector<8x384xf32>
    %22 = tpu.matmul %20, %21, %cst_22 {dimension_numbers = #tpu.dot_dimension_numbers<[1], [0], [0], [1], [0, 0, 1, 1], [], []>} : vector<8x128xf32>, vector<128x384xf32>, vector<8x384xf32> -> vector<8x384xf32>
    %c0_23 = arith.constant 0 : index
    %c0_24 = arith.constant 0 : index
    %23 = vector.load %arg7[%c0_23, %c0_24] : memref<128x384xf32, #tpu.memory_space<vmem>>, vector<128x384xf32>
    %cst_25 = arith.constant dense<0.000000e+00> : vector<8x384xf32>
    %24 = tpu.matmul %20, %23, %cst_25 {dimension_numbers = #tpu.dot_dimension_numbers<[1], [0], [0], [1], [0, 0, 1, 1], [], []>} : vector<8x128xf32>, vector<128x384xf32>, vector<8x384xf32> -> vector<8x384xf32>
    %c8_i32 = arith.constant 8 : i32
    %25 = arith.muli %c0_i32, %c8_i32 : i32
    %26 = tpu.assume_multiple %25, 8 : i32
    %c7_i32 = arith.constant 7 : i32
    %27 = arith.subi %c7_i32, %c0_i32 : i32
    %c8_i32_26 = arith.constant 8 : i32
    %28 = arith.muli %27, %c8_i32_26 : i32
    %29 = tpu.assume_multiple %28, 8 : i32
    %30 = arith.index_cast %26 : i32 to index
    %c0_27 = arith.constant 0 : index
    %31 = vector.load %arg16[%30, %c0_27] : memref<64x384xf32, #tpu.memory_space<vmem>>, vector<8x384xf32>
    %32 = arith.index_cast %29 : i32 to index
    %c0_28 = arith.constant 0 : index
    %33 = vector.load %arg17[%32, %c0_28] : memref<64x384xf32, #tpu.memory_space<vmem>>, vector<8x384xf32>
    %34 = vector.extract_strided_slice %31 {offsets = [0, 0], sizes = [8, 128], strides = [1, 1]} : vector<8x384xf32> to vector<8x128xf32>
    %35 = vector.extract_strided_slice %22 {offsets = [0, 0], sizes = [8, 128], strides = [1, 1]} : vector<8x384xf32> to vector<8x128xf32>
    %36 = arith.addf %34, %35 : vector<8x128xf32>
    %37 = arith.negf %36 : vector<8x128xf32>
    %38 = math.exp %37 : vector<8x128xf32>
    %cst_29 = arith.constant 1.000000e+00 : f32
    %39 = vector.broadcast %cst_29 : f32 to vector<8x128xf32>
    %40 = arith.addf %39, %38 : vector<8x128xf32>
    %41 = arith.divf %39, %40 : vector<8x128xf32>
    %42 = vector.extract_strided_slice %31 {offsets = [0, 128], sizes = [8, 128], strides = [1, 1]} : vector<8x384xf32> to vector<8x128xf32>
    %43 = vector.extract_strided_slice %22 {offsets = [0, 128], sizes = [8, 128], strides = [1, 1]} : vector<8x384xf32> to vector<8x128xf32>
    %44 = arith.addf %42, %43 : vector<8x128xf32>
    %45 = arith.negf %44 : vector<8x128xf32>
    %46 = math.exp %45 : vector<8x128xf32>
    %cst_30 = arith.constant 1.000000e+00 : f32
    %47 = vector.broadcast %cst_30 : f32 to vector<8x128xf32>
    %48 = arith.addf %47, %46 : vector<8x128xf32>
    %49 = arith.divf %47, %48 : vector<8x128xf32>
    %50 = vector.extract_strided_slice %31 {offsets = [0, 256], sizes = [8, 128], strides = [1, 1]} : vector<8x384xf32> to vector<8x128xf32>
    %51 = vector.extract_strided_slice %22 {offsets = [0, 256], sizes = [8, 128], strides = [1, 1]} : vector<8x384xf32> to vector<8x128xf32>
    %52 = arith.addf %51, %16 : vector<8x128xf32>
    %53 = arith.mulf %41, %52 : vector<8x128xf32>
    %54 = arith.addf %50, %53 : vector<8x128xf32>
    %55 = math.tanh %54 : vector<8x128xf32>
    %cst_31 = arith.constant 1.000000e+00 : f32
    %56 = vector.broadcast %cst_31 : f32 to vector<8x128xf32>
    %57 = arith.subf %56, %49 : vector<8x128xf32>
    %58 = arith.mulf %57, %55 : vector<8x128xf32>
    %59 = arith.mulf %49, %20 : vector<8x128xf32>
    %60 = arith.addf %58, %59 : vector<8x128xf32>
    %61 = vector.extract_strided_slice %33 {offsets = [0, 0], sizes = [8, 128], strides = [1, 1]} : vector<8x384xf32> to vector<8x128xf32>
    %62 = vector.extract_strided_slice %24 {offsets = [0, 0], sizes = [8, 128], strides = [1, 1]} : vector<8x384xf32> to vector<8x128xf32>
    %63 = arith.addf %61, %62 : vector<8x128xf32>
    %64 = arith.negf %63 : vector<8x128xf32>
    %65 = math.exp %64 : vector<8x128xf32>
    %cst_32 = arith.constant 1.000000e+00 : f32
    %66 = vector.broadcast %cst_32 : f32 to vector<8x128xf32>
    %67 = arith.addf %66, %65 : vector<8x128xf32>
    %68 = arith.divf %66, %67 : vector<8x128xf32>
    %69 = vector.extract_strided_slice %33 {offsets = [0, 128], sizes = [8, 128], strides = [1, 1]} : vector<8x384xf32> to vector<8x128xf32>
    %70 = vector.extract_strided_slice %24 {offsets = [0, 128], sizes = [8, 128], strides = [1, 1]} : vector<8x384xf32> to vector<8x128xf32>
    %71 = arith.addf %69, %70 : vector<8x128xf32>
    %72 = arith.negf %71 : vector<8x128xf32>
    %73 = math.exp %72 : vector<8x128xf32>
    %cst_33 = arith.constant 1.000000e+00 : f32
    %74 = vector.broadcast %cst_33 : f32 to vector<8x128xf32>
    %75 = arith.addf %74, %73 : vector<8x128xf32>
    %76 = arith.divf %74, %75 : vector<8x128xf32>
    %77 = vector.extract_strided_slice %33 {offsets = [0, 256], sizes = [8, 128], strides = [1, 1]} : vector<8x384xf32> to vector<8x128xf32>
    %78 = vector.extract_strided_slice %24 {offsets = [0, 256], sizes = [8, 128], strides = [1, 1]} : vector<8x384xf32> to vector<8x128xf32>
    %79 = arith.addf %78, %19 : vector<8x128xf32>
    %80 = arith.mulf %68, %79 : vector<8x128xf32>
    %81 = arith.addf %77, %80 : vector<8x128xf32>
    %82 = math.tanh %81 : vector<8x128xf32>
    %cst_34 = arith.constant 1.000000e+00 : f32
    %83 = vector.broadcast %cst_34 : f32 to vector<8x128xf32>
    %84 = arith.subf %83, %76 : vector<8x128xf32>
    %85 = arith.mulf %84, %82 : vector<8x128xf32>
    %86 = arith.mulf %76, %20 : vector<8x128xf32>
    %87 = arith.addf %85, %86 : vector<8x128xf32>
    %c1_i32 = arith.constant 1 : i32
    %c0_35 = arith.constant 0 : index
    %c0_36 = arith.constant 0 : index
    %88 = vector.load %arg6[%c0_35, %c0_36] : memref<128x384xf32, #tpu.memory_space<vmem>>, vector<128x384xf32>
    %cst_37 = arith.constant dense<0.000000e+00> : vector<8x384xf32>
    %89 = tpu.matmul %60, %88, %cst_37 {dimension_numbers = #tpu.dot_dimension_numbers<[1], [0], [0], [1], [0, 0, 1, 1], [], []>} : vector<8x128xf32>, vector<128x384xf32>, vector<8x384xf32> -> vector<8x384xf32>
    %c0_38 = arith.constant 0 : index
    %c0_39 = arith.constant 0 : index
    %90 = vector.load %arg7[%c0_38, %c0_39] : memref<128x384xf32, #tpu.memory_space<vmem>>, vector<128x384xf32>
    %cst_40 = arith.constant dense<0.000000e+00> : vector<8x384xf32>
    %91 = tpu.matmul %87, %90, %cst_40 {dimension_numbers = #tpu.dot_dimension_numbers<[1], [0], [0], [1], [0, 0, 1, 1], [], []>} : vector<8x128xf32>, vector<128x384xf32>, vector<8x384xf32> -> vector<8x384xf32>
    %c8_i32_41 = arith.constant 8 : i32
    %92 = arith.muli %c1_i32, %c8_i32_41 : i32
    %93 = tpu.assume_multiple %92, 8 : i32
    %c7_i32_42 = arith.constant 7 : i32
    %94 = arith.subi %c7_i32_42, %c1_i32 : i32
    %c8_i32_43 = arith.constant 8 : i32
    %95 = arith.muli %94, %c8_i32_43 : i32
    %96 = tpu.assume_multiple %95, 8 : i32
    %97 = arith.index_cast %93 : i32 to index
    %c0_44 = arith.constant 0 : index
    %98 = vector.load %arg16[%97, %c0_44] : memref<64x384xf32, #tpu.memory_space<vmem>>, vector<8x384xf32>
    %99 = arith.index_cast %96 : i32 to index
    %c0_45 = arith.constant 0 : index
    %100 = vector.load %arg17[%99, %c0_45] : memref<64x384xf32, #tpu.memory_space<vmem>>, vector<8x384xf32>
    %101 = vector.extract_strided_slice %98 {offsets = [0, 0], sizes = [8, 128], strides = [1, 1]} : vector<8x384xf32> to vector<8x128xf32>
    %102 = vector.extract_strided_slice %89 {offsets = [0, 0], sizes = [8, 128], strides = [1, 1]} : vector<8x384xf32> to vector<8x128xf32>
    %103 = arith.addf %101, %102 : vector<8x128xf32>
    %104 = arith.negf %103 : vector<8x128xf32>
    %105 = math.exp %104 : vector<8x128xf32>
    %cst_46 = arith.constant 1.000000e+00 : f32
    %106 = vector.broadcast %cst_46 : f32 to vector<8x128xf32>
    %107 = arith.addf %106, %105 : vector<8x128xf32>
    %108 = arith.divf %106, %107 : vector<8x128xf32>
    %109 = vector.extract_strided_slice %98 {offsets = [0, 128], sizes = [8, 128], strides = [1, 1]} : vector<8x384xf32> to vector<8x128xf32>
    %110 = vector.extract_strided_slice %89 {offsets = [0, 128], sizes = [8, 128], strides = [1, 1]} : vector<8x384xf32> to vector<8x128xf32>
    %111 = arith.addf %109, %110 : vector<8x128xf32>
    %112 = arith.negf %111 : vector<8x128xf32>
    %113 = math.exp %112 : vector<8x128xf32>
    %cst_47 = arith.constant 1.000000e+00 : f32
    %114 = vector.broadcast %cst_47 : f32 to vector<8x128xf32>
    %115 = arith.addf %114, %113 : vector<8x128xf32>
    %116 = arith.divf %114, %115 : vector<8x128xf32>
    %117 = vector.extract_strided_slice %98 {offsets = [0, 256], sizes = [8, 128], strides = [1, 1]} : vector<8x384xf32> to vector<8x128xf32>
    %118 = vector.extract_strided_slice %89 {offsets = [0, 256], sizes = [8, 128], strides = [1, 1]} : vector<8x384xf32> to vector<8x128xf32>
    %119 = arith.addf %118, %16 : vector<8x128xf32>
    %120 = arith.mulf %108, %119 : vector<8x128xf32>
    %121 = arith.addf %117, %120 : vector<8x128xf32>
    %122 = math.tanh %121 : vector<8x128xf32>
    %cst_48 = arith.constant 1.000000e+00 : f32
    %123 = vector.broadcast %cst_48 : f32 to vector<8x128xf32>
    %124 = arith.subf %123, %116 : vector<8x128xf32>
    %125 = arith.mulf %124, %122 : vector<8x128xf32>
    %126 = arith.mulf %116, %60 : vector<8x128xf32>
    %127 = arith.addf %125, %126 : vector<8x128xf32>
    %128 = vector.extract_strided_slice %100 {offsets = [0, 0], sizes = [8, 128], strides = [1, 1]} : vector<8x384xf32> to vector<8x128xf32>
    %129 = vector.extract_strided_slice %91 {offsets = [0, 0], sizes = [8, 128], strides = [1, 1]} : vector<8x384xf32> to vector<8x128xf32>
    %130 = arith.addf %128, %129 : vector<8x128xf32>
    %131 = arith.negf %130 : vector<8x128xf32>
    %132 = math.exp %131 : vector<8x128xf32>
    %cst_49 = arith.constant 1.000000e+00 : f32
    %133 = vector.broadcast %cst_49 : f32 to vector<8x128xf32>
    %134 = arith.addf %133, %132 : vector<8x128xf32>
    %135 = arith.divf %133, %134 : vector<8x128xf32>
    %136 = vector.extract_strided_slice %100 {offsets = [0, 128], sizes = [8, 128], strides = [1, 1]} : vector<8x384xf32> to vector<8x128xf32>
    %137 = vector.extract_strided_slice %91 {offsets = [0, 128], sizes = [8, 128], strides = [1, 1]} : vector<8x384xf32> to vector<8x128xf32>
    %138 = arith.addf %136, %137 : vector<8x128xf32>
    %139 = arith.negf %138 : vector<8x128xf32>
    %140 = math.exp %139 : vector<8x128xf32>
    %cst_50 = arith.constant 1.000000e+00 : f32
    %141 = vector.broadcast %cst_50 : f32 to vector<8x128xf32>
    %142 = arith.addf %141, %140 : vector<8x128xf32>
    %143 = arith.divf %141, %142 : vector<8x128xf32>
    %144 = vector.extract_strided_slice %100 {offsets = [0, 256], sizes = [8, 128], strides = [1, 1]} : vector<8x384xf32> to vector<8x128xf32>
    %145 = vector.extract_strided_slice %91 {offsets = [0, 256], sizes = [8, 128], strides = [1, 1]} : vector<8x384xf32> to vector<8x128xf32>
    %146 = arith.addf %145, %19 : vector<8x128xf32>
    %147 = arith.mulf %135, %146 : vector<8x128xf32>
    %148 = arith.addf %144, %147 : vector<8x128xf32>
    %149 = math.tanh %148 : vector<8x128xf32>
    %cst_51 = arith.constant 1.000000e+00 : f32
    %150 = vector.broadcast %cst_51 : f32 to vector<8x128xf32>
    %151 = arith.subf %150, %143 : vector<8x128xf32>
    %152 = arith.mulf %151, %149 : vector<8x128xf32>
    %153 = arith.mulf %143, %87 : vector<8x128xf32>
    %154 = arith.addf %152, %153 : vector<8x128xf32>
    %c2_i32 = arith.constant 2 : i32
    %c0_52 = arith.constant 0 : index
    %c0_53 = arith.constant 0 : index
    %155 = vector.load %arg6[%c0_52, %c0_53] : memref<128x384xf32, #tpu.memory_space<vmem>>, vector<128x384xf32>
    %cst_54 = arith.constant dense<0.000000e+00> : vector<8x384xf32>
    %156 = tpu.matmul %127, %155, %cst_54 {dimension_numbers = #tpu.dot_dimension_numbers<[1], [0], [0], [1], [0, 0, 1, 1], [], []>} : vector<8x128xf32>, vector<128x384xf32>, vector<8x384xf32> -> vector<8x384xf32>
    %c0_55 = arith.constant 0 : index
    %c0_56 = arith.constant 0 : index
    %157 = vector.load %arg7[%c0_55, %c0_56] : memref<128x384xf32, #tpu.memory_space<vmem>>, vector<128x384xf32>
    %cst_57 = arith.constant dense<0.000000e+00> : vector<8x384xf32>
    %158 = tpu.matmul %154, %157, %cst_57 {dimension_numbers = #tpu.dot_dimension_numbers<[1], [0], [0], [1], [0, 0, 1, 1], [], []>} : vector<8x128xf32>, vector<128x384xf32>, vector<8x384xf32> -> vector<8x384xf32>
    %c8_i32_58 = arith.constant 8 : i32
    %159 = arith.muli %c2_i32, %c8_i32_58 : i32
    %160 = tpu.assume_multiple %159, 8 : i32
    %c7_i32_59 = arith.constant 7 : i32
    %161 = arith.subi %c7_i32_59, %c2_i32 : i32
    %c8_i32_60 = arith.constant 8 : i32
    %162 = arith.muli %161, %c8_i32_60 : i32
    %163 = tpu.assume_multiple %162, 8 : i32
    %164 = arith.index_cast %160 : i32 to index
    %c0_61 = arith.constant 0 : index
    %165 = vector.load %arg16[%164, %c0_61] : memref<64x384xf32, #tpu.memory_space<vmem>>, vector<8x384xf32>
    %166 = arith.index_cast %163 : i32 to index
    %c0_62 = arith.constant 0 : index
    %167 = vector.load %arg17[%166, %c0_62] : memref<64x384xf32, #tpu.memory_space<vmem>>, vector<8x384xf32>
    %168 = vector.extract_strided_slice %165 {offsets = [0, 0], sizes = [8, 128], strides = [1, 1]} : vector<8x384xf32> to vector<8x128xf32>
    %169 = vector.extract_strided_slice %156 {offsets = [0, 0], sizes = [8, 128], strides = [1, 1]} : vector<8x384xf32> to vector<8x128xf32>
    %170 = arith.addf %168, %169 : vector<8x128xf32>
    %171 = arith.negf %170 : vector<8x128xf32>
    %172 = math.exp %171 : vector<8x128xf32>
    %cst_63 = arith.constant 1.000000e+00 : f32
    %173 = vector.broadcast %cst_63 : f32 to vector<8x128xf32>
    %174 = arith.addf %173, %172 : vector<8x128xf32>
    %175 = arith.divf %173, %174 : vector<8x128xf32>
    %176 = vector.extract_strided_slice %165 {offsets = [0, 128], sizes = [8, 128], strides = [1, 1]} : vector<8x384xf32> to vector<8x128xf32>
    %177 = vector.extract_strided_slice %156 {offsets = [0, 128], sizes = [8, 128], strides = [1, 1]} : vector<8x384xf32> to vector<8x128xf32>
    %178 = arith.addf %176, %177 : vector<8x128xf32>
    %179 = arith.negf %178 : vector<8x128xf32>
    %180 = math.exp %179 : vector<8x128xf32>
    %cst_64 = arith.constant 1.000000e+00 : f32
    %181 = vector.broadcast %cst_64 : f32 to vector<8x128xf32>
    %182 = arith.addf %181, %180 : vector<8x128xf32>
    %183 = arith.divf %181, %182 : vector<8x128xf32>
    %184 = vector.extract_strided_slice %165 {offsets = [0, 256], sizes = [8, 128], strides = [1, 1]} : vector<8x384xf32> to vector<8x128xf32>
    %185 = vector.extract_strided_slice %156 {offsets = [0, 256], sizes = [8, 128], strides = [1, 1]} : vector<8x384xf32> to vector<8x128xf32>
    %186 = arith.addf %185, %16 : vector<8x128xf32>
    %187 = arith.mulf %175, %186 : vector<8x128xf32>
    %188 = arith.addf %184, %187 : vector<8x128xf32>
    %189 = math.tanh %188 : vector<8x128xf32>
    %cst_65 = arith.constant 1.000000e+00 : f32
    %190 = vector.broadcast %cst_65 : f32 to vector<8x128xf32>
    %191 = arith.subf %190, %183 : vector<8x128xf32>
    %192 = arith.mulf %191, %189 : vector<8x128xf32>
    %193 = arith.mulf %183, %127 : vector<8x128xf32>
    %194 = arith.addf %192, %193 : vector<8x128xf32>
    %195 = vector.extract_strided_slice %167 {offsets = [0, 0], sizes = [8, 128], strides = [1, 1]} : vector<8x384xf32> to vector<8x128xf32>
    %196 = vector.extract_strided_slice %158 {offsets = [0, 0], sizes = [8, 128], strides = [1, 1]} : vector<8x384xf32> to vector<8x128xf32>
    %197 = arith.addf %195, %196 : vector<8x128xf32>
    %198 = arith.negf %197 : vector<8x128xf32>
    %199 = math.exp %198 : vector<8x128xf32>
    %cst_66 = arith.constant 1.000000e+00 : f32
    %200 = vector.broadcast %cst_66 : f32 to vector<8x128xf32>
    %201 = arith.addf %200, %199 : vector<8x128xf32>
    %202 = arith.divf %200, %201 : vector<8x128xf32>
    %203 = vector.extract_strided_slice %167 {offsets = [0, 128], sizes = [8, 128], strides = [1, 1]} : vector<8x384xf32> to vector<8x128xf32>
    %204 = vector.extract_strided_slice %158 {offsets = [0, 128], sizes = [8, 128], strides = [1, 1]} : vector<8x384xf32> to vector<8x128xf32>
    %205 = arith.addf %203, %204 : vector<8x128xf32>
    %206 = arith.negf %205 : vector<8x128xf32>
    %207 = math.exp %206 : vector<8x128xf32>
    %cst_67 = arith.constant 1.000000e+00 : f32
    %208 = vector.broadcast %cst_67 : f32 to vector<8x128xf32>
    %209 = arith.addf %208, %207 : vector<8x128xf32>
    %210 = arith.divf %208, %209 : vector<8x128xf32>
    %211 = vector.extract_strided_slice %167 {offsets = [0, 256], sizes = [8, 128], strides = [1, 1]} : vector<8x384xf32> to vector<8x128xf32>
    %212 = vector.extract_strided_slice %158 {offsets = [0, 256], sizes = [8, 128], strides = [1, 1]} : vector<8x384xf32> to vector<8x128xf32>
    %213 = arith.addf %212, %19 : vector<8x128xf32>
    %214 = arith.mulf %202, %213 : vector<8x128xf32>
    %215 = arith.addf %211, %214 : vector<8x128xf32>
    %216 = math.tanh %215 : vector<8x128xf32>
    %cst_68 = arith.constant 1.000000e+00 : f32
    %217 = vector.broadcast %cst_68 : f32 to vector<8x128xf32>
    %218 = arith.subf %217, %210 : vector<8x128xf32>
    %219 = arith.mulf %218, %216 : vector<8x128xf32>
    %220 = arith.mulf %210, %154 : vector<8x128xf32>
    %221 = arith.addf %219, %220 : vector<8x128xf32>
    %c3_i32 = arith.constant 3 : i32
    %c0_69 = arith.constant 0 : index
    %c0_70 = arith.constant 0 : index
    %222 = vector.load %arg6[%c0_69, %c0_70] : memref<128x384xf32, #tpu.memory_space<vmem>>, vector<128x384xf32>
    %cst_71 = arith.constant dense<0.000000e+00> : vector<8x384xf32>
    %223 = tpu.matmul %194, %222, %cst_71 {dimension_numbers = #tpu.dot_dimension_numbers<[1], [0], [0], [1], [0, 0, 1, 1], [], []>} : vector<8x128xf32>, vector<128x384xf32>, vector<8x384xf32> -> vector<8x384xf32>
    %c0_72 = arith.constant 0 : index
    %c0_73 = arith.constant 0 : index
    %224 = vector.load %arg7[%c0_72, %c0_73] : memref<128x384xf32, #tpu.memory_space<vmem>>, vector<128x384xf32>
    %cst_74 = arith.constant dense<0.000000e+00> : vector<8x384xf32>
    %225 = tpu.matmul %221, %224, %cst_74 {dimension_numbers = #tpu.dot_dimension_numbers<[1], [0], [0], [1], [0, 0, 1, 1], [], []>} : vector<8x128xf32>, vector<128x384xf32>, vector<8x384xf32> -> vector<8x384xf32>
    %c8_i32_75 = arith.constant 8 : i32
    %226 = arith.muli %c3_i32, %c8_i32_75 : i32
    %227 = tpu.assume_multiple %226, 8 : i32
    %c7_i32_76 = arith.constant 7 : i32
    %228 = arith.subi %c7_i32_76, %c3_i32 : i32
    %c8_i32_77 = arith.constant 8 : i32
    %229 = arith.muli %228, %c8_i32_77 : i32
    %230 = tpu.assume_multiple %229, 8 : i32
    %231 = arith.index_cast %227 : i32 to index
    %c0_78 = arith.constant 0 : index
    %232 = vector.load %arg16[%231, %c0_78] : memref<64x384xf32, #tpu.memory_space<vmem>>, vector<8x384xf32>
    %233 = arith.index_cast %230 : i32 to index
    %c0_79 = arith.constant 0 : index
    %234 = vector.load %arg17[%233, %c0_79] : memref<64x384xf32, #tpu.memory_space<vmem>>, vector<8x384xf32>
    %235 = vector.extract_strided_slice %232 {offsets = [0, 0], sizes = [8, 128], strides = [1, 1]} : vector<8x384xf32> to vector<8x128xf32>
    %236 = vector.extract_strided_slice %223 {offsets = [0, 0], sizes = [8, 128], strides = [1, 1]} : vector<8x384xf32> to vector<8x128xf32>
    %237 = arith.addf %235, %236 : vector<8x128xf32>
    %238 = arith.negf %237 : vector<8x128xf32>
    %239 = math.exp %238 : vector<8x128xf32>
    %cst_80 = arith.constant 1.000000e+00 : f32
    %240 = vector.broadcast %cst_80 : f32 to vector<8x128xf32>
    %241 = arith.addf %240, %239 : vector<8x128xf32>
    %242 = arith.divf %240, %241 : vector<8x128xf32>
    %243 = vector.extract_strided_slice %232 {offsets = [0, 128], sizes = [8, 128], strides = [1, 1]} : vector<8x384xf32> to vector<8x128xf32>
    %244 = vector.extract_strided_slice %223 {offsets = [0, 128], sizes = [8, 128], strides = [1, 1]} : vector<8x384xf32> to vector<8x128xf32>
    %245 = arith.addf %243, %244 : vector<8x128xf32>
    %246 = arith.negf %245 : vector<8x128xf32>
    %247 = math.exp %246 : vector<8x128xf32>
    %cst_81 = arith.constant 1.000000e+00 : f32
    %248 = vector.broadcast %cst_81 : f32 to vector<8x128xf32>
    %249 = arith.addf %248, %247 : vector<8x128xf32>
    %250 = arith.divf %248, %249 : vector<8x128xf32>
    %251 = vector.extract_strided_slice %232 {offsets = [0, 256], sizes = [8, 128], strides = [1, 1]} : vector<8x384xf32> to vector<8x128xf32>
    %252 = vector.extract_strided_slice %223 {offsets = [0, 256], sizes = [8, 128], strides = [1, 1]} : vector<8x384xf32> to vector<8x128xf32>
    %253 = arith.addf %252, %16 : vector<8x128xf32>
    %254 = arith.mulf %242, %253 : vector<8x128xf32>
    %255 = arith.addf %251, %254 : vector<8x128xf32>
    %256 = math.tanh %255 : vector<8x128xf32>
    %cst_82 = arith.constant 1.000000e+00 : f32
    %257 = vector.broadcast %cst_82 : f32 to vector<8x128xf32>
    %258 = arith.subf %257, %250 : vector<8x128xf32>
    %259 = arith.mulf %258, %256 : vector<8x128xf32>
    %260 = arith.mulf %250, %194 : vector<8x128xf32>
    %261 = arith.addf %259, %260 : vector<8x128xf32>
    %262 = vector.extract_strided_slice %234 {offsets = [0, 0], sizes = [8, 128], strides = [1, 1]} : vector<8x384xf32> to vector<8x128xf32>
    %263 = vector.extract_strided_slice %225 {offsets = [0, 0], sizes = [8, 128], strides = [1, 1]} : vector<8x384xf32> to vector<8x128xf32>
    %264 = arith.addf %262, %263 : vector<8x128xf32>
    %265 = arith.negf %264 : vector<8x128xf32>
    %266 = math.exp %265 : vector<8x128xf32>
    %cst_83 = arith.constant 1.000000e+00 : f32
    %267 = vector.broadcast %cst_83 : f32 to vector<8x128xf32>
    %268 = arith.addf %267, %266 : vector<8x128xf32>
    %269 = arith.divf %267, %268 : vector<8x128xf32>
    %270 = vector.extract_strided_slice %234 {offsets = [0, 128], sizes = [8, 128], strides = [1, 1]} : vector<8x384xf32> to vector<8x128xf32>
    %271 = vector.extract_strided_slice %225 {offsets = [0, 128], sizes = [8, 128], strides = [1, 1]} : vector<8x384xf32> to vector<8x128xf32>
    %272 = arith.addf %270, %271 : vector<8x128xf32>
    %273 = arith.negf %272 : vector<8x128xf32>
    %274 = math.exp %273 : vector<8x128xf32>
    %cst_84 = arith.constant 1.000000e+00 : f32
    %275 = vector.broadcast %cst_84 : f32 to vector<8x128xf32>
    %276 = arith.addf %275, %274 : vector<8x128xf32>
    %277 = arith.divf %275, %276 : vector<8x128xf32>
    %278 = vector.extract_strided_slice %234 {offsets = [0, 256], sizes = [8, 128], strides = [1, 1]} : vector<8x384xf32> to vector<8x128xf32>
    %279 = vector.extract_strided_slice %225 {offsets = [0, 256], sizes = [8, 128], strides = [1, 1]} : vector<8x384xf32> to vector<8x128xf32>
    %280 = arith.addf %279, %19 : vector<8x128xf32>
    %281 = arith.mulf %269, %280 : vector<8x128xf32>
    %282 = arith.addf %278, %281 : vector<8x128xf32>
    %283 = math.tanh %282 : vector<8x128xf32>
    %cst_85 = arith.constant 1.000000e+00 : f32
    %284 = vector.broadcast %cst_85 : f32 to vector<8x128xf32>
    %285 = arith.subf %284, %277 : vector<8x128xf32>
    %286 = arith.mulf %285, %283 : vector<8x128xf32>
    %287 = arith.mulf %277, %221 : vector<8x128xf32>
    %288 = arith.addf %286, %287 : vector<8x128xf32>
    %c4_i32 = arith.constant 4 : i32
    %c0_86 = arith.constant 0 : index
    %c0_87 = arith.constant 0 : index
    %289 = vector.load %arg6[%c0_86, %c0_87] : memref<128x384xf32, #tpu.memory_space<vmem>>, vector<128x384xf32>
    %cst_88 = arith.constant dense<0.000000e+00> : vector<8x384xf32>
    %290 = tpu.matmul %261, %289, %cst_88 {dimension_numbers = #tpu.dot_dimension_numbers<[1], [0], [0], [1], [0, 0, 1, 1], [], []>} : vector<8x128xf32>, vector<128x384xf32>, vector<8x384xf32> -> vector<8x384xf32>
    %c0_89 = arith.constant 0 : index
    %c0_90 = arith.constant 0 : index
    %291 = vector.load %arg7[%c0_89, %c0_90] : memref<128x384xf32, #tpu.memory_space<vmem>>, vector<128x384xf32>
    %cst_91 = arith.constant dense<0.000000e+00> : vector<8x384xf32>
    %292 = tpu.matmul %288, %291, %cst_91 {dimension_numbers = #tpu.dot_dimension_numbers<[1], [0], [0], [1], [0, 0, 1, 1], [], []>} : vector<8x128xf32>, vector<128x384xf32>, vector<8x384xf32> -> vector<8x384xf32>
    %c8_i32_92 = arith.constant 8 : i32
    %293 = arith.muli %c4_i32, %c8_i32_92 : i32
    %294 = tpu.assume_multiple %293, 8 : i32
    %c7_i32_93 = arith.constant 7 : i32
    %295 = arith.subi %c7_i32_93, %c4_i32 : i32
    %c8_i32_94 = arith.constant 8 : i32
    %296 = arith.muli %295, %c8_i32_94 : i32
    %297 = tpu.assume_multiple %296, 8 : i32
    %298 = arith.index_cast %294 : i32 to index
    %c0_95 = arith.constant 0 : index
    %299 = vector.load %arg16[%298, %c0_95] : memref<64x384xf32, #tpu.memory_space<vmem>>, vector<8x384xf32>
    %300 = arith.index_cast %297 : i32 to index
    %c0_96 = arith.constant 0 : index
    %301 = vector.load %arg17[%300, %c0_96] : memref<64x384xf32, #tpu.memory_space<vmem>>, vector<8x384xf32>
    %302 = vector.extract_strided_slice %299 {offsets = [0, 0], sizes = [8, 128], strides = [1, 1]} : vector<8x384xf32> to vector<8x128xf32>
    %303 = vector.extract_strided_slice %290 {offsets = [0, 0], sizes = [8, 128], strides = [1, 1]} : vector<8x384xf32> to vector<8x128xf32>
    %304 = arith.addf %302, %303 : vector<8x128xf32>
    %305 = arith.negf %304 : vector<8x128xf32>
    %306 = math.exp %305 : vector<8x128xf32>
    %cst_97 = arith.constant 1.000000e+00 : f32
    %307 = vector.broadcast %cst_97 : f32 to vector<8x128xf32>
    %308 = arith.addf %307, %306 : vector<8x128xf32>
    %309 = arith.divf %307, %308 : vector<8x128xf32>
    %310 = vector.extract_strided_slice %299 {offsets = [0, 128], sizes = [8, 128], strides = [1, 1]} : vector<8x384xf32> to vector<8x128xf32>
    %311 = vector.extract_strided_slice %290 {offsets = [0, 128], sizes = [8, 128], strides = [1, 1]} : vector<8x384xf32> to vector<8x128xf32>
    %312 = arith.addf %310, %311 : vector<8x128xf32>
    %313 = arith.negf %312 : vector<8x128xf32>
    %314 = math.exp %313 : vector<8x128xf32>
    %cst_98 = arith.constant 1.000000e+00 : f32
    %315 = vector.broadcast %cst_98 : f32 to vector<8x128xf32>
    %316 = arith.addf %315, %314 : vector<8x128xf32>
    %317 = arith.divf %315, %316 : vector<8x128xf32>
    %318 = vector.extract_strided_slice %299 {offsets = [0, 256], sizes = [8, 128], strides = [1, 1]} : vector<8x384xf32> to vector<8x128xf32>
    %319 = vector.extract_strided_slice %290 {offsets = [0, 256], sizes = [8, 128], strides = [1, 1]} : vector<8x384xf32> to vector<8x128xf32>
    %320 = arith.addf %319, %16 : vector<8x128xf32>
    %321 = arith.mulf %309, %320 : vector<8x128xf32>
    %322 = arith.addf %318, %321 : vector<8x128xf32>
    %323 = math.tanh %322 : vector<8x128xf32>
    %cst_99 = arith.constant 1.000000e+00 : f32
    %324 = vector.broadcast %cst_99 : f32 to vector<8x128xf32>
    %325 = arith.subf %324, %317 : vector<8x128xf32>
    %326 = arith.mulf %325, %323 : vector<8x128xf32>
    %327 = arith.mulf %317, %261 : vector<8x128xf32>
    %328 = arith.addf %326, %327 : vector<8x128xf32>
    %329 = vector.extract_strided_slice %301 {offsets = [0, 0], sizes = [8, 128], strides = [1, 1]} : vector<8x384xf32> to vector<8x128xf32>
    %330 = vector.extract_strided_slice %292 {offsets = [0, 0], sizes = [8, 128], strides = [1, 1]} : vector<8x384xf32> to vector<8x128xf32>
    %331 = arith.addf %329, %330 : vector<8x128xf32>
    %332 = arith.negf %331 : vector<8x128xf32>
    %333 = math.exp %332 : vector<8x128xf32>
    %cst_100 = arith.constant 1.000000e+00 : f32
    %334 = vector.broadcast %cst_100 : f32 to vector<8x128xf32>
    %335 = arith.addf %334, %333 : vector<8x128xf32>
    %336 = arith.divf %334, %335 : vector<8x128xf32>
    %337 = vector.extract_strided_slice %301 {offsets = [0, 128], sizes = [8, 128], strides = [1, 1]} : vector<8x384xf32> to vector<8x128xf32>
    %338 = vector.extract_strided_slice %292 {offsets = [0, 128], sizes = [8, 128], strides = [1, 1]} : vector<8x384xf32> to vector<8x128xf32>
    %339 = arith.addf %337, %338 : vector<8x128xf32>
    %340 = arith.negf %339 : vector<8x128xf32>
    %341 = math.exp %340 : vector<8x128xf32>
    %cst_101 = arith.constant 1.000000e+00 : f32
    %342 = vector.broadcast %cst_101 : f32 to vector<8x128xf32>
    %343 = arith.addf %342, %341 : vector<8x128xf32>
    %344 = arith.divf %342, %343 : vector<8x128xf32>
    %345 = vector.extract_strided_slice %301 {offsets = [0, 256], sizes = [8, 128], strides = [1, 1]} : vector<8x384xf32> to vector<8x128xf32>
    %346 = vector.extract_strided_slice %292 {offsets = [0, 256], sizes = [8, 128], strides = [1, 1]} : vector<8x384xf32> to vector<8x128xf32>
    %347 = arith.addf %346, %19 : vector<8x128xf32>
    %348 = arith.mulf %336, %347 : vector<8x128xf32>
    %349 = arith.addf %345, %348 : vector<8x128xf32>
    %350 = math.tanh %349 : vector<8x128xf32>
    %cst_102 = arith.constant 1.000000e+00 : f32
    %351 = vector.broadcast %cst_102 : f32 to vector<8x128xf32>
    %352 = arith.subf %351, %344 : vector<8x128xf32>
    %353 = arith.mulf %352, %350 : vector<8x128xf32>
    %354 = arith.mulf %344, %288 : vector<8x128xf32>
    %355 = arith.addf %353, %354 : vector<8x128xf32>
    %c5_i32 = arith.constant 5 : i32
    %c0_103 = arith.constant 0 : index
    %c0_104 = arith.constant 0 : index
    %356 = vector.load %arg6[%c0_103, %c0_104] : memref<128x384xf32, #tpu.memory_space<vmem>>, vector<128x384xf32>
    %cst_105 = arith.constant dense<0.000000e+00> : vector<8x384xf32>
    %357 = tpu.matmul %328, %356, %cst_105 {dimension_numbers = #tpu.dot_dimension_numbers<[1], [0], [0], [1], [0, 0, 1, 1], [], []>} : vector<8x128xf32>, vector<128x384xf32>, vector<8x384xf32> -> vector<8x384xf32>
    %c0_106 = arith.constant 0 : index
    %c0_107 = arith.constant 0 : index
    %358 = vector.load %arg7[%c0_106, %c0_107] : memref<128x384xf32, #tpu.memory_space<vmem>>, vector<128x384xf32>
    %cst_108 = arith.constant dense<0.000000e+00> : vector<8x384xf32>
    %359 = tpu.matmul %355, %358, %cst_108 {dimension_numbers = #tpu.dot_dimension_numbers<[1], [0], [0], [1], [0, 0, 1, 1], [], []>} : vector<8x128xf32>, vector<128x384xf32>, vector<8x384xf32> -> vector<8x384xf32>
    %c8_i32_109 = arith.constant 8 : i32
    %360 = arith.muli %c5_i32, %c8_i32_109 : i32
    %361 = tpu.assume_multiple %360, 8 : i32
    %c7_i32_110 = arith.constant 7 : i32
    %362 = arith.subi %c7_i32_110, %c5_i32 : i32
    %c8_i32_111 = arith.constant 8 : i32
    %363 = arith.muli %362, %c8_i32_111 : i32
    %364 = tpu.assume_multiple %363, 8 : i32
    %365 = arith.index_cast %361 : i32 to index
    %c0_112 = arith.constant 0 : index
    %366 = vector.load %arg16[%365, %c0_112] : memref<64x384xf32, #tpu.memory_space<vmem>>, vector<8x384xf32>
    %367 = arith.index_cast %364 : i32 to index
    %c0_113 = arith.constant 0 : index
    %368 = vector.load %arg17[%367, %c0_113] : memref<64x384xf32, #tpu.memory_space<vmem>>, vector<8x384xf32>
    %369 = vector.extract_strided_slice %366 {offsets = [0, 0], sizes = [8, 128], strides = [1, 1]} : vector<8x384xf32> to vector<8x128xf32>
    %370 = vector.extract_strided_slice %357 {offsets = [0, 0], sizes = [8, 128], strides = [1, 1]} : vector<8x384xf32> to vector<8x128xf32>
    %371 = arith.addf %369, %370 : vector<8x128xf32>
    %372 = arith.negf %371 : vector<8x128xf32>
    %373 = math.exp %372 : vector<8x128xf32>
    %cst_114 = arith.constant 1.000000e+00 : f32
    %374 = vector.broadcast %cst_114 : f32 to vector<8x128xf32>
    %375 = arith.addf %374, %373 : vector<8x128xf32>
    %376 = arith.divf %374, %375 : vector<8x128xf32>
    %377 = vector.extract_strided_slice %366 {offsets = [0, 128], sizes = [8, 128], strides = [1, 1]} : vector<8x384xf32> to vector<8x128xf32>
    %378 = vector.extract_strided_slice %357 {offsets = [0, 128], sizes = [8, 128], strides = [1, 1]} : vector<8x384xf32> to vector<8x128xf32>
    %379 = arith.addf %377, %378 : vector<8x128xf32>
    %380 = arith.negf %379 : vector<8x128xf32>
    %381 = math.exp %380 : vector<8x128xf32>
    %cst_115 = arith.constant 1.000000e+00 : f32
    %382 = vector.broadcast %cst_115 : f32 to vector<8x128xf32>
    %383 = arith.addf %382, %381 : vector<8x128xf32>
    %384 = arith.divf %382, %383 : vector<8x128xf32>
    %385 = vector.extract_strided_slice %366 {offsets = [0, 256], sizes = [8, 128], strides = [1, 1]} : vector<8x384xf32> to vector<8x128xf32>
    %386 = vector.extract_strided_slice %357 {offsets = [0, 256], sizes = [8, 128], strides = [1, 1]} : vector<8x384xf32> to vector<8x128xf32>
    %387 = arith.addf %386, %16 : vector<8x128xf32>
    %388 = arith.mulf %376, %387 : vector<8x128xf32>
    %389 = arith.addf %385, %388 : vector<8x128xf32>
    %390 = math.tanh %389 : vector<8x128xf32>
    %cst_116 = arith.constant 1.000000e+00 : f32
    %391 = vector.broadcast %cst_116 : f32 to vector<8x128xf32>
    %392 = arith.subf %391, %384 : vector<8x128xf32>
    %393 = arith.mulf %392, %390 : vector<8x128xf32>
    %394 = arith.mulf %384, %328 : vector<8x128xf32>
    %395 = arith.addf %393, %394 : vector<8x128xf32>
    %396 = vector.extract_strided_slice %368 {offsets = [0, 0], sizes = [8, 128], strides = [1, 1]} : vector<8x384xf32> to vector<8x128xf32>
    %397 = vector.extract_strided_slice %359 {offsets = [0, 0], sizes = [8, 128], strides = [1, 1]} : vector<8x384xf32> to vector<8x128xf32>
    %398 = arith.addf %396, %397 : vector<8x128xf32>
    %399 = arith.negf %398 : vector<8x128xf32>
    %400 = math.exp %399 : vector<8x128xf32>
    %cst_117 = arith.constant 1.000000e+00 : f32
    %401 = vector.broadcast %cst_117 : f32 to vector<8x128xf32>
    %402 = arith.addf %401, %400 : vector<8x128xf32>
    %403 = arith.divf %401, %402 : vector<8x128xf32>
    %404 = vector.extract_strided_slice %368 {offsets = [0, 128], sizes = [8, 128], strides = [1, 1]} : vector<8x384xf32> to vector<8x128xf32>
    %405 = vector.extract_strided_slice %359 {offsets = [0, 128], sizes = [8, 128], strides = [1, 1]} : vector<8x384xf32> to vector<8x128xf32>
    %406 = arith.addf %404, %405 : vector<8x128xf32>
    %407 = arith.negf %406 : vector<8x128xf32>
    %408 = math.exp %407 : vector<8x128xf32>
    %cst_118 = arith.constant 1.000000e+00 : f32
    %409 = vector.broadcast %cst_118 : f32 to vector<8x128xf32>
    %410 = arith.addf %409, %408 : vector<8x128xf32>
    %411 = arith.divf %409, %410 : vector<8x128xf32>
    %412 = vector.extract_strided_slice %368 {offsets = [0, 256], sizes = [8, 128], strides = [1, 1]} : vector<8x384xf32> to vector<8x128xf32>
    %413 = vector.extract_strided_slice %359 {offsets = [0, 256], sizes = [8, 128], strides = [1, 1]} : vector<8x384xf32> to vector<8x128xf32>
    %414 = arith.addf %413, %19 : vector<8x128xf32>
    %415 = arith.mulf %403, %414 : vector<8x128xf32>
    %416 = arith.addf %412, %415 : vector<8x128xf32>
    %417 = math.tanh %416 : vector<8x128xf32>
    %cst_119 = arith.constant 1.000000e+00 : f32
    %418 = vector.broadcast %cst_119 : f32 to vector<8x128xf32>
    %419 = arith.subf %418, %411 : vector<8x128xf32>
    %420 = arith.mulf %419, %417 : vector<8x128xf32>
    %421 = arith.mulf %411, %355 : vector<8x128xf32>
    %422 = arith.addf %420, %421 : vector<8x128xf32>
    %c6_i32 = arith.constant 6 : i32
    %c0_120 = arith.constant 0 : index
    %c0_121 = arith.constant 0 : index
    %423 = vector.load %arg6[%c0_120, %c0_121] : memref<128x384xf32, #tpu.memory_space<vmem>>, vector<128x384xf32>
    %cst_122 = arith.constant dense<0.000000e+00> : vector<8x384xf32>
    %424 = tpu.matmul %395, %423, %cst_122 {dimension_numbers = #tpu.dot_dimension_numbers<[1], [0], [0], [1], [0, 0, 1, 1], [], []>} : vector<8x128xf32>, vector<128x384xf32>, vector<8x384xf32> -> vector<8x384xf32>
    %c0_123 = arith.constant 0 : index
    %c0_124 = arith.constant 0 : index
    %425 = vector.load %arg7[%c0_123, %c0_124] : memref<128x384xf32, #tpu.memory_space<vmem>>, vector<128x384xf32>
    %cst_125 = arith.constant dense<0.000000e+00> : vector<8x384xf32>
    %426 = tpu.matmul %422, %425, %cst_125 {dimension_numbers = #tpu.dot_dimension_numbers<[1], [0], [0], [1], [0, 0, 1, 1], [], []>} : vector<8x128xf32>, vector<128x384xf32>, vector<8x384xf32> -> vector<8x384xf32>
    %c8_i32_126 = arith.constant 8 : i32
    %427 = arith.muli %c6_i32, %c8_i32_126 : i32
    %428 = tpu.assume_multiple %427, 8 : i32
    %c7_i32_127 = arith.constant 7 : i32
    %429 = arith.subi %c7_i32_127, %c6_i32 : i32
    %c8_i32_128 = arith.constant 8 : i32
    %430 = arith.muli %429, %c8_i32_128 : i32
    %431 = tpu.assume_multiple %430, 8 : i32
    %432 = arith.index_cast %428 : i32 to index
    %c0_129 = arith.constant 0 : index
    %433 = vector.load %arg16[%432, %c0_129] : memref<64x384xf32, #tpu.memory_space<vmem>>, vector<8x384xf32>
    %434 = arith.index_cast %431 : i32 to index
    %c0_130 = arith.constant 0 : index
    %435 = vector.load %arg17[%434, %c0_130] : memref<64x384xf32, #tpu.memory_space<vmem>>, vector<8x384xf32>
    %436 = vector.extract_strided_slice %433 {offsets = [0, 0], sizes = [8, 128], strides = [1, 1]} : vector<8x384xf32> to vector<8x128xf32>
    %437 = vector.extract_strided_slice %424 {offsets = [0, 0], sizes = [8, 128], strides = [1, 1]} : vector<8x384xf32> to vector<8x128xf32>
    %438 = arith.addf %436, %437 : vector<8x128xf32>
    %439 = arith.negf %438 : vector<8x128xf32>
    %440 = math.exp %439 : vector<8x128xf32>
    %cst_131 = arith.constant 1.000000e+00 : f32
    %441 = vector.broadcast %cst_131 : f32 to vector<8x128xf32>
    %442 = arith.addf %441, %440 : vector<8x128xf32>
    %443 = arith.divf %441, %442 : vector<8x128xf32>
    %444 = vector.extract_strided_slice %433 {offsets = [0, 128], sizes = [8, 128], strides = [1, 1]} : vector<8x384xf32> to vector<8x128xf32>
    %445 = vector.extract_strided_slice %424 {offsets = [0, 128], sizes = [8, 128], strides = [1, 1]} : vector<8x384xf32> to vector<8x128xf32>
    %446 = arith.addf %444, %445 : vector<8x128xf32>
    %447 = arith.negf %446 : vector<8x128xf32>
    %448 = math.exp %447 : vector<8x128xf32>
    %cst_132 = arith.constant 1.000000e+00 : f32
    %449 = vector.broadcast %cst_132 : f32 to vector<8x128xf32>
    %450 = arith.addf %449, %448 : vector<8x128xf32>
    %451 = arith.divf %449, %450 : vector<8x128xf32>
    %452 = vector.extract_strided_slice %433 {offsets = [0, 256], sizes = [8, 128], strides = [1, 1]} : vector<8x384xf32> to vector<8x128xf32>
    %453 = vector.extract_strided_slice %424 {offsets = [0, 256], sizes = [8, 128], strides = [1, 1]} : vector<8x384xf32> to vector<8x128xf32>
    %454 = arith.addf %453, %16 : vector<8x128xf32>
    %455 = arith.mulf %443, %454 : vector<8x128xf32>
    %456 = arith.addf %452, %455 : vector<8x128xf32>
    %457 = math.tanh %456 : vector<8x128xf32>
    %cst_133 = arith.constant 1.000000e+00 : f32
    %458 = vector.broadcast %cst_133 : f32 to vector<8x128xf32>
    %459 = arith.subf %458, %451 : vector<8x128xf32>
    %460 = arith.mulf %459, %457 : vector<8x128xf32>
    %461 = arith.mulf %451, %395 : vector<8x128xf32>
    %462 = arith.addf %460, %461 : vector<8x128xf32>
    %463 = vector.extract_strided_slice %435 {offsets = [0, 0], sizes = [8, 128], strides = [1, 1]} : vector<8x384xf32> to vector<8x128xf32>
    %464 = vector.extract_strided_slice %426 {offsets = [0, 0], sizes = [8, 128], strides = [1, 1]} : vector<8x384xf32> to vector<8x128xf32>
    %465 = arith.addf %463, %464 : vector<8x128xf32>
    %466 = arith.negf %465 : vector<8x128xf32>
    %467 = math.exp %466 : vector<8x128xf32>
    %cst_134 = arith.constant 1.000000e+00 : f32
    %468 = vector.broadcast %cst_134 : f32 to vector<8x128xf32>
    %469 = arith.addf %468, %467 : vector<8x128xf32>
    %470 = arith.divf %468, %469 : vector<8x128xf32>
    %471 = vector.extract_strided_slice %435 {offsets = [0, 128], sizes = [8, 128], strides = [1, 1]} : vector<8x384xf32> to vector<8x128xf32>
    %472 = vector.extract_strided_slice %426 {offsets = [0, 128], sizes = [8, 128], strides = [1, 1]} : vector<8x384xf32> to vector<8x128xf32>
    %473 = arith.addf %471, %472 : vector<8x128xf32>
    %474 = arith.negf %473 : vector<8x128xf32>
    %475 = math.exp %474 : vector<8x128xf32>
    %cst_135 = arith.constant 1.000000e+00 : f32
    %476 = vector.broadcast %cst_135 : f32 to vector<8x128xf32>
    %477 = arith.addf %476, %475 : vector<8x128xf32>
    %478 = arith.divf %476, %477 : vector<8x128xf32>
    %479 = vector.extract_strided_slice %435 {offsets = [0, 256], sizes = [8, 128], strides = [1, 1]} : vector<8x384xf32> to vector<8x128xf32>
    %480 = vector.extract_strided_slice %426 {offsets = [0, 256], sizes = [8, 128], strides = [1, 1]} : vector<8x384xf32> to vector<8x128xf32>
    %481 = arith.addf %480, %19 : vector<8x128xf32>
    %482 = arith.mulf %470, %481 : vector<8x128xf32>
    %483 = arith.addf %479, %482 : vector<8x128xf32>
    %484 = math.tanh %483 : vector<8x128xf32>
    %cst_136 = arith.constant 1.000000e+00 : f32
    %485 = vector.broadcast %cst_136 : f32 to vector<8x128xf32>
    %486 = arith.subf %485, %478 : vector<8x128xf32>
    %487 = arith.mulf %486, %484 : vector<8x128xf32>
    %488 = arith.mulf %478, %422 : vector<8x128xf32>
    %489 = arith.addf %487, %488 : vector<8x128xf32>
    %c7_i32_137 = arith.constant 7 : i32
    %c0_138 = arith.constant 0 : index
    %c0_139 = arith.constant 0 : index
    %490 = vector.load %arg6[%c0_138, %c0_139] : memref<128x384xf32, #tpu.memory_space<vmem>>, vector<128x384xf32>
    %cst_140 = arith.constant dense<0.000000e+00> : vector<8x384xf32>
    %491 = tpu.matmul %462, %490, %cst_140 {dimension_numbers = #tpu.dot_dimension_numbers<[1], [0], [0], [1], [0, 0, 1, 1], [], []>} : vector<8x128xf32>, vector<128x384xf32>, vector<8x384xf32> -> vector<8x384xf32>
    %c0_141 = arith.constant 0 : index
    %c0_142 = arith.constant 0 : index
    %492 = vector.load %arg7[%c0_141, %c0_142] : memref<128x384xf32, #tpu.memory_space<vmem>>, vector<128x384xf32>
    %cst_143 = arith.constant dense<0.000000e+00> : vector<8x384xf32>
    %493 = tpu.matmul %489, %492, %cst_143 {dimension_numbers = #tpu.dot_dimension_numbers<[1], [0], [0], [1], [0, 0, 1, 1], [], []>} : vector<8x128xf32>, vector<128x384xf32>, vector<8x384xf32> -> vector<8x384xf32>
    %c8_i32_144 = arith.constant 8 : i32
    %494 = arith.muli %c7_i32_137, %c8_i32_144 : i32
    %495 = tpu.assume_multiple %494, 8 : i32
    %c7_i32_145 = arith.constant 7 : i32
    %496 = arith.subi %c7_i32_145, %c7_i32_137 : i32
    %c8_i32_146 = arith.constant 8 : i32
    %497 = arith.muli %496, %c8_i32_146 : i32
    %498 = tpu.assume_multiple %497, 8 : i32
    %499 = arith.index_cast %495 : i32 to index
    %c0_147 = arith.constant 0 : index
    %500 = vector.load %arg16[%499, %c0_147] : memref<64x384xf32, #tpu.memory_space<vmem>>, vector<8x384xf32>
    %501 = arith.index_cast %498 : i32 to index
    %c0_148 = arith.constant 0 : index
    %502 = vector.load %arg17[%501, %c0_148] : memref<64x384xf32, #tpu.memory_space<vmem>>, vector<8x384xf32>
    %503 = vector.extract_strided_slice %500 {offsets = [0, 0], sizes = [8, 128], strides = [1, 1]} : vector<8x384xf32> to vector<8x128xf32>
    %504 = vector.extract_strided_slice %491 {offsets = [0, 0], sizes = [8, 128], strides = [1, 1]} : vector<8x384xf32> to vector<8x128xf32>
    %505 = arith.addf %503, %504 : vector<8x128xf32>
    %506 = arith.negf %505 : vector<8x128xf32>
    %507 = math.exp %506 : vector<8x128xf32>
    %cst_149 = arith.constant 1.000000e+00 : f32
    %508 = vector.broadcast %cst_149 : f32 to vector<8x128xf32>
    %509 = arith.addf %508, %507 : vector<8x128xf32>
    %510 = arith.divf %508, %509 : vector<8x128xf32>
    %511 = vector.extract_strided_slice %500 {offsets = [0, 128], sizes = [8, 128], strides = [1, 1]} : vector<8x384xf32> to vector<8x128xf32>
    %512 = vector.extract_strided_slice %491 {offsets = [0, 128], sizes = [8, 128], strides = [1, 1]} : vector<8x384xf32> to vector<8x128xf32>
    %513 = arith.addf %511, %512 : vector<8x128xf32>
    %514 = arith.negf %513 : vector<8x128xf32>
    %515 = math.exp %514 : vector<8x128xf32>
    %cst_150 = arith.constant 1.000000e+00 : f32
    %516 = vector.broadcast %cst_150 : f32 to vector<8x128xf32>
    %517 = arith.addf %516, %515 : vector<8x128xf32>
    %518 = arith.divf %516, %517 : vector<8x128xf32>
    %519 = vector.extract_strided_slice %500 {offsets = [0, 256], sizes = [8, 128], strides = [1, 1]} : vector<8x384xf32> to vector<8x128xf32>
    %520 = vector.extract_strided_slice %491 {offsets = [0, 256], sizes = [8, 128], strides = [1, 1]} : vector<8x384xf32> to vector<8x128xf32>
    %521 = arith.addf %520, %16 : vector<8x128xf32>
    %522 = arith.mulf %510, %521 : vector<8x128xf32>
    %523 = arith.addf %519, %522 : vector<8x128xf32>
    %524 = math.tanh %523 : vector<8x128xf32>
    %cst_151 = arith.constant 1.000000e+00 : f32
    %525 = vector.broadcast %cst_151 : f32 to vector<8x128xf32>
    %526 = arith.subf %525, %518 : vector<8x128xf32>
    %527 = arith.mulf %526, %524 : vector<8x128xf32>
    %528 = arith.mulf %518, %462 : vector<8x128xf32>
    %529 = arith.addf %527, %528 : vector<8x128xf32>
    %530 = vector.extract_strided_slice %502 {offsets = [0, 0], sizes = [8, 128], strides = [1, 1]} : vector<8x384xf32> to vector<8x128xf32>
    %531 = vector.extract_strided_slice %493 {offsets = [0, 0], sizes = [8, 128], strides = [1, 1]} : vector<8x384xf32> to vector<8x128xf32>
    %532 = arith.addf %530, %531 : vector<8x128xf32>
    %533 = arith.negf %532 : vector<8x128xf32>
    %534 = math.exp %533 : vector<8x128xf32>
    %cst_152 = arith.constant 1.000000e+00 : f32
    %535 = vector.broadcast %cst_152 : f32 to vector<8x128xf32>
    %536 = arith.addf %535, %534 : vector<8x128xf32>
    %537 = arith.divf %535, %536 : vector<8x128xf32>
    %538 = vector.extract_strided_slice %502 {offsets = [0, 128], sizes = [8, 128], strides = [1, 1]} : vector<8x384xf32> to vector<8x128xf32>
    %539 = vector.extract_strided_slice %493 {offsets = [0, 128], sizes = [8, 128], strides = [1, 1]} : vector<8x384xf32> to vector<8x128xf32>
    %540 = arith.addf %538, %539 : vector<8x128xf32>
    %541 = arith.negf %540 : vector<8x128xf32>
    %542 = math.exp %541 : vector<8x128xf32>
    %cst_153 = arith.constant 1.000000e+00 : f32
    %543 = vector.broadcast %cst_153 : f32 to vector<8x128xf32>
    %544 = arith.addf %543, %542 : vector<8x128xf32>
    %545 = arith.divf %543, %544 : vector<8x128xf32>
    %546 = vector.extract_strided_slice %502 {offsets = [0, 256], sizes = [8, 128], strides = [1, 1]} : vector<8x384xf32> to vector<8x128xf32>
    %547 = vector.extract_strided_slice %493 {offsets = [0, 256], sizes = [8, 128], strides = [1, 1]} : vector<8x384xf32> to vector<8x128xf32>
    %548 = arith.addf %547, %19 : vector<8x128xf32>
    %549 = arith.mulf %537, %548 : vector<8x128xf32>
    %550 = arith.addf %546, %549 : vector<8x128xf32>
    %551 = math.tanh %550 : vector<8x128xf32>
    %cst_154 = arith.constant 1.000000e+00 : f32
    %552 = vector.broadcast %cst_154 : f32 to vector<8x128xf32>
    %553 = arith.subf %552, %545 : vector<8x128xf32>
    %554 = arith.mulf %553, %551 : vector<8x128xf32>
    %555 = arith.mulf %545, %489 : vector<8x128xf32>
    %556 = arith.addf %554, %555 : vector<8x128xf32>
    %c8_i32_155 = arith.constant 8 : i32
    %c0_156 = arith.constant 0 : index
    %c0_157 = arith.constant 0 : index
    %557 = vector.load %arg10[%c0_156, %c0_157] : memref<128x128xf32, #tpu.memory_space<vmem>>, vector<128x128xf32>
    %cst_158 = arith.constant dense<0.000000e+00> : vector<8x128xf32>
    %558 = tpu.matmul %529, %557, %cst_158 {dimension_numbers = #tpu.dot_dimension_numbers<[1], [0], [0], [1], [0, 0, 1, 1], [], []>} : vector<8x128xf32>, vector<128x128xf32>, vector<8x128xf32> -> vector<8x128xf32>
    %c0_159 = arith.constant 0 : index
    %c0_160 = arith.constant 0 : index
    %559 = vector.load %arg11[%c0_159, %c0_160] : memref<128x128xf32, #tpu.memory_space<vmem>>, vector<128x128xf32>
    %cst_161 = arith.constant dense<0.000000e+00> : vector<8x128xf32>
    %560 = tpu.matmul %556, %559, %cst_161 {dimension_numbers = #tpu.dot_dimension_numbers<[1], [0], [0], [1], [0, 0, 1, 1], [], []>} : vector<8x128xf32>, vector<128x128xf32>, vector<8x128xf32> -> vector<8x128xf32>
    %561 = arith.addf %558, %560 : vector<8x128xf32>
    %c0_162 = arith.constant 0 : index
    %c0_163 = arith.constant 0 : index
    %562 = vector.load %arg12[%c0_162, %c0_163] : memref<1x128xf32, #tpu.memory_space<vmem>>, vector<1x128xf32>
    %563 = vector.broadcast %562 : vector<1x128xf32> to vector<8x128xf32>
    %564 = arith.addf %561, %563 : vector<8x128xf32>
    %cst_164 = arith.constant 0.000000e+00 : f32
    %565 = vector.broadcast %cst_164 : f32 to vector<8x128xf32>
    %566 = arith.maximumf %564, %565 : vector<8x128xf32>
    %c0_165 = arith.constant 0 : index
    %c0_166 = arith.constant 0 : index
    %567 = vector.load %arg13[%c0_165, %c0_166] : memref<1x128xf32, #tpu.memory_space<vmem>>, vector<1x128xf32>
    %568 = vector.broadcast %567 : vector<1x128xf32> to vector<8x128xf32>
    %569 = arith.mulf %566, %568 : vector<8x128xf32>
    %cst_167 = arith.constant dense<0.000000e+00> : vector<8xf32>
    %570 = vector.multi_reduction <add>, %569, %cst_167 [1] : vector<8x128xf32> to vector<8xf32>
    %571 = vector.shape_cast %570 : vector<8xf32> to vector<8x1xf32>
    %c0_168 = arith.constant 0 : index
    %c0_169 = arith.constant 0 : index
    %572 = vector.load %arg14[%c0_168, %c0_169] : memref<1x1xf32, #tpu.memory_space<vmem>>, vector<1x1xf32>
    %573 = vector.broadcast %572 : vector<1x1xf32> to vector<8x1xf32>
    %574 = arith.addf %571, %573 : vector<8x1xf32>
    %c0_170 = arith.constant 0 : index
    %c0_171 = arith.constant 0 : index
    %c0_172 = arith.constant 0 : index
    %575 = vector.load %arg15[%c0_170, %c0_171, %c0_172] : memref<1x8x1xf32, #tpu.memory_space<vmem>>, vector<1x8x1xf32>
    %576 = vector.shape_cast %575 : vector<1x8x1xf32> to vector<8x1xf32>
    %577 = vector.shape_cast %574 : vector<8x1xf32> to vector<1x8x1xf32>
    tpu.vector_store %arg15[%c0_170, %c0_171, %c0_172], %577 {strides = array<i32>} : memref<1x8x1xf32, #tpu.memory_space<vmem>>, vector<1x8x1xf32>,
    return
  }
  func.func @transform_0(%arg0: i32) -> (i32, i32, i32) {
    %c0_i32 = arith.constant 0 : i32
    %c0_i32_0 = arith.constant 0 : i32
    %c0_i32_1 = arith.constant 0 : i32
    return %arg0, %c0_i32, %c0_i32_0 : i32, i32, i32
  }
  func.func @transform_1(%arg0: i32) -> (i32, i32) {
    %c0_i32 = arith.constant 0 : i32
    %c0_i32_0 = arith.constant 0 : i32
    %c0_i32_1 = arith.constant 0 : i32
    return %c0_i32, %c0_i32_0 : i32, i32
  }
  func.func @transform_2(%arg0: i32) -> (i32, i32) {
    %c0_i32 = arith.constant 0 : i32
    %c0_i32_0 = arith.constant 0 : i32
    %c0_i32_1 = arith.constant 0 : i32
    return %c0_i32, %c0_i32_0 : i32, i32
  }
  func.func @transform_3(%arg0: i32) -> (i32, i32) {
    %c0_i32 = arith.constant 0 : i32
    %c0_i32_0 = arith.constant 0 : i32
    %c0_i32_1 = arith.constant 0 : i32
    return %c0_i32, %c0_i32_0 : i32, i32
  }
  func.func @transform_4(%arg0: i32) -> (i32, i32) {
    %c0_i32 = arith.constant 0 : i32
    %c0_i32_0 = arith.constant 0 : i32
    %c0_i32_1 = arith.constant 0 : i32
    return %c0_i32, %c0_i32_0 : i32, i32
  }
  func.func @transform_5(%arg0: i32) -> (i32, i32) {
    %c0_i32 = arith.constant 0 : i32
    %c0_i32_0 = arith.constant 0 : i32
    %c0_i32_1 = arith.constant 0 : i32
    return %c0_i32, %c0_i32_0 : i32, i32
  }
  func.func @transform_6(%arg0: i32) -> (i32, i32) {
    %c0_i32 = arith.constant 0 : i32
    %c0_i32_0 = arith.constant 0 : i32
    %c0_i32_1 = arith.constant 0 : i32
    return %c0_i32, %c0_i32_0 : i32, i32
  }
  func.func @transform_7(%arg0: i32) -> (i32, i32) {
    %c0_i32 = arith.constant 0 : i32
    %c0_i32_0 = arith.constant 0 : i32
    %c0_i32_1 = arith.constant 0 : i32
    return %c0_i32, %c0_i32_0 : i32, i32
  }
  func.func @transform_8(%arg0: i32) -> (i32, i32) {
    %c0_i32 = arith.constant 0 : i32
    %c0_i32_0 = arith.constant 0 : i32
    %c0_i32_1 = arith.constant 0 : i32
    return %c0_i32, %c0_i32_0 : i32, i32
  }
  func.func @transform_9(%arg0: i32) -> (i32, i32) {
    %c0_i32 = arith.constant 0 : i32
    %c0_i32_0 = arith.constant 0 : i32
    %c0_i32_1 = arith.constant 0 : i32
    return %c0_i32, %c0_i32_0 : i32, i32
  }
  func.func @transform_10(%arg0: i32) -> (i32, i32) {
    %c0_i32 = arith.constant 0 : i32
    %c0_i32_0 = arith.constant 0 : i32
    %c0_i32_1 = arith.constant 0 : i32
    return %c0_i32, %c0_i32_0 : i32, i32
  }
  func.func @transform_11(%arg0: i32) -> (i32, i32) {
    %c0_i32 = arith.constant 0 : i32
    %c0_i32_0 = arith.constant 0 : i32
    %c0_i32_1 = arith.constant 0 : i32
    return %c0_i32, %c0_i32_0 : i32, i32
  }
  func.func @transform_12(%arg0: i32) -> (i32, i32) {
    %c0_i32 = arith.constant 0 : i32
    %c0_i32_0 = arith.constant 0 : i32
    %c0_i32_1 = arith.constant 0 : i32
    return %c0_i32, %c0_i32_0 : i32, i32
  }
  func.func @transform_13(%arg0: i32) -> (i32, i32) {
    %c0_i32 = arith.constant 0 : i32
    %c0_i32_0 = arith.constant 0 : i32
    %c0_i32_1 = arith.constant 0 : i32
    return %c0_i32, %c0_i32_0 : i32, i32
  }
  func.func @transform_14(%arg0: i32) -> (i32, i32, i32) {
    %c0_i32 = arith.constant 0 : i32
    %c0_i32_0 = arith.constant 0 : i32
    %c0_i32_1 = arith.constant 0 : i32
    return %arg0, %c0_i32, %c0_i32_0 : i32, i32, i32
  }
}

</mosaic_0001>

<bundles_post_ra>
// kernel: tpu_custom_call.1
= control target key start
LH: loop header
LB: loop body
LE: loop exit
PB: predicated region body
PF: predicated region fallthrough
CT: control target
= control target key end

     0   :  { %s5242_s0 = inlined_call_operand.hbm [shape: f32[1,64,64], index: 0, kind: input, shape index: {}]   ;;  %s5243_s1 = inlined_call_operand.hbm [shape: f32[64,384], index: 1, kind: input, shape index: {}]   ;;  %s5244_s2 = inlined_call_operand.hbm [shape: f32[64,384], index: 2, kind: input, shape index: {}]   ;;  %s5245_s3 = inlined_call_operand.vmem [shape: f32[1,384], index: 3, kind: input, shape index: {}]   ;;  %s5246_s4 = inlined_call_operand.hbm [shape: f32[1,384], index: 4, kind: input, shape index: {}]   ;;  %s5247_s5 = inlined_call_operand.hbm [shape: f32[128,384], index: 5, kind: input, shape index: {}]   ;;  %s5248_s6 = inlined_call_operand.hbm [shape: f32[128,384], index: 6, kind: input, shape index: {}]   ;;  %s5249_s7 = inlined_call_operand.vmem [shape: f32[1,128], index: 7, kind: input, shape index: {}]   ;;  %s5250_s8 = inlined_call_operand.vmem [shape: f32[1,128], index: 8, kind: input, shape index: {}]   ;;  %s5251_s9 = inlined_call_operand.hbm [shape: f32[128,128], index: 9, kind: input, shape index: {}]   ;;  %s5252_s10 = inlined_call_operand.hbm [shape: f32[128,128], index: 10, kind: input, shape index: {}]   ;;  %s5253_s11 = inlined_call_operand.vmem [shape: f32[1,128], index: 11, kind: input, shape index: {}]   ;;  %s5254_s12 = inlined_call_operand.vmem [shape: f32[1,128], index: 12, kind: input, shape index: {}]   ;;  %s5255_s13 = inlined_call_operand.<no memory space> [shape: f32[1,1], index: 13, kind: input, shape index: {}]   ;;  %s5256_s14 = inlined_call_operand.vmem [shape: f32[1,8,1], index: 14, kind: output, shape index: {}]  }
   0x1   :  { %v19_v0 = vstv %s5255_s13 }
   0x2   :  { %20 = vst [vmem:[#allocation4] sm:$0x1] %v19_v0 }
   0x3   :  { %21 = vsyncpa [#allocation6], 0 }
   0x4   :  { %22 = vsyncpa [#allocation8], 0 }
   0x5   :  { %23 = vsyncpa [#allocation11], 0 }
   0x6   :  { %24 = vsyncpa [#allocation14], 0  ;;  %s43_s17 = sshll.u32 %s5243_s1, 4  ;;  %s44_s17 = int_to_ptr.hbm [resolvable:$true] %s43_s17 }
   0x7   :  { %25 = vsyncpa [#allocation17], 0  ;;  %s3270_s18 = smov [#allocation7]   ;;  %s72_s22 = sshll.u32 %s5246_s4, 4  ;;  %s73_s22 = int_to_ptr.hbm [resolvable:$true] %s72_s22 }
   0x8   :  { %s45_s19 = sshll.u32 %s3270_s18, 4  ;;  %s3271_s23 = smov 384   ;;  %s46_s19 = int_to_ptr.vmem [resolvable:$true] %s45_s19 }
   0x9   :  { %s3272_s13 = smov 24   ;;  %s3273_s24 = smov [#allocation10]  }
   0xa   :  { %51 = dma.hbm_to_vmem [thread:$0]  %s44_s17, 3072, %s46_s19, [#allocation8], %s3271_s23, %s3271_s23, %s3272_s13  }
   0xb   :  { %s74_s25 = sshll.u32 %s3273_s24, 4  ;;  %s95_s27 = sshll.u32 %s5248_s6, 4  ;;  %s75_s25 = int_to_ptr.vmem [resolvable:$true] %s74_s25  ;;  %s96_s27 = int_to_ptr.hbm [resolvable:$true] %s95_s27 }
   0xc   :  { %77 = dma.hbm_to_vmem [thread:$0]  %s73_s22, 48, %s75_s25, [#allocation11]  }
   0xd   :  { %s30_s4 = sshll.u32 %s5242_s0, 4  ;;  %s3274_s30 = smov [#allocation13]   ;;  %s31_s4 = int_to_ptr.hbm [resolvable:$true] %s30_s4 }
   0xe   :  { %s97_s15 = sshll.u32 %s3274_s30, 4  ;;  %s3275_s16 = smov [#allocation5]   ;;  %s98_s15 = int_to_ptr.vmem [resolvable:$true] %s97_s15 }
   0xf   :  { %103 = dma.hbm_to_vmem [thread:$0]  %s96_s27, 6144, %s98_s15, [#allocation14], %s3271_s23, %s3271_s23, %s3272_s13  }
  0x10   :  { %s32_s17 = sshll.u32 %s3275_s16, 4  ;;  %s3276_s18 = smov 128   ;;  %s33_s17 = int_to_ptr.vmem [resolvable:$true] %s32_s17 }
  0x11   :  { %s3277_s6 = smov 8   ;;  %s56_s21 = sshll.u32 %s5244_s2, 4  ;;  %s57_s21 = int_to_ptr.hbm [resolvable:$true] %s56_s21 }
  0x12   :  { %38 = dma.hbm_to_vmem [thread:$0]  %s31_s4, 1024, %s33_s17, [#allocation6], %s3276_s18, %s3276_s18, %s3277_s6  }
  0x13   :  { %s3278_s0 = smov [#allocation9]   ;;  %s82_s26 = sshll.u32 %s5247_s5, 4  ;;  %s83_s26 = int_to_ptr.hbm [resolvable:$true] %s82_s26 }
  0x14   :  { %s58_s22 = sshll.u32 %s3278_s0, 4  ;;  %s3279_s1 = smov [#allocation12]   ;;  %s59_s22 = int_to_ptr.vmem [resolvable:$true] %s58_s22 }
  0x15   :  { %64 = dma.hbm_to_vmem [thread:$0]  %s57_s21, 3072, %s59_s22, [#allocation8], %s3271_s23, %s3271_s23, %s3272_s13  }
  0x16   :  { %s84_s27 = sshll.u32 %s3279_s1, 4  ;;  %s112_s4 = sshll.u32 %s5251_s9, 4  ;;  %s85_s27 = int_to_ptr.vmem [resolvable:$true] %s84_s27  ;;  %s113_s4 = int_to_ptr.hbm [resolvable:$true] %s112_s4 }
  0x17   :  { %90 = dma.hbm_to_vmem [thread:$0]  %s83_s26, 6144, %s85_s27, [#allocation11], %s3271_s23, %s3271_s23, %s3272_s13  }
  0x18   :  { %s125_s5 = sshll.u32 %s5252_s10, 4  ;;  %s3280_s15 = smov [#allocation15]   ;;  %s126_s5 = int_to_ptr.hbm [resolvable:$true] %s125_s5 }
  0x19   :  { %s114_s16 = sshll.u32 %s3280_s15, 4  ;;  %s3281_s17 = smov [#allocation16]   ;;  %s115_s16 = int_to_ptr.vmem [resolvable:$true] %s114_s16 }
  0x1a   :  { %120 = dma.hbm_to_vmem [thread:$0]  %s113_s4, 2048, %s115_s16, [#allocation14], %s3276_s18, %s3276_s18, %s3277_s6  }
  0x1b   :  { %s127_s19 = sshll.u32 %s3281_s17, 4  ;;  %s128_s19 = int_to_ptr.vmem [resolvable:$true] %s127_s19 }
  0x1c   :  { %133 = dma.hbm_to_vmem [thread:$0]  %s126_s5, 2048, %s128_s19, [#allocation17], %s3276_s18, %s3276_s18, %s3277_s6  }
  0x1d   :  { %3260 = dma.done.wait [#allocation6], 1024  }
  0x1e   :  { %3261 = vsyncadd [#allocation6], 4294966272 }
  0x1f   :  { %3262 = dma.done.wait [#allocation8], 6144  }
  0x20   :  { %3263 = vsyncadd [#allocation8], 4294961152 }
  0x21   :  { %3264 = dma.done.wait [#allocation11], 6192  }
  0x22   :  { %3265 = vsyncadd [#allocation11], 4294961104 }
  0x23   :  { %3266 = dma.done.wait [#allocation14], 8192  }
  0x24   :  { %3267 = vsyncadd [#allocation14], 4294959104 }
  0x25   :  { %3268 = dma.done.wait [#allocation17], 2048  }
  0x26   :  { %3269 = vsyncadd [#allocation17], 4294965248  ;;  %v201_v1 = vld [vmem:[#allocation7 + $0xa8] sm:$0xff]  ;;  %v202_v2 = vld [vmem:[#allocation7 + $0xb0] sm:$0xff]  ;;  %vm212_vm0 = vcmask 523264  }
  0x27   :  { %v198_v3 = vld [vmem:[#allocation7 + $0x90] sm:$0xff]  ;;  %245 = vmatpush.msra.mxu0 %v201_v1  ;;  %2678 = vmatpush.msra.mxu2 %v201_v1  ;;  %v199_v4 = vld [vmem:[#allocation7 + $0x98] sm:$0xff]  ;;  %v196_v6 = vld [vmem:[#allocation7 + $0x80] sm:$0xff] }
  0x28   :  { %2686 = vmatpush.msra.mxu3 %v202_v2  ;;  %v195_v5 = vld [vmem:[#allocation7 + $0x78] sm:$0xff]  ;;  %286 = vmatpush.msra.mxu1 %v202_v2  ;;  %v192_v7 = vld [vmem:[#allocation7 + $0x60] sm:$0xff]  ;;  %v193_v8 = vld [vmem:[#allocation7 + $0x68] sm:$0xff] }
  0x29   :  { %246 = vmatpush.msra.mxu0 %v198_v3  ;;  %2679 = vmatpush.msra.mxu2 %v198_v3  ;;  %v189_v9 = vld [vmem:[#allocation7 + $0x48] sm:$0xff]  ;;  %v190_v10 = vld [vmem:[#allocation7 + $0x50] sm:$0xff]  ;;  %v187_v12 = vld [vmem:[#allocation7 + $0x38] sm:$0xff] }
  0x2a   :  { %2687 = vmatpush.msra.mxu3 %v199_v4  ;;  %287 = vmatpush.msra.mxu1 %v199_v4  ;;  %v186_v11 = vld [vmem:[#allocation7 + $0x30] sm:$0xff]  ;;  %v183_v13 = vld [vmem:[#allocation7 + $0x18] sm:$0xff]  ;;  %v184_v14 = vld [vmem:[#allocation7 + $0x20] sm:$0xff] }
  0x2b   :  { %247 = vmatpush.msra.mxu0 %v195_v5  ;;  %2680 = vmatpush.msra.mxu2 %v195_v5  ;;  %v180_v15 = vld [vmem:[#allocation7] sm:$0xff]  ;;  %v181_v16 = vld [vmem:[#allocation7 + $0x8] sm:$0xff]  ;;  %v3399_v18 = vld [vmem:[#allocation5 + $0x30] sm:$0xff] }
  0x2c   :  { %2688 = vmatpush.msra.mxu3 %v196_v6  ;;  %288 = vmatpush.msra.mxu1 %v196_v6  ;;  %v3397_v17 = vld [vmem:[#allocation5] sm:$0xff]  ;;  %v406_v19 = vld [vmem:[#allocation9 + $0xb0] sm:$0xff]  ;;  %v203_v20 = vld [vmem:[#allocation7 + $0xb8] sm:$0xff] }
  0x2d   :  { %248 = vmatpush.msra.mxu0 %v192_v7  ;;  %2681 = vmatpush.msra.mxu2 %v192_v7  ;;  %v405_v21 = vld [vmem:[#allocation9 + $0xa8] sm:$0xff]  ;;  %v200_v22 = vld [vmem:[#allocation7 + $0xa0] sm:$0xff]  ;;  %v403_v23 = vld [vmem:[#allocation9 + $0x98] sm:$0xff] }
  0x2e   :  { %2689 = vmatpush.msra.mxu3 %v193_v8  ;;  %289 = vmatpush.msra.mxu1 %v193_v8  ;;  %v402_v24 = vld [vmem:[#allocation9 + $0x90] sm:$0xff]  ;;  %v197_v25 = vld [vmem:[#allocation7 + $0x88] sm:$0xff]  ;;  %v399_v26 = vld [vmem:[#allocation9 + $0x78] sm:$0xff] }
  0x2f   :  { %249 = vmatpush.msra.mxu0 %v189_v9  ;;  %2682 = vmatpush.msra.mxu2 %v189_v9  ;;  %v194_v27 = vld [vmem:[#allocation7 + $0x70] sm:$0xff]  ;;  %v400_v28 = vld [vmem:[#allocation9 + $0x80] sm:$0xff]  ;;  %v3407_v29 = vld [vmem:[#allocation5 + $0x8] sm:$0xff] }
  0x30   :  { %2690 = vmatpush.msra.mxu3 %v190_v10  ;;  %290 = vmatpush.msra.mxu1 %v190_v10  ;;  %v407_v30 = vld [vmem:[#allocation9 + $0xb8] sm:$0xff]  ;;  %v396_v31 = vld [vmem:[#allocation9 + $0x60] sm:$0xff]  ;;  %v393_v34 = vld [vmem:[#allocation9 + $0x48] sm:$0xff] }
  0x31   :  { %250 = vmatpush.msra.mxu0 %v186_v11  ;;  %2683 = vmatpush.msra.mxu2 %v186_v11  ;;  %v3411_v32 = vld [vmem:[#allocation5 + $0x38] sm:$0xff]  ;;  %v397_v35 = vld [vmem:[#allocation9 + $0x68] sm:$0xff]  ;;  %v188_v36 = vld [vmem:[#allocation7 + $0x40] sm:$0xff] }
  0x32   :  { %2691 = vmatpush.msra.mxu3 %v187_v12  ;;  %291 = vmatpush.msra.mxu1 %v187_v12  ;;  %v191_v33 = vld [vmem:[#allocation7 + $0x58] sm:$0xff]  ;;  %v404_v37 = vld [vmem:[#allocation9 + $0xa0] sm:$0xff]  ;;  %v390_v38 = vld [vmem:[#allocation9 + $0x30] sm:$0xff] }
  0x33   :  { %251 = vmatpush.msra.mxu0 %v183_v13  ;;  %2684 = vmatpush.msra.mxu2 %v183_v13  ;;  %v185_v39 = vld [vmem:[#allocation7 + $0x28] sm:$0xff]  ;;  %v394_v40 = vld [vmem:[#allocation9 + $0x50] sm:$0xff]  ;;  %v387_v41 = vld [vmem:[#allocation9 + $0x18] sm:$0xff] }
  0x34   :  { %2692 = vmatpush.msra.mxu3 %v184_v14  ;;  %292 = vmatpush.msra.mxu1 %v184_v14  ;;  %v401_v42 = vld [vmem:[#allocation9 + $0x88] sm:$0xff]  ;;  %v182_v43 = vld [vmem:[#allocation7 + $0x10] sm:$0xff]  ;;  %v384_v45 = vld [vmem:[#allocation9] sm:$0xff] }
  0x35   :  { %252 = vmatpush.msra.mxu0 %v180_v15  ;;  %2685 = vmatpush.msra.mxu2 %v180_v15  ;;  %v3419_v44 = vld [vmem:[#allocation5 + $0x10] sm:$0xff]  ;;  %v391_v48 = vld [vmem:[#allocation9 + $0x38] sm:$0xff]  ;;  %v388_v53 = vld [vmem:[#allocation9 + $0x20] sm:$0xff] }
  0x36   :  { %2693 = vmatpush.msra.mxu3 %v181_v16  ;;  %2598 = vmatmul.msk.f32.vlgmr.msra.gmra.mxu0 %vm212_vm0, %v3397_v17  ;;  %v3423_v46 = vld [vmem:[#allocation12 + $0x168] sm:$0xff]  ;;  %v3427_v47 = vld [vmem:[#allocation12 + $0x170] sm:$0xff]  ;;  %v3436_v51 = vld [vmem:[#allocation12 + $0x158] sm:$0xff] }
  0x37   :  { %2604 = vmatmul.msk.f32.vlgmr.msra.gmra.mxu2 %vm212_vm0, %v3399_v18  ;;  %2612 = vmatmul.msk.f32.vlgmr.msra.gmra.mxu3 %vm212_vm0, %v3399_v18  ;;  %v3431_v49 = vld [vmem:[#allocation12 + $0x150] sm:$0xff]  ;;  %v3439_v52 = vld [vmem:[#allocation12 + $0x138] sm:$0xff]  ;;  %v3441_v54 = vld [vmem:[#allocation12 + $0x140] sm:$0xff] }
  0x38   :  { %465 = vmatpush.msrb.mxu0 %v406_v19  ;;  %327 = vmatpush.msrb.mxu2 %v203_v20  ;;  %v398_v50 = vld [vmem:[#allocation9 + $0x70] sm:$0xff]  ;;  %v395_v55 = vld [vmem:[#allocation9 + $0x58] sm:$0xff]  ;;  %v3449_v57 = vld [vmem:[#allocation12 + $0x120] sm:$0xff] }
  0x39   :  { %424 = vmatpush.msrb.mxu3 %v405_v21  ;;  %293 = vmatpush.msra.mxu1 %v181_v16  ;;  %v3444_v56 = vld [vmem:[#allocation5 + $0x18] sm:$0xff]  ;;  %v3451_v58 = vld [vmem:[#allocation12 + $0x128] sm:$0xff]  ;;  %v392_v63 = vld [vmem:[#allocation9 + $0x40] sm:$0xff] }
  0x3a   :  { %328 = vmatpush.msrb.mxu2 %v200_v22  ;;  %466 = vmatpush.msrb.mxu0 %v403_v23  ;;  %v385_v59 = vld [vmem:[#allocation9 + $0x8] sm:$0xff]  ;;  %v3457_v60 = vld [vmem:[#allocation12 + $0x110] sm:$0xff]  ;;  %v3469_v0 = vld [vmem:[#allocation12 + $0xf8] sm:$0xff] }
  0x3b   :  { %425 = vmatpush.msrb.mxu3 %v402_v24  ;;  %2606 = vmatmul.msk.f32.vlgmr.msra.gmra.mxu1 %vm212_vm0, %v3397_v17  ;;  %v3460_v61 = vld [vmem:[#allocation12 + $0x108] sm:$0xff]  ;;  %v3465_v62 = vld [vmem:[#allocation13 + $0x170] sm:$0xff]  ;;  %v3475_v2 = vld [vmem:[#allocation13 + $0x158] sm:$0xff] }
  0x3c   :  { %329 = vmatpush.msrb.mxu2 %v197_v25  ;;  %467 = vmatpush.msrb.mxu0 %v400_v28  ;;  %5465 = vst [vmem:[#allocation23_spill] sm:$0xff] %v3465_v62  ;;  %v3473_v1 = vld [vmem:[#allocation12 + $0xf0] sm:$0xff]  ;;  %v3477_v3 = vld [vmem:[#allocation12 + $0xe0] sm:$0xff]  ;;  %v3485_v6 = vld [vmem:[#allocation12 + $0xd8] sm:$0xff] }
  0x3d   :  { %426 = vmatpush.msrb.mxu3 %v399_v26  ;;  %506 = vmatpush.msrb.mxu1 %v407_v30  ;;  %5466 = vst [vmem:[#allocation24_spill] sm:$0xff] %v3475_v2  ;;  %v389_v4 = vld [vmem:[#allocation9 + $0x28] sm:$0xff]  ;;  %v3480_v5 = vld [vmem:[#allocation5 + $0x20] sm:$0xff]  ;;  %v3496_v9 = vld [vmem:[#allocation12 + $0xb0] sm:$0xff] }
  0x3e   :  { %330 = vmatpush.msrb.mxu2 %v194_v27  ;;  %2599 = vmatmul.msk.f32.gmra.mxu0 %vm212_vm0, %v3407_v29  ;;  %v3487_v7 = vld [vmem:[#allocation12 + $0xc8] sm:$0xff]  ;;  %v3492_v8 = vld [vmem:[#allocation12 + $0xc0] sm:$0xff]  ;;  %v3508_v13 = vld [vmem:[#allocation12 + $0x98] sm:$0xff] }
  0x3f   :  { %427 = vmatpush.msrb.mxu3 %v396_v31  ;;  %2605 = vmatmul.msk.f32.gmra.mxu2 %vm212_vm0, %v3411_v32  ;;  %v3499_v10 = vld [vmem:[#allocation13 + $0x140] sm:$0xff]  ;;  %v386_v11 = vld [vmem:[#allocation9 + $0x10] sm:$0xff]  ;;  %v3520_v19 = vld [vmem:[#allocation13 + $0x178] sm:$0xff] }
  0x40   :  { %2613 = vmatmul.msk.f32.gmra.mxu3 %vm212_vm0, %v3411_v32  ;;  %331 = vmatpush.msrb.mxu2 %v191_v33  ;;  %5467 = vst [vmem:[#allocation25_spill] sm:$0xff] %v3499_v10  ;;  %v3504_v12 = vld [vmem:[#allocation12 + $0xa8] sm:$0xff]  ;;  %v3515_v15 = vld [vmem:[#allocation12 + $0x90] sm:$0xff]  ;;  %v3517_v16 = vld [vmem:[#allocation12 + $0x80] sm:$0xff] }
  0x41   :  { %428 = vmatpush.msrb.mxu3 %v393_v34  ;;  %468 = vmatpush.msrb.mxu0 %v397_v35  ;;  %v3513_v14 = vld [vmem:[#allocation13 + $0x128] sm:$0xff]  ;;  %5469 = vst [vmem:[#allocation27_spill] sm:$0xff] %v3520_v19  ;;  %v3527_v21 = vld [vmem:[#allocation12 + $0x78] sm:$0xff]  ;;  %v3534_v23 = vld [vmem:[#allocation13 + $0x110] sm:$0xff] }
  0x42   :  { %332 = vmatpush.msrb.mxu2 %v188_v36  ;;  %507 = vmatpush.msrb.mxu1 %v404_v37  ;;  %5468 = vst [vmem:[#allocation26_spill] sm:$0xff] %v3513_v14  ;;  %v3522_v20 = vld [vmem:[#allocation5 + $0x28] sm:$0xff]  ;;  %v3539_v24 = vld [vmem:[#allocation12 + $0x50] sm:$0xff]  ;;  %v3547_v26 = vld [vmem:[#allocation13 + $0xf8] sm:$0xff] }
  0x43   :  { %429 = vmatpush.msrb.mxu3 %v390_v38  ;;  %2607 = vmatmul.msk.f32.gmra.mxu1 %vm212_vm0, %v3407_v29  ;;  %v3529_v22 = vld [vmem:[#allocation12 + $0x68] sm:$0xff]  ;;  %5470 = vst [vmem:[#allocation28_spill] sm:$0xff] %v3534_v23  ;;  %v3542_v25 = vld [vmem:[#allocation12 + $0x60] sm:$0xff]  ;;  %v3553_v28 = vld [vmem:[#allocation12 + $0x38] sm:$0xff] }
  0x44   :  { %333 = vmatpush.msrb.mxu2 %v185_v39  ;;  %469 = vmatpush.msrb.mxu0 %v394_v40  ;;  %5471 = vst [vmem:[#allocation29_spill] sm:$0xff] %v3547_v26  ;;  %v3549_v27 = vld [vmem:[#allocation13 + $0x160] sm:$0xff]  ;;  %v3558_v30 = vld [vmem:[#allocation12 + $0x48] sm:$0xff]  ;;  %v3571_v35 = vld [vmem:[#allocation12 + $0x30] sm:$0xff] }
  0x45   :  { %430 = vmatpush.msrb.mxu3 %v387_v41  ;;  %508 = vmatpush.msrb.mxu1 %v401_v42  ;;  %5472 = vst [vmem:[#allocation30_spill] sm:$0xff] %v3549_v27  ;;  %v3560_v31 = vld [vmem:[#allocation13 + $0xe0] sm:$0xff]  ;;  %v3566_v34 = vld [vmem:[#allocation13 + $0x148] sm:$0xff]  ;;  %v3578_v37 = vld [vmem:[#allocation12 + $0x18] sm:$0xff] }
  0x46   :  { %334 = vmatpush.msrb.mxu2 %v182_v43  ;;  %2600 = vmatmul.msk.f32.gmra.mxu0 %vm212_vm0, %v3419_v44  ;;  %5473 = vst [vmem:[#allocation31_spill] sm:$0xff] %v3560_v31  ;;  %v3562_v33 = vld [vmem:[#allocation12 + $0x20] sm:$0xff]  ;;  %v3573_v36 = vld [vmem:[#allocation12 + $0x8] sm:$0xff]  ;;  %v3593_v41 = vld [vmem:[#allocation13 + $0x130] sm:$0xff] }
  0x47   :  { %431 = vmatpush.msrb.mxu3 %v384_v45  ;;  %2614 = vmatmul.msk.f32.vlgmr.msrb.gmra.mxu2 %vm212_vm0, %v3397_v17  ;;  %5474 = vst [vmem:[#allocation32_spill] sm:$0xff] %v3566_v34  ;;  %v3583_v38 = vld [vmem:[#allocation13 + $0x168] sm:$0xff]  ;;  %v3591_v40 = vld [vmem:[#allocation12] sm:$0xff]  ;;  %v3597_v42 = vld [vmem:[#allocation13 + $0x150] sm:$0xff] }
  0x48   :  { %2622 = vmatmul.msk.f32.vlgmr.msrb.gmra.mxu3 %vm212_vm0, %v3397_v17  ;;  %619 = vmatpush.msra.mxu2 %v3423_v46  ;;  %v3586_v39 = vld [vmem:[#allocation13 + $0xc8] sm:$0xff]  ;;  %5476 = vst [vmem:[#allocation34_spill] sm:$0xff] %v3591_v40  ;;  %v3602_v43 = vld [vmem:[#allocation12 + $0x178] sm:$0xff]  ;;  %v3604_v45 = vld [vmem:[#allocation13 + $0xb0] sm:$0xff] }
  0x49   :  { %639 = vmatpush.msra.mxu3 %v3427_v47  ;;  %470 = vmatpush.msrb.mxu0 %v391_v48  ;;  %5475 = vst [vmem:[#allocation33_spill] sm:$0xff] %v3586_v39  ;;  %v3606_v48 = vld [vmem:[#allocation13 + $0x138] sm:$0xff] }
  0x4a   :  { %620 = vmatpush.msra.mxu2 %v3431_v49  ;;  %509 = vmatpush.msrb.mxu1 %v398_v50  ;;  %5477 = vst [vmem:[#allocation35_spill] sm:$0xff] %v3593_v41  ;;  %v3610_v50 = vld [vmem:[#allocation13 + $0x118] sm:$0xff] }
  0x4b   :  { %2608 = vmatmul.msk.f32.gmra.mxu1 %vm212_vm0, %v3419_v44  ;;  %640 = vmatpush.msra.mxu3 %v3436_v51  ;;  %5478 = vst [vmem:[#allocation36_spill] sm:$0xff] %v3604_v45 }
  0x4c   :  { %621 = vmatpush.msra.mxu2 %v3439_v52  ;;  %471 = vmatpush.msrb.mxu0 %v388_v53  ;;  %5479 = vst [vmem:[#allocation37_spill] sm:$0xff] %v3610_v50  ;;  %v3615_v53 = vld [vmem:[#allocation12 + $0x160] sm:$0xff] }
  0x4d   :  { %641 = vmatpush.msra.mxu3 %v3441_v54  ;;  %510 = vmatpush.msrb.mxu1 %v395_v55  ;;  %v3617_v55 = vld [vmem:[#allocation13 + $0x120] sm:$0xff] }
  0x4e   :  { %2601 = vmatmul.msk.f32.gmra.mxu0 %vm212_vm0, %v3444_v56  ;;  %622 = vmatpush.msra.mxu2 %v3449_v57 }
  0x4f   :  { %2615 = vmatmul.msk.f32.gmra.mxu2 %vm212_vm0, %v3407_v29  ;;  %642 = vmatpush.msra.mxu3 %v3451_v58 }
  0x50   :  { %2623 = vmatmul.msk.f32.gmra.mxu3 %vm212_vm0, %v3407_v29  ;;  %472 = vmatpush.msrb.mxu0 %v385_v59  ;;  %v3622_v59 = vld [vmem:[#allocation12 + $0x148] sm:$0xff] }
  0x51   :  { %643 = vmatpush.msra.mxu3 %v3457_v60  ;;  %623 = vmatpush.msra.mxu2 %v3460_v61 }
  0x52   :  { %747 = vmatpush.msra.mxu0 %v3465_v62  ;;  %511 = vmatpush.msrb.mxu1 %v392_v63  ;;  %v3630_v63 = vld [vmem:[#allocation13 + $0x98] sm:$0xff]  ;;  %v3710_v62 = vld [vmem:[#allocation12 + $0x88] sm:$0xff] }
  0x53   :  { %2609 = vmatmul.msk.f32.gmra.mxu1 %vm212_vm0, %v3444_v56  ;;  %644 = vmatpush.msra.mxu3 %v3469_v0  ;;  %5480 = vst [vmem:[#allocation38_spill] sm:$0xff] %v3630_v63 }
  0x54   :  { %624 = vmatpush.msra.mxu2 %v3473_v1  ;;  %748 = vmatpush.msra.mxu0 %v3475_v2  ;;  %v3698_v2 = vld [vmem:[#allocation13 + $0xb8] sm:$0xff]  ;;  %5497 = vst [vmem:[#allocation55_spill] sm:$0xff] %v3710_v62 }
  0x55   :  { %645 = vmatpush.msra.mxu3 %v3477_v3  ;;  %512 = vmatpush.msrb.mxu1 %v389_v4  ;;  %v3635_v4 = vld [vmem:[#allocation12 + $0x130] sm:$0xff]  ;;  %5494 = vst [vmem:[#allocation52_spill] sm:$0xff] %v3698_v2 }
  0x56   :  { %2602 = vmatmul.msk.f32.gmra.mxu0 %vm212_vm0, %v3480_v5  ;;  %625 = vmatpush.msra.mxu2 %v3485_v6 }
  0x57   :  { %2616 = vmatmul.msk.f32.gmra.mxu2 %vm212_vm0, %v3419_v44  ;;  %646 = vmatpush.msra.mxu3 %v3487_v7 }
  0x58   :  { %2624 = vmatmul.msk.f32.gmra.mxu3 %vm212_vm0, %v3419_v44  ;;  %626 = vmatpush.msra.mxu2 %v3492_v8 }
  0x59   :  { %647 = vmatpush.msra.mxu3 %v3496_v9  ;;  %749 = vmatpush.msra.mxu0 %v3499_v10  ;;  %v3692_v10 = vld [vmem:[#allocation13 + $0x50] sm:$0xff] }
  0x5a   :  { %513 = vmatpush.msrb.mxu1 %v386_v11  ;;  %627 = vmatpush.msra.mxu2 %v3504_v12  ;;  %v3637_v11 = vld [vmem:[#allocation13 + $0x100] sm:$0xff]  ;;  %5492 = vst [vmem:[#allocation50_spill] sm:$0xff] %v3692_v10 }
  0x5b   :  { %2610 = vmatmul.msk.f32.gmra.mxu1 %vm212_vm0, %v3480_v5  ;;  %648 = vmatpush.msra.mxu3 %v3508_v13  ;;  %5481 = vst [vmem:[#allocation39_spill] sm:$0xff] %v3637_v11 }
  0x5c   :  { %750 = vmatpush.msra.mxu0 %v3513_v14  ;;  %628 = vmatpush.msra.mxu2 %v3515_v15  ;;  %v3681_v14 = vld [vmem:[#allocation13 + $0xd0] sm:$0xff] }
  0x5d   :  { %649 = vmatpush.msra.mxu3 %v3517_v16  ;;  %767 = vmatpush.msra.mxu1 %v3520_v19  ;;  %5489 = vst [vmem:[#allocation47_spill] sm:$0xff] %v3681_v14  ;;  %v3703_v19 = vld [vmem:[#allocation12 + $0xa0] sm:$0xff] }
  0x5e   :  { %2603 = vmatmul.msk.f32.gmra.mxu0 %vm212_vm0, %v3522_v20  ;;  %629 = vmatpush.msra.mxu2 %v3527_v21  ;;  %5495 = vst [vmem:[#allocation53_spill] sm:$0xff] %v3703_v19 }
  0x5f   :  { %2617 = vmatmul.msk.f32.gmra.mxu2 %vm212_vm0, %v3444_v56  ;;  %650 = vmatpush.msra.mxu3 %v3529_v22 }
  0x60   :  { %2625 = vmatmul.msk.f32.gmra.mxu3 %vm212_vm0, %v3444_v56  ;;  %751 = vmatpush.msra.mxu0 %v3534_v23  ;;  %v3659_v23 = vld [vmem:[#allocation12 + $0x100] sm:$0xff] }
  0x61   :  { %651 = vmatpush.msra.mxu3 %v3539_v24  ;;  %630 = vmatpush.msra.mxu2 %v3542_v25 }
  0x62   :  { %752 = vmatpush.msra.mxu0 %v3547_v26  ;;  %768 = vmatpush.msra.mxu1 %v3549_v27  ;;  %v3650_v26 = vld [vmem:[#allocation13 + $0xd8] sm:$0xff] }
  0x63   :  { %2611 = vmatmul.msk.f32.gmra.mxu1 %vm212_vm0, %v3522_v20  ;;  %652 = vmatpush.msra.mxu3 %v3553_v28  ;;  %5483 = vst [vmem:[#allocation41_spill] sm:$0xff] %v3650_v26  ;;  %v3694_v27 = vld [vmem:[#allocation13 + $0x78] sm:$0xff] }
  0x64   :  { %631 = vmatpush.msra.mxu2 %v3558_v30  ;;  %753 = vmatpush.msra.mxu0 %v3560_v31  ;;  %v3648_v31 = vld [vmem:[#allocation13 + $0x80] sm:$0xff]  ;;  %5493 = vst [vmem:[#allocation51_spill] sm:$0xff] %v3694_v27 }
  0x65   :  { %653 = vmatpush.msra.mxu3 %v3562_v33  ;;  %769 = vmatpush.msra.mxu1 %v3566_v34  ;;  %5482 = vst [vmem:[#allocation40_spill] sm:$0xff] %v3648_v31  ;;  %v3690_v34 = vld [vmem:[#allocation12 + $0xb8] sm:$0xff] }
  0x66   :  { %2630 = vmatmul.msk.f32.vlgmr.msrb.gmra.mxu0 %vm212_vm0, %v3397_v17  ;;  %632 = vmatpush.msra.mxu2 %v3571_v35  ;;  %5491 = vst [vmem:[#allocation49_spill] sm:$0xff] %v3690_v34 }
  0x67   :  { %2618 = vmatmul.msk.f32.gmra.mxu2 %vm212_vm0, %v3480_v5  ;;  %654 = vmatpush.msra.mxu3 %v3573_v36 }
  0x68   :  { %2626 = vmatmul.msk.f32.gmra.mxu3 %vm212_vm0, %v3480_v5  ;;  %633 = vmatpush.msra.mxu2 %v3578_v37 }
  0x69   :  { %727 = vmatpush.msrb.mxu3 %v3583_v38  ;;  %754 = vmatpush.msra.mxu0 %v3586_v39  ;;  %v3646_v39 = vld [vmem:[#allocation12 + $0x118] sm:$0xff] }
  0x6a   :  { %634 = vmatpush.msra.mxu2 %v3591_v40  ;;  %770 = vmatpush.msra.mxu1 %v3593_v41  ;;  %v3666_v41 = vld [vmem:[#allocation12 + $0xe8] sm:$0xff]  ;;  %v3736_v40 = vld [vmem:[#allocation13 + $0x20] sm:$0xff] }
  0x6b   :  { %2638 = vmatmul.msk.f32.vlgmr.msrb.gmra.mxu1 %vm212_vm0, %v3397_v17  ;;  %728 = vmatpush.msrb.mxu3 %v3597_v42  ;;  %v3627_v17 = vld [vmem:[#allocation13 + $0x108] sm:$0xff]  ;;  %5504 = vst [vmem:[#allocation62_spill] sm:$0xff] %v3736_v40 }
  0x6c   :  { %659 = vmatpush.msrb.mxu2 %v3602_v43  ;;  %755 = vmatpush.msra.mxu0 %v3604_v45  ;;  %v3641_v45 = vld [vmem:[#allocation13 + $0xf0] sm:$0xff] }
  0x6d   :  { %729 = vmatpush.msrb.mxu3 %v3606_v48  ;;  %771 = vmatpush.msra.mxu1 %v3610_v50  ;;  %v3654_v50 = vld [vmem:[#allocation13 + $0xe8] sm:$0xff] }
  0x6e   :  { %2631 = vmatmul.msk.f32.gmra.mxu0 %vm212_vm0, %v3407_v29  ;;  %660 = vmatpush.msrb.mxu2 %v3615_v53  ;;  %5484 = vst [vmem:[#allocation42_spill] sm:$0xff] %v3654_v50 }
  0x6f   :  { %2619 = vmatmul.msk.f32.gmra.mxu2 %vm212_vm0, %v3522_v20  ;;  %730 = vmatpush.msrb.mxu3 %v3617_v55 }
  0x70   :  { %2627 = vmatmul.msk.f32.gmra.mxu3 %vm212_vm0, %v3522_v20  ;;  %661 = vmatpush.msrb.mxu2 %v3622_v59 }
  0x71   :  { %731 = vmatpush.msrb.mxu3 %v3627_v17  ;;  %756 = vmatpush.msra.mxu0 %v3630_v63  ;;  %v3661_v63 = vld [vmem:[#allocation13 + $0xc0] sm:$0xff] }
  0x72   :  { %662 = vmatpush.msrb.mxu2 %v3635_v4  ;;  %772 = vmatpush.msra.mxu1 %v3637_v11  ;;  %5485 = vst [vmem:[#allocation43_spill] sm:$0xff] %v3661_v63  ;;  %v3674_v11 = vld [vmem:[#allocation13 + $0x68] sm:$0xff] }
  0x73   :  { %2639 = vmatmul.msk.f32.gmra.mxu1 %vm212_vm0, %v3407_v29  ;;  %732 = vmatpush.msrb.mxu3 %v3641_v45  ;;  %v3671_v29 = vld [vmem:[#allocation13 + $0xa8] sm:$0xff]  ;;  %5487 = vst [vmem:[#allocation45_spill] sm:$0xff] %v3674_v11 }
  0x74   :  { %663 = vmatpush.msrb.mxu2 %v3646_v39  ;;  %757 = vmatpush.msra.mxu0 %v3648_v31  ;;  %5486 = vst [vmem:[#allocation44_spill] sm:$0xff] %v3671_v29  ;;  %v3679_v31 = vld [vmem:[#allocation12 + $0xd0] sm:$0xff] }
  0x75   :  { %733 = vmatpush.msrb.mxu3 %v3650_v26  ;;  %773 = vmatpush.msra.mxu1 %v3654_v50  ;;  %5488 = vst [vmem:[#allocation46_spill] sm:$0xff] %v3679_v31  ;;  %v3685_v50 = vld [vmem:[#allocation13 + $0x90] sm:$0xff] }
  0x76   :  { %2632 = vmatmul.msk.f32.gmra.mxu0 %vm212_vm0, %v3419_v44  ;;  %664 = vmatpush.msrb.mxu2 %v3659_v23  ;;  %5490 = vst [vmem:[#allocation48_spill] sm:$0xff] %v3685_v50 }
  0x77   :  { %2620 = vmatmul.msk.f32.gmra.mxu2 %vm212_vm0, %v3399_v18  ;;  %734 = vmatpush.msrb.mxu3 %v3661_v63 }
  0x78   :  { %2628 = vmatmul.msk.f32.gmra.mxu3 %vm212_vm0, %v3399_v18  ;;  %665 = vmatpush.msrb.mxu2 %v3666_v41 }
  0x79   :  { %735 = vmatpush.msrb.mxu3 %v3671_v29  ;;  %758 = vmatpush.msra.mxu0 %v3674_v11  ;;  %v3705_v11 = vld [vmem:[#allocation13 + $0x60] sm:$0xff]  ;;  %v3742_v29 = vld [vmem:[#allocation13 + $0x88] sm:$0xff] }
  0x7a   :  { %666 = vmatpush.msrb.mxu2 %v3679_v31  ;;  %774 = vmatpush.msra.mxu1 %v3681_v14  ;;  %5496 = vst [vmem:[#allocation54_spill] sm:$0xff] %v3705_v11  ;;  %v3718_v14 = vld [vmem:[#allocation13 + $0x38] sm:$0xff] }
  0x7b   :  { %2640 = vmatmul.msk.f32.gmra.mxu1 %vm212_vm0, %v3419_v44  ;;  %736 = vmatpush.msrb.mxu3 %v3685_v50  ;;  %v3715_v44 = vld [vmem:[#allocation13 + $0x48] sm:$0xff]  ;;  %5499 = vst [vmem:[#allocation57_spill] sm:$0xff] %v3718_v14  ;;  %v3734_v50 = vld [vmem:[#allocation12 + $0x58] sm:$0xff] }
  0x7c   :  { %667 = vmatpush.msrb.mxu2 %v3690_v34  ;;  %759 = vmatpush.msra.mxu0 %v3692_v10  ;;  %5498 = vst [vmem:[#allocation56_spill] sm:$0xff] %v3715_v44  ;;  %v3723_v10 = vld [vmem:[#allocation12 + $0x70] sm:$0xff] }
  0x7d   :  { %737 = vmatpush.msrb.mxu3 %v3694_v27  ;;  %775 = vmatpush.msra.mxu1 %v3698_v2  ;;  %5500 = vst [vmem:[#allocation58_spill] sm:$0xff] %v3723_v10  ;;  %v3725_v27 = vld [vmem:[#allocation13 + $0xa0] sm:$0xff]  ;;  %v3729_v2 = vld [vmem:[#allocation13 + $0x30] sm:$0xff] }
  0x7e   :  { %2633 = vmatmul.msk.f32.gmra.mxu0 %vm212_vm0, %v3444_v56  ;;  %668 = vmatpush.msrb.mxu2 %v3703_v19  ;;  %5501 = vst [vmem:[#allocation59_spill] sm:$0xff] %v3725_v27 }
  0x7f   :  { %2621 = vmatmul.msk.f32.gmra.mxu2 %vm212_vm0, %v3411_v32  ;;  %738 = vmatpush.msrb.mxu3 %v3705_v11  ;;  %5502 = vst [vmem:[#allocation60_spill] sm:$0xff] %v3729_v2  ;;  %v3738_v11 = vld [vmem:[#allocation13 + $0x18] sm:$0xff] }
  0x80   :  { %2629 = vmatmul.msk.f32.gmra.mxu3 %vm212_vm0, %v3411_v32  ;;  %669 = vmatpush.msrb.mxu2 %v3710_v62  ;;  %5503 = vst [vmem:[#allocation61_spill] sm:$0xff] %v3734_v50 }
  0x81   :  { %739 = vmatpush.msrb.mxu3 %v3715_v44  ;;  %760 = vmatpush.msra.mxu0 %v3718_v14  ;;  %5505 = vst [vmem:[#allocation63_spill] sm:$0xff] %v3738_v11  ;;  %v3747_v44 = vld [vmem:[#allocation12 + $0x40] sm:$0xff] }
  0x82   :  { %670 = vmatpush.msrb.mxu2 %v3723_v10  ;;  %776 = vmatpush.msra.mxu1 %v3725_v27  ;;  %5506 = vst [vmem:[#allocation64_spill] sm:$0xff] %v3742_v29  ;;  %v3749_v14 = vld [vmem:[#allocation13] sm:$0xff]  ;;  %v3754_v10 = vld [vmem:[#allocation12 + $0x28] sm:$0xff]  ;;  %v3762_v27 = vld [vmem:[#allocation13 + $0x70] sm:$0xff] }
  0x83   :  { %2641 = vmatmul.msk.f32.gmra.mxu1 %vm212_vm0, %v3444_v56  ;;  %740 = vmatpush.msrb.mxu3 %v3729_v2  ;;  %5507 = vst [vmem:[#allocation65_spill] sm:$0xff] %v3747_v44  ;;  %v3760_v56 = vld [vmem:[#allocation13 + $0x8] sm:$0xff]  ;;  %v5316_v2 = vmov 0.0  }
  0x84   :  { %5508 = vst [vmem:[#allocation66_spill] sm:$0xff] %v3749_v14  ;;  %671 = vmatpush.msrb.mxu2 %v3734_v50  ;;  %761 = vmatpush.msra.mxu0 %v3736_v40  ;;  %v3766_v40 = vld [vmem:[#allocation12 + $0x10] sm:$0xff] }
  0x85   :  { %741 = vmatpush.msrb.mxu3 %v3738_v11  ;;  %5509 = vst [vmem:[#allocation67_spill] sm:$0xff] %v3754_v10  ;;  %777 = vmatpush.msra.mxu1 %v3742_v29  ;;  %v3772_v29 = vld [vmem:[#allocation13 + $0x58] sm:$0xff] }
  0x86   :  { %2634 = vmatmul.msk.f32.gmra.mxu0 %vm212_vm0, %v3480_v5  ;;  %672 = vmatpush.msrb.mxu2 %v3747_v44  ;;  %5510 = vst [vmem:[#allocation68_spill] sm:$0xff] %v3760_v56 }
  0x87   :  { %635 = vmatmul.f32.vlgmr.msra.gmra.mxu2 %v5316_v2  ;;  %742 = vmatpush.msrb.mxu3 %v3749_v14  ;;  %5511 = vst [vmem:[#allocation69_spill] sm:$0xff] %v3766_v40  ;;  %v3778_v14 = vld [vmem:[#allocation13 + $0x40] sm:$0xff] }
  0x88   :  { %655 = vmatmul.f32.vlgmr.msra.gmra.mxu3 %v5316_v2  ;;  %673 = vmatpush.msrb.mxu2 %v3754_v10  ;;  %v3783_v2 = vld [vmem:[#allocation13 + $0x28] sm:$0xff] }
  0x89   :  { %762 = vmatpush.msra.mxu0 %v3760_v56  ;;  %778 = vmatpush.msra.mxu1 %v3762_v27  ;;  %v3791_v56 = vld [vmem:[#allocation13 + $0x10] sm:$0xff] }
  0x8a   :  { %674 = vmatpush.msrb.mxu2 %v3766_v40  ;;  %915 = vmatpush.msra.mxu3 %v3427_v47 }
  0x8b   :  { %2642 = vmatmul.msk.f32.gmra.mxu1 %vm212_vm0, %v3480_v5  ;;  %935 = vmatpush.msrb.mxu0 %v3602_v43  ;;  %v5512_v5 = vmov 0.0  }
  0x8c   :  { %895 = vmatpush.msra.mxu2 %v3423_v46  ;;  %779 = vmatpush.msra.mxu1 %v3772_v29 }
  0x8d   :  { %916 = vmatpush.msra.mxu3 %v3436_v51  ;;  %936 = vmatpush.msrb.mxu0 %v3615_v53 }
  0x8e   :  { %896 = vmatpush.msra.mxu2 %v3431_v49  ;;  %2635 = vmatmul.msk.f32.gmra.mxu0 %vm212_vm0, %v3522_v20 }
  0x8f   :  { %780 = vmatpush.msra.mxu1 %v3778_v14  ;;  %675 = vmatmul.f32.vlgmr.msrb.gmra.mxu2 %v5512_v5 }
  0x90   :  { %917 = vmatpush.msra.mxu3 %v3441_v54  ;;  %897 = vmatpush.msra.mxu2 %v3439_v52 }
  0x91   :  { %743 = vmatmul.f32.vlgmr.msrb.gmra.mxu3 %v5512_v5  ;;  %781 = vmatpush.msra.mxu1 %v3783_v2 }
  0x92   :  { %918 = vmatpush.msra.mxu3 %v3451_v58  ;;  %898 = vmatpush.msra.mxu2 %v3449_v57 }
  0x93   :  { %782 = vmatpush.msra.mxu1 %v3791_v56  ;;  %937 = vmatpush.msrb.mxu0 %v3622_v59 }
  0x94   :  { %2643 = vmatmul.msk.f32.gmra.mxu1 %vm212_vm0, %v3522_v20  ;;  %919 = vmatpush.msra.mxu3 %v3457_v60  ;;  %v5515_v20 = vld [vmem:[#allocation23_spill] sm:$0xff] }
  0x95   :  { %899 = vmatpush.msra.mxu2 %v3460_v61  ;;  %955 = vmatpush.msrb.mxu1 %v3583_v38 }
  0x96   :  { %2636 = vmatmul.msk.f32.gmra.mxu0 %vm212_vm0, %v3399_v18  ;;  %920 = vmatpush.msra.mxu3 %v3469_v0 }
  0x97   :  { %900 = vmatpush.msra.mxu2 %v3473_v1  ;;  %938 = vmatpush.msrb.mxu0 %v3635_v4 }
  0x98   :  { %921 = vmatpush.msra.mxu3 %v3477_v3  ;;  %956 = vmatpush.msrb.mxu1 %v3597_v42 }
  0x99   :  { %901 = vmatpush.msra.mxu2 %v3485_v6  ;;  %939 = vmatpush.msrb.mxu0 %v3646_v39 }
  0x9a   :  { %922 = vmatpush.msra.mxu3 %v3487_v7  ;;  %957 = vmatpush.msrb.mxu1 %v3606_v48 }
  0x9b   :  { %902 = vmatpush.msra.mxu2 %v3492_v8  ;;  %940 = vmatpush.msrb.mxu0 %v3659_v23 }
  0x9c   :  { %2644 = vmatmul.msk.f32.gmra.mxu1 %vm212_vm0, %v3399_v18  ;;  %923 = vmatpush.msra.mxu3 %v3496_v9  ;;  %v5513_v18 = vld [vmem:[#allocation44_spill] sm:$0xff] }
  0x9d   :  { %903 = vmatpush.msra.mxu2 %v3504_v12  ;;  %958 = vmatpush.msrb.mxu1 %v3617_v55 }
  0x9e   :  { %2637 = vmatmul.msk.f32.gmra.mxu0 %vm212_vm0, %v3411_v32  ;;  %924 = vmatpush.msra.mxu3 %v3508_v13 }
  0x9f   :  { %904 = vmatpush.msra.mxu2 %v3515_v15  ;;  %941 = vmatpush.msrb.mxu0 %v3666_v41 }
  0xa0   :  { %925 = vmatpush.msra.mxu3 %v3517_v16  ;;  %959 = vmatpush.msrb.mxu1 %v3627_v17 }
  0xa1   :  { %905 = vmatpush.msra.mxu2 %v3527_v21  ;;  %942 = vmatpush.msrb.mxu0 %v3679_v31  ;;  %v5518_v31 = vld [vmem:[#allocation48_spill] sm:$0xff] }
  0xa2   :  { %926 = vmatpush.msra.mxu3 %v3529_v22  ;;  %960 = vmatpush.msrb.mxu1 %v3641_v45 }
  0xa3   :  { %906 = vmatpush.msra.mxu2 %v3542_v25  ;;  %943 = vmatpush.msrb.mxu0 %v3690_v34  ;;  %v5516_v34 = vld [vmem:[#allocation27_spill] sm:$0xff] }
  0xa4   :  { %2645 = vmatmul.msk.f32.gmra.mxu1 %vm212_vm0, %v3411_v32  ;;  %927 = vmatpush.msra.mxu3 %v3539_v24  ;;  %v5514_v32 = vld [vmem:[#allocation34_spill] sm:$0xff] }
  0xa5   :  { %907 = vmatpush.msra.mxu2 %v3558_v30  ;;  %961 = vmatpush.msrb.mxu1 %v3650_v26  ;;  %v5520_v26 = vld [vmem:[#allocation30_spill] sm:$0xff] }
  0xa6   :  { %763 = vmatmul.f32.vlgmr.msra.gmra.mxu0 %v5512_v5  ;;  %928 = vmatpush.msra.mxu3 %v3553_v28 }
  0xa7   :  { %908 = vmatpush.msra.mxu2 %v3571_v35  ;;  %944 = vmatpush.msrb.mxu0 %v3703_v19  ;;  %v5517_v19 = vld [vmem:[#allocation58_spill] sm:$0xff] }
  0xa8   :  { %929 = vmatpush.msra.mxu3 %v3562_v33  ;;  %962 = vmatpush.msrb.mxu1 %v3661_v63  ;;  %v5519_v63 = vld [vmem:[#allocation24_spill] sm:$0xff] }
  0xa9   :  { %909 = vmatpush.msra.mxu2 %v3578_v37  ;;  %945 = vmatpush.msrb.mxu0 %v3710_v62  ;;  %v5521_v62 = vld [vmem:[#allocation51_spill] sm:$0xff] }
  0xaa   :  { %930 = vmatpush.msra.mxu3 %v3573_v36  ;;  %963 = vmatpush.msrb.mxu1 %v5513_v18  ;;  %v5522_v18 = vld [vmem:[#allocation25_spill] sm:$0xff] }
  0xab   :  { %910 = vmatpush.msra.mxu2 %v5514_v32  ;;  %946 = vmatpush.msrb.mxu0 %v5517_v19  ;;  %v5526_v19 = vld [vmem:[#allocation35_spill] sm:$0xff] }
  0xac   :  { %783 = vmatmul.f32.vlgmr.msra.gmra.mxu1 %v5512_v5  ;;  %995 = vmatpush.msrb.mxu3 %v5516_v34  ;;  %v5523_v5 = vld [vmem:[#allocation32_spill] sm:$0xff]  ;;  %v5525_v34 = vld [vmem:[#allocation26_spill] sm:$0xff] }
  0xad   :  { %975 = vmatpush.msrb.mxu2 %v5515_v20  ;;  %964 = vmatpush.msrb.mxu1 %v5518_v31  ;;  %v5524_v20 = vld [vmem:[#allocation54_spill] sm:$0xff] }
  0xae   :  { %996 = vmatpush.msrb.mxu3 %v5520_v26  ;;  %947 = vmatpush.msrb.mxu0 %v3734_v50  ;;  %v5527_v26 = vld [vmem:[#allocation56_spill] sm:$0xff]  ;;  %v5529_v50 = vld [vmem:[#allocation37_spill] sm:$0xff] }
  0xaf   :  { %976 = vmatpush.msrb.mxu2 %v5519_v63  ;;  %965 = vmatpush.msrb.mxu1 %v5521_v62  ;;  %v5528_v63 = vld [vmem:[#allocation28_spill] sm:$0xff] }
  0xb0   :  { %997 = vmatpush.msrb.mxu3 %v5523_v5  ;;  %948 = vmatpush.msrb.mxu0 %v3747_v44  ;;  %v3880_v5 = vld [vmem:[%s5245_s3] sm:$0x7] }
  0xb1   :  { %977 = vmatpush.msrb.mxu2 %v5522_v18  ;;  %966 = vmatpush.msrb.mxu1 %v5524_v20  ;;  %v5530_v18 = vld [vmem:[#allocation60_spill] sm:$0xff]  ;;  %v5535_v44 = vld [vmem:[#allocation66_spill] sm:$0xff]  ;;  %v5536_v20 = vld [vmem:[#allocation33_spill] sm:$0xff] }
  0xb2   :  { %998 = vmatpush.msrb.mxu3 %v5526_v19  ;;  %949 = vmatpush.msrb.mxu0 %v3754_v10  ;;  %v5531_v19 = vld [vmem:[#allocation29_spill] sm:$0xff]  ;;  %v3885_v10 = vperm.slane %v3880_v5, 1 }
  0xb3   :  { %978 = vmatpush.msrb.mxu2 %v5525_v34  ;;  %v3869_v31 = vpop.f32.mrf.mxu0  ;;  %967 = vmatpush.msrb.mxu1 %v5527_v26  ;;  %v5532_v34 = vld [vmem:[#allocation39_spill] sm:$0xff]  ;;  %v3894_v26 = vperm.slane %v3880_v5, 0 }
  0xb4   :  { %999 = vmatpush.msrb.mxu3 %v5529_v50  ;;  %950 = vmatpush.msrb.mxu0 %v3766_v40  ;;  %v5533_v40 = vld [vmem:[#allocation31_spill] sm:$0xff] }
  0xb5   :  { %979 = vmatpush.msrb.mxu2 %v5528_v63  ;;  %968 = vmatpush.msrb.mxu1 %v5530_v18  ;;  %v5534_v18 = vld [vmem:[#allocation42_spill] sm:$0xff] }
  0xb6   :  { %1000 = vmatpush.msrb.mxu3 %v5532_v34  ;;  %1123 = vmatpush.msra.mxu0 %v3423_v46 }
  0xb7   :  { %980 = vmatpush.msrb.mxu2 %v5531_v19  ;;  %969 = vmatpush.msrb.mxu1 %v3738_v11  ;;  %v5537_v11 = vld [vmem:[#allocation47_spill] sm:$0xff] }
  0xb8   :  { %v3889_v63 = vpop.f32.mrf.mxu1  ;;  %1001 = vmatpush.msrb.mxu3 %v5534_v18  ;;  %1124 = vmatpush.msra.mxu0 %v3431_v49  ;;  %v5541_v49 = vld [vmem:[#allocation52_spill] sm:$0xff] }
  0xb9   :  { %981 = vmatpush.msrb.mxu2 %v5533_v40  ;;  %970 = vmatpush.msrb.mxu1 %v5535_v44  ;;  %v5540_v44 = vld [vmem:[#allocation36_spill] sm:$0xff] }
  0xba   :  { %v272_v19 = vpop.f32.mrf.mxu2  ;;  %v313_v34 = vpop.f32.mrf.mxu3  ;;  %1002 = vmatpush.msrb.mxu3 %v5537_v11  ;;  %1125 = vmatpush.msra.mxu0 %v3439_v52  ;;  %v5542_v11 = vld [vmem:[#allocation38_spill] sm:$0xff]  ;;  %v5546_v52 = vld [vmem:[#allocation64_spill] sm:$0xff] }
  0xbb   :  { %982 = vmatpush.msrb.mxu2 %v5536_v20  ;;  %v3901_v46 = vadd.f32 %v272_v19, %v3894_v26  ;;  %v3904_v40 = vadd.f32 %v313_v34, %v3885_v10  ;;  %v3906_v18 = vpop.f32.mrf.mxu0  ;;  %1143 = vmatpush.msra.mxu1 %v3427_v47  ;;  %v5543_v19 = vld [vmem:[#allocation59_spill] sm:$0xff]  ;;  %v5545_v47 = vld [vmem:[#allocation40_spill] sm:$0xff] }
  0xbc   :  { %1003 = vmatpush.msrb.mxu3 %v5541_v49  ;;  %1126 = vmatpush.msra.mxu0 %v3449_v57  ;;  %v5547_v57 = vld [vmem:[#allocation45_spill] sm:$0xff] }
  0xbd   :  { %5538 = vst [vmem:[#allocation34_spill] sm:$0xff] %v3901_v46  ;;  %983 = vmatpush.msrb.mxu2 %v5540_v44  ;;  %1144 = vmatpush.msra.mxu1 %v3436_v51 }
  0xbe   :  { %5539 = vst [vmem:[#allocation23_spill] sm:$0xff] %v3904_v40  ;;  %1004 = vmatpush.msrb.mxu3 %v5543_v19  ;;  %1127 = vmatpush.msra.mxu0 %v3460_v61 }
  0xbf   :  { %984 = vmatpush.msrb.mxu2 %v5542_v11  ;;  %1145 = vmatpush.msra.mxu1 %v3441_v54 }
  0xc0   :  { %v3918_v34 = vpop.f32.mrf.mxu1  ;;  %1005 = vmatpush.msrb.mxu3 %v5546_v52  ;;  %1128 = vmatpush.msra.mxu0 %v3473_v1  ;;  %v5551_v1 = vld [vmem:[#allocation50_spill] sm:$0xff] }
  0xc1   :  { %5544 = vst [vmem:[#allocation27_spill] sm:$0xff] %v3918_v34  ;;  %985 = vmatpush.msrb.mxu2 %v5545_v47  ;;  %1146 = vmatpush.msra.mxu1 %v3451_v58  ;;  %v408_v34 = vld [vmem:[#allocation10] sm:$0x7] }
  0xc2   :  { %v275_v51 = vpop.f32.mrf.mxu2  ;;  %1006 = vmatpush.msrb.mxu3 %v3762_v27  ;;  %1129 = vmatpush.msra.mxu0 %v3485_v6 }
  0xc3   :  { %986 = vmatpush.msrb.mxu2 %v5547_v57  ;;  %v3927_v40 = vadd.f32 %v275_v51, %v3894_v26  ;;  %v316_v54 = vpop.f32.mrf.mxu3  ;;  %v260_v61 = vpop.f32.mrf.mxu0  ;;  %1147 = vmatpush.msra.mxu1 %v3457_v60  ;;  %v5552_v51 = vld [vmem:[#allocation57_spill] sm:$0xff]  ;;  %v3945_v60 = vperm.slane %v408_v34, 0 }
  0xc4   :  { %v3932_v46 = vadd.f32 %v316_v54, %v3885_v10  ;;  %v3935_v58 = vadd.f32 %v260_v61, %v3894_v26  ;;  %1007 = vmatpush.msrb.mxu3 %v3772_v29  ;;  %1130 = vmatpush.msra.mxu0 %v3492_v8  ;;  %v5553_v54 = vld [vmem:[#allocation62_spill] sm:$0xff]  ;;  %v5555_v8 = vld [vmem:[#allocation68_spill] sm:$0xff] }
  0xc5   :  { %5548 = vst [vmem:[#allocation24_spill] sm:$0xff] %v3927_v40  ;;  %987 = vmatpush.msrb.mxu2 %v5551_v1  ;;  %1148 = vmatpush.msra.mxu1 %v3469_v0 }
  0xc6   :  { %5549 = vst [vmem:[#allocation30_spill] sm:$0xff] %v3932_v46  ;;  %1008 = vmatpush.msrb.mxu3 %v3778_v14  ;;  %1131 = vmatpush.msra.mxu0 %v3504_v12 }
  0xc7   :  { %5550 = vst [vmem:[#allocation51_spill] sm:$0xff] %v3935_v58  ;;  %988 = vmatpush.msrb.mxu2 %v5552_v51  ;;  %1149 = vmatpush.msra.mxu1 %v3477_v3 }
  0xc8   :  { %v301_v6 = vpop.f32.mrf.mxu1  ;;  %1009 = vmatpush.msrb.mxu3 %v3783_v2  ;;  %1132 = vmatpush.msra.mxu0 %v3515_v15  ;;  %v3971_v15 = vperm.slane %v3880_v5, 2 }
  0xc9   :  { %989 = vmatpush.msrb.mxu2 %v5553_v54  ;;  %v3950_v61 = vadd.f32 %v301_v6, %v3885_v10  ;;  %1150 = vmatpush.msra.mxu1 %v3487_v7 }
  0xca   :  { %v3954_v0 = vpop.f32.mrf.mxu2  ;;  %1010 = vmatpush.msrb.mxu3 %v3791_v56  ;;  %1133 = vmatpush.msra.mxu0 %v3527_v21 }
  0xcb   :  { %5554 = vst [vmem:[#allocation25_spill] sm:$0xff] %v3950_v61  ;;  %990 = vmatpush.msrb.mxu2 %v5555_v8  ;;  %v433_v3 = vpop.f32.mrf.mxu3  ;;  %v263_v12 = vpop.f32.mrf.mxu0  ;;  %1151 = vmatpush.msra.mxu1 %v3496_v9 }
  0xcc   :  { %v3961_v46 = vadd.f32 %v433_v3, %v3945_v60  ;;  %v3964_v6 = vadd.f32 %v263_v12, %v3894_v26  ;;  %1134 = vmatpush.msra.mxu0 %v3542_v25 }
  0xcd   :  { %1152 = vmatpush.msra.mxu1 %v3508_v13 }
  0xce   :  { %5556 = vst [vmem:[#allocation32_spill] sm:$0xff] %v3961_v46  ;;  %1135 = vmatpush.msra.mxu0 %v3558_v30 }
  0xcf   :  { %5557 = vst [vmem:[#allocation26_spill] sm:$0xff] %v3964_v6  ;;  %1153 = vmatpush.msra.mxu1 %v3517_v16 }
  0xd0   :  { %v304_v7 = vpop.f32.mrf.mxu1  ;;  %1136 = vmatpush.msra.mxu0 %v3571_v35 }
  0xd1   :  { %v3974_v9 = vadd.f32 %v304_v7, %v3885_v10  ;;  %1154 = vmatpush.msra.mxu1 %v3529_v22 }
  0xd2   :  { %v339_v21 = vpop.f32.mrf.mxu2  ;;  %1137 = vmatpush.msra.mxu0 %v3578_v37 }
  0xd3   :  { %5558 = vst [vmem:[#allocation35_spill] sm:$0xff] %v3974_v9  ;;  %v3979_v13 = vadd.f32 %v339_v21, %v3971_v15  ;;  %v436_v25 = vpop.f32.mrf.mxu3  ;;  %v266_v3 = vpop.f32.mrf.mxu0  ;;  %1155 = vmatpush.msra.mxu1 %v3539_v24 }
  0xd4   :  { %v3984_v16 = vadd.f32 %v436_v25, %v3945_v60  ;;  %v3987_v30 = vadd.f32 %v266_v3, %v3894_v26  ;;  %1138 = vmatpush.msra.mxu0 %v5514_v32  ;;  %v4005_v32 = vperm.slane %v408_v34, 1 }
  0xd5   :  { %5559 = vst [vmem:[#allocation28_spill] sm:$0xff] %v3979_v13  ;;  %1156 = vmatpush.msra.mxu1 %v3553_v28 }
  0xd6   :  { %5560 = vst [vmem:[#allocation37_spill] sm:$0xff] %v3984_v16 }
  0xd7   :  { %5561 = vst [vmem:[#allocation29_spill] sm:$0xff] %v3987_v30  ;;  %1157 = vmatpush.msra.mxu1 %v3562_v33 }
  0xd8   :  { %v307_v22 = vpop.f32.mrf.mxu1 }
  0xd9   :  { %v3993_v35 = vadd.f32 %v307_v22, %v3885_v10  ;;  %1158 = vmatpush.msra.mxu1 %v3573_v36 }
  0xda   :  { %v342_v24 = vpop.f32.mrf.mxu2 }
  0xdb   :  { %5562 = vst [vmem:[#allocation31_spill] sm:$0xff] %v3993_v35  ;;  %v3997_v37 = vadd.f32 %v342_v24, %v3971_v15  ;;  %v439_v5 = vpop.f32.mrf.mxu3  ;;  %v269_v12 = vpop.f32.mrf.mxu0 }
  0xdc   :  { %v4000_v7 = vadd.f32 %v439_v5, %v3945_v60  ;;  %v4003_v28 = vadd.f32 %v269_v12, %v3894_v26  ;;  %v4019_v12 = vperm.slane %v408_v34, 2 }
  0xdd   :  { %5563 = vst [vmem:[#allocation33_spill] sm:$0xff] %v3997_v37 }
  0xde   :  { %5564 = vst [vmem:[#allocation36_spill] sm:$0xff] %v4000_v7 }
  0xdf   :  { %5565 = vst [vmem:[#allocation52_spill] sm:$0xff] %v4003_v28 }
  0xe0   :  { %v310_v33 = vpop.f32.mrf.mxu1 }
  0xe1   :  { %v4008_v21 = vadd.f32 %v310_v33, %v3885_v10 }
  0xe2   :  { %v345_v25 = vpop.f32.mrf.mxu2 }
  0xe3   :  { %5566 = vst [vmem:[#allocation38_spill] sm:$0xff] %v4008_v21  ;;  %v4011_v36 = vadd.f32 %v345_v25, %v3971_v15  ;;  %v442_v3 = vpop.f32.mrf.mxu3  ;;  %v474_v22 = vpop.f32.mrf.mxu0 }
  0xe4   :  { %v4014_v24 = vadd.f32 %v442_v3, %v3945_v60  ;;  %v4017_v5 = vadd.f32 %v474_v22, %v4005_v32 }
  0xe5   :  { %5567 = vst [vmem:[#allocation59_spill] sm:$0xff] %v4011_v36 }
  0xe6   :  { %5568 = vst [vmem:[#allocation40_spill] sm:$0xff] %v4014_v24 }
  0xe7   :  { %5569 = vst [vmem:[#allocation64_spill] sm:$0xff] %v4017_v5 }
  0xe8   :  { %v515_v46 = vpop.f32.mrf.mxu1 }
  0xe9   :  { %v4022_v40 = vadd.f32 %v515_v46, %v4019_v12 }
  0xea   :  { %v348_v33 = vpop.f32.mrf.mxu2 }
  0xeb   :  { %5570 = vst [vmem:[#allocation45_spill] sm:$0xff] %v4022_v40  ;;  %v4025_v16 = vadd.f32 %v348_v33, %v3971_v15  ;;  %v445_v25 = vpop.f32.mrf.mxu3  ;;  %v477_v7 = vpop.f32.mrf.mxu0 }
  0xec   :  { %v4028_v21 = vadd.f32 %v445_v25, %v3945_v60  ;;  %v4031_v3 = vadd.f32 %v477_v7, %v4005_v32 }
  0xed   :  { %5571 = vst [vmem:[#allocation50_spill] sm:$0xff] %v4025_v16 }
  0xee   :  { %5572 = vst [vmem:[#allocation57_spill] sm:$0xff] %v4028_v21 }
  0xef   :  { %5573 = vst [vmem:[#allocation62_spill] sm:$0xff] %v4031_v3 }
  0xf0   :  { %v518_v22 = vpop.f32.mrf.mxu1 }
  0xf1   :  { %v4034_v34 = vadd.f32 %v518_v22, %v4019_v12 }
  0xf2   :  { %v351_v5 = vpop.f32.mrf.mxu2 }
  0xf3   :  { %5574 = vst [vmem:[#allocation68_spill] sm:$0xff] %v4034_v34  ;;  %v4037_v46 = vadd.f32 %v351_v5, %v3971_v15  ;;  %v448_v40 = vpop.f32.mrf.mxu3  ;;  %v480_v28 = vpop.f32.mrf.mxu0 }
  0xf4   :  { %v4040_v33 = vadd.f32 %v448_v40, %v3945_v60  ;;  %v4043_v16 = vadd.f32 %v480_v28, %v4005_v32 }
  0xf5   :  { %5575 = vst [vmem:[#allocation70_spill] sm:$0xff] %v4037_v46 }
  0xf6   :  { %5576 = vst [vmem:[#allocation71_spill] sm:$0xff] %v4040_v33 }
  0xf7   :  { %5577 = vst [vmem:[#allocation72_spill] sm:$0xff] %v4043_v16 }
  0xf8   :  { %v521_v25 = vpop.f32.mrf.mxu1 }
  0xf9   :  { %v4046_v7 = vadd.f32 %v521_v25, %v4019_v12 }
  0xfa   :  { %v354_v3 = vpop.f32.mrf.mxu2 }
  0xfb   :  { %5578 = vst [vmem:[#allocation73_spill] sm:$0xff] %v4046_v7  ;;  %v4049_v22 = vadd.f32 %v354_v3, %v3971_v15  ;;  %v451_v34 = vpop.f32.mrf.mxu3  ;;  %v483_v24 = vpop.f32.mrf.mxu0 }
  0xfc   :  { %v4052_v5 = vadd.f32 %v451_v34, %v3945_v60  ;;  %v4055_v46 = vadd.f32 %v483_v24, %v4005_v32  ;;  %v255_v34 = vadd.f32 %v3869_v31, %v3894_v26 }
  0xfd   :  { %5579 = vst [vmem:[#allocation74_spill] sm:$0xff] %v4049_v22 }
  0xfe   :  { %5580 = vst [vmem:[#allocation75_spill] sm:$0xff] %v4055_v46 }
 0x100   :  { %v524_v40 = vpop.f32.mrf.mxu1 }
 0x101   :  { %v4058_v28 = vadd.f32 %v524_v40, %v4019_v12  ;;  %v296_v40 = vadd.f32 %v3889_v63, %v3885_v10 }
 0x102   :  { %v357_v16 = vpop.f32.mrf.mxu2 }
 0x103   :  { %5581 = vst [vmem:[#allocation76_spill] sm:$0xff] %v4058_v28  ;;  %v4061_v25 = vadd.f32 %v357_v16, %v3971_v15  ;;  %v454_v7 = vpop.f32.mrf.mxu3  ;;  %v486_v35 = vpop.f32.mrf.mxu0 }
 0x104   :  { %v4064_v3 = vadd.f32 %v486_v35, %v4005_v32 }
 0x105   :  { %5582 = vst [vmem:[#allocation77_spill] sm:$0xff] %v4061_v25 }
 0x106   :  { %5583 = vst [vmem:[#allocation78_spill] sm:$0xff] %v4064_v3 }
 0x108   :  { %v527_v22 = vpop.f32.mrf.mxu1 }
 0x109   :  { %v4069_v24 = vadd.f32 %v527_v22, %v4019_v12  ;;  %v455_v22 = vadd.f32 %v454_v7, %v3945_v60 }
 0x10a   :  { %v636_v28 = vpop.f32.mrf.mxu2 }
 0x10b   :  { %5584 = vst [vmem:[#allocation79_spill] sm:$0xff] %v4069_v24  ;;  %v799_v46 = vadd.f32 %v636_v28, %v255_v34  ;;  %v656_v30 = vpop.f32.mrf.mxu3  ;;  %v489_v16 = vpop.f32.mrf.mxu0 }
 0x10c   :  { %v819_v25 = vadd.f32 %v656_v30, %v296_v40  ;;  %v4074_v36 = vadd.f32 %v489_v16, %v4005_v32 }
 0x10d   :  { %v2646_v35 = vmul.f32 -1.442695, %v799_v46 }
 0x10e   :  { %5585 = vst [vmem:[#allocation80_spill] sm:$0xff] %v4074_v36  ;;  %v2647_v3 = vmul.f32 -1.442695, %v819_v25 }
 0x10f   :  { %2712 = vpow2.f32 %v2646_v35 }
 0x110   :  { %2714 = vpow2.f32 %v2647_v3 }
 0x111   :  { %v530_v21 = vpop.f32.mrf.mxu1 }
 0x112   :  { %v4077_v31 = vadd.f32 %v530_v21, %v4019_v12 }
 0x113   :  { %v492_v63 = vpop.f32.mrf.mxu0 }
 0x114   :  { %5586 = vst [vmem:[#allocation81_spill] sm:$0xff] %v4077_v31  ;;  %v744_v24 = vpop.f32.mrf.mxu3  ;;  %v4081_v28 = vadd.f32 %v492_v63, %v4005_v32  ;;  %v676_v31 = vpop.f32.mrf.mxu2 }
 0x115   :  { %v847_v9 = vadd.f32 %v744_v24, %v455_v22  ;;  %v2713_v30 = vpop.eup %2712 }
 0x116   :  { %5587 = vst [vmem:[#allocation82_spill] sm:$0xff] %v4081_v28  ;;  %v2715_v34 = vpop.eup %2714  ;;  %v803_v40 = vadd.f32 1.0, %v2713_v30  ;;  %v4089_v30 = vld [vmem:[%s5249_s7] ss:$0 sm:$0xff] }
 0x117   :  { %v2648_v16 = vmul.f32 -1.442695, %v847_v9  ;;  %v823_v46 = vadd.f32 1.0, %v2715_v34 }
 0x118   :  { %2716 = vrcp.f32 %v803_v40  ;;  %v813_v33 = vand.u32 2147483647, %v803_v40  ;;  %vm809_vm2 = vweird.f32 %v803_v40 }
 0x119   :  { %v533_v25 = vpop.f32.mrf.mxu1  ;;  %2718 = vrcp.f32 %v823_v46  ;;  %vm829_vm6 = vweird.f32 %v823_v46 }
 0x11a   :  { %v4084_v3 = vadd.f32 %v533_v25, %v4019_v12  ;;  %2720 = vpow2.f32 %v2648_v16  ;;  %v815_v25 = vand.u32 2147483648, %v803_v40  ;;  %vm814_vm4 = vcmp.eq.f32.partialorder %v813_v33, 8.507059e+37 }
 0x11b   :  { %v495_v21 = vpop.f32.mrf.mxu0 }
 0x11c   :  { %5588 = vst [vmem:[#allocation83_spill] sm:$0xff] %v4084_v3  ;;  %v496_v6 = vadd.f32 %v495_v21, %v4005_v32  ;;  %v839_v3 = vadd.f32 %v4089_v30, %v676_v31 }
 0x11e   :  { %v2717_v60 = vpop.eup %2716 }
 0x11f   :  { %v2719_v7 = vpop.eup %2718  ;;  %v805_v35 = vmul.f32 %v2717_v60, %v803_v40  ;;  %vm810_vm1 = vweird.f32 %v2717_v60  ;;  %v833_v40 = vand.u32 2147483647, %v823_v46 }
 0x120   :  { %v2721_v24 = vpop.eup %2720  ;;  %v825_v22 = vmul.f32 %v2719_v7, %v823_v46  ;;  %vm811_vm3 = vmor %vm809_vm2, %vm810_vm1  ;;  %vm830_vm5 = vweird.f32 %v2719_v7 }
 0x121   :  { %v851_v63 = vadd.f32 1.0, %v2721_v24  ;;  %v806_v9 = vsub.f32 1.0, %v805_v35  ;;  %v536_v58 = vpop.f32.mrf.mxu1  ;;  %v816_v35 = vor.u32 1.1754944e-38, %v815_v25  ;;  %vm831_vm7 = vmor %vm829_vm6, %vm830_vm5  ;;  %vm834_vm9 = vcmp.eq.f32.partialorder %v833_v40, 8.507059e+37 }
 0x122   :  { %v826_v34 = vsub.f32 1.0, %v825_v22 }
 0x123   :  { %2722 = vrcp.f32 %v851_v63  ;;  %v764_v16 = vpop.f32.mrf.mxu0  ;;  %v807_v37 = vmul.f32 %v2717_v60, %v806_v9  ;;  %v337_v9 = vadd.f32 %v3954_v0, %v3971_v15  ;;  %v861_v15 = vand.u32 2147483647, %v851_v63 }
 0x124   :  { %v827_v36 = vmul.f32 %v2719_v7, %v826_v34  ;;  %v867_v61 = vadd.f32 %v764_v16, %v496_v6  ;;  %v835_v6 = vand.u32 2147483648, %v823_v46  ;;  %vm857_vm10 = vweird.f32 %v851_v63 }
 0x125   :  { %v808_v24 = vadd.f32 %v2717_v60, %v807_v37  ;;  %vm862_vm12 = vcmp.eq.f32.partialorder %v861_v15, 8.507059e+37 }
 0x126   :  { %v2649_v13 = vmul.f32 -1.442695, %v867_v61  ;;  %v828_v21 = vadd.f32 %v2719_v7, %v827_v36  ;;  %v863_v36 = vand.u32 2147483648, %v851_v63  ;;  %v836_v33 = vor.u32 1.1754944e-38, %v835_v6 }
 0x127   :  { %v812_v22 = vsel %vm811_vm3, %v2717_v60, %v808_v24 }
 0x128   :  { %2724 = vpow2.f32 %v2649_v13  ;;  %v817_v32 = vsel %vm814_vm4, %v816_v35, %v812_v22  ;;  %v832_v31 = vsel %vm831_vm7, %v2719_v7, %v828_v21  ;;  %v4098_v13 = vld [vmem:[%s5250_s8] ss:$0 sm:$0xff]  ;;  %v864_v7 = vor.u32 1.1754944e-38, %v863_v36  ;;  %v4109_v36 = vld [vmem:[#allocation13 + $0x170] sm:$0xff] }
 0x129   :  { %v2723_v28 = vpop.eup %2722  ;;  %v840_v34 = vmul.f32 %v839_v3, %v817_v32  ;;  %v784_v25 = vpop.f32.mrf.mxu1  ;;  %v837_v46 = vsel %vm834_vm9, %v836_v33, %v832_v31 }
 0x12a   :  { %v853_v37 = vmul.f32 %v2723_v28, %v851_v63  ;;  %vm858_vm8 = vweird.f32 %v2723_v28  ;;  %v887_v35 = vadd.f32 %v4098_v13, %v784_v25  ;;  %v843_v32 = vsub.f32 1.0, %v837_v46  ;;  %v4124_v25 = vld [vmem:[#allocation13 + $0x128] sm:$0xff] }
 0x12b   :  { %v841_v16 = vadd.f32 %v840_v34, %v337_v9  ;;  %vm859_vm11 = vmor %vm857_vm10, %vm858_vm8  ;;  %v845_v6 = vmul.f32 0.0, %v837_v46  ;;  %v4141_v46 = vld [vmem:[#allocation13 + $0xe0] sm:$0xff] }
 0x12c   :  { %v854_v61 = vsub.f32 1.0, %v853_v37  ;;  %v537_v37 = vadd.f32 %v536_v58, %v4019_v12 }
 0x12d   :  { %2726 = vtanh.f32 %v841_v16 }
 0x12e   :  { %v2725_v60 = vpop.eup %2724  ;;  %v855_v0 = vmul.f32 %v2723_v28, %v854_v61 }
 0x12f   :  { %v871_v3 = vadd.f32 1.0, %v2725_v60  ;;  %v4114_v60 = vld [vmem:[#allocation13 + $0x158] sm:$0xff] }
 0x130   :  { %v856_v24 = vadd.f32 %v2723_v28, %v855_v0  ;;  %v4129_v0 = vld [vmem:[#allocation13 + $0x110] sm:$0xff] }
 0x131   :  { %2728 = vrcp.f32 %v871_v3  ;;  %v883_v58 = vand.u32 2147483648, %v871_v3  ;;  %v881_v33 = vand.u32 2147483647, %v871_v3  ;;  %vm877_vm14 = vweird.f32 %v871_v3 }
 0x132   :  { %v860_v22 = vsel %vm859_vm11, %v2723_v28, %v856_v24  ;;  %v5590_v24 = vld [vmem:[#allocation46_spill] sm:$0xff] }
 0x133   :  { %v2727_v21 = vpop.eup %2726  ;;  %v865_v9 = vsel %vm862_vm12, %v864_v7, %v860_v22  ;;  %vm882_vm0 = vcmp.eq.f32.partialorder %v881_v33, 8.507059e+37  ;;  %v4153_v7 = vld [vmem:[#allocation13 + $0x160] sm:$0xff]  ;;  %v5594_v22 = vld [vmem:[#allocation44_spill] sm:$0xff]  ;;  %v4233_v33 = vld [vmem:[#allocation12 + $0xd8] sm:$0xff] }
 0x134   :  { %v844_v34 = vmul.f32 %v2727_v21, %v843_v32  ;;  %v888_v16 = vmul.f32 %v887_v35, %v865_v9  ;;  %v5593_v35 = vld [vmem:[#allocation53_spill] sm:$0xff]  ;;  %v4159_v32 = vld [vmem:[#allocation13 + $0x148] sm:$0xff]  ;;  %v5596_v21 = vld [vmem:[#allocation55_spill] sm:$0xff] }
 0x135   :  { %v5597_v9 = vld [vmem:[#allocation48_spill] sm:$0xff] }
 0x136   :  { %v4102_v40 = vadd.f32 %v845_v6, %v844_v34  ;;  %v889_v63 = vadd.f32 %v888_v16, %v537_v37  ;;  %v4165_v34 = vld [vmem:[#allocation13 + $0x130] sm:$0xff]  ;;  %v5602_v37 = vld [vmem:[#allocation39_spill] sm:$0xff] }
 0x137   :  { %v2729_v61 = vpop.eup %2728  ;;  %5598 = vst [vmem:[#allocation46_spill] sm:$0xff] %v4165_v34  ;;  %v5600_v6 = vld [vmem:[#allocation61_spill] sm:$0xff] }
 0x138   :  { %v873_v31 = vmul.f32 %v2729_v61, %v871_v3  ;;  %911 = vmatmul.f32.vlgmr.msra.gmra.mxu2 %v4102_v40  ;;  %931 = vmatmul.f32.vlgmr.msra.gmra.mxu3 %v4102_v40  ;;  %vm878_vm13 = vweird.f32 %v2729_v61  ;;  %2730 = vtanh.f32 %v889_v63  ;;  %v5603_v16 = vld [vmem:[#allocation65_spill] sm:$0xff]  ;;  %v5610_v63 = vld [vmem:[#allocation63_spill] sm:$0xff] }
 0x139   :  { %951 = vmatmul.f32.vlgmr.msrb.gmra.mxu0 %v4102_v40  ;;  %1163 = vmatpush.msra.mxu2 %v3602_v43  ;;  %v4119_v43 = vld [vmem:[#allocation13 + $0x140] sm:$0xff]  ;;  %vm879_vm15 = vmor %vm877_vm14, %vm878_vm13 }
 0x13a   :  { %v874_v28 = vsub.f32 1.0, %v873_v31  ;;  %1183 = vmatpush.msra.mxu3 %v3583_v38  ;;  %1203 = vmatpush.msrb.mxu0 %v4109_v36  ;;  %v5609_v31 = vld [vmem:[#allocation69_spill] sm:$0xff] }
 0x13b   :  { %1164 = vmatpush.msra.mxu2 %v3615_v53  ;;  %v884_v53 = vor.u32 1.1754944e-38, %v883_v58  ;;  %v4219_v58 = vld [vmem:[#allocation12 + $0x108] sm:$0xff] }
 0x13c   :  { %v875_v12 = vmul.f32 %v2729_v61, %v874_v28  ;;  %1184 = vmatpush.msra.mxu3 %v3597_v42  ;;  %1204 = vmatpush.msrb.mxu0 %v4114_v60  ;;  %v4190_v28 = vld [vmem:[#allocation12 + $0x168] sm:$0xff]  ;;  %5616 = vst [vmem:[#allocation55_spill] sm:$0xff] %v4219_v58 }
 0x13d   :  { %1165 = vmatpush.msra.mxu2 %v3622_v59 }
 0x13e   :  { %v876_v38 = vadd.f32 %v2729_v61, %v875_v12  ;;  %1185 = vmatpush.msra.mxu3 %v3606_v48  ;;  %1205 = vmatpush.msrb.mxu0 %v4119_v43  ;;  %v2731_v15 = vpop.eup %2730  ;;  %v4226_v12 = vld [vmem:[#allocation12 + $0xf0] sm:$0xff] }
 0x13f   :  { %1166 = vmatpush.msra.mxu2 %v3635_v4 }
 0x140   :  { %v880_v42 = vsel %vm879_vm15, %v2729_v61, %v876_v38  ;;  %1186 = vmatpush.msra.mxu3 %v3617_v55  ;;  %1206 = vmatpush.msrb.mxu0 %v4124_v25  ;;  %v4134_v55 = vld [vmem:[#allocation13 + $0xf8] sm:$0xff]  ;;  %v5604_v61 = vld [vmem:[#allocation56_spill] sm:$0xff]  ;;  %v4240_v38 = vld [vmem:[#allocation12 + $0xc0] sm:$0xff] }
 0x141   :  { %v885_v59 = vsel %vm882_vm0, %v884_v53, %v880_v42  ;;  %1167 = vmatpush.msra.mxu2 %v3646_v39  ;;  %5622 = vst [vmem:[#allocation65_spill] sm:$0xff] %v4240_v38  ;;  %v4243_v53 = vld [vmem:[#allocation12 + $0xc8] sm:$0xff]  ;;  %v4249_v42 = vld [vmem:[#allocation12 + $0xb0] sm:$0xff] }
 0x142   :  { %v891_v48 = vsub.f32 1.0, %v885_v59  ;;  %1187 = vmatpush.msra.mxu3 %v3627_v17  ;;  %1207 = vmatpush.msrb.mxu0 %v4129_v0  ;;  %v893_v3 = vmul.f32 0.0, %v885_v59  ;;  %v5589_v17 = vld [vmem:[#allocation41_spill] sm:$0xff]  ;;  %5623 = vst [vmem:[#allocation56_spill] sm:$0xff] %v4243_v53  ;;  %v4255_v59 = vld [vmem:[#allocation12 + $0x98] sm:$0xff] }
 0x143   :  { %1168 = vmatpush.msra.mxu2 %v3659_v23  ;;  %v4148_v23 = vld [vmem:[#allocation13 + $0x178] sm:$0xff]  ;;  %5595 = vst [vmem:[#allocation41_spill] sm:$0xff] %v4159_v32 }
 0x144   :  { %v892_v4 = vmul.f32 %v2731_v15, %v891_v48  ;;  %1188 = vmatpush.msra.mxu3 %v3641_v45  ;;  %1208 = vmatpush.msrb.mxu0 %v4134_v55  ;;  %v5592_v45 = vld [vmem:[#allocation43_spill] sm:$0xff]  ;;  %v4258_v48 = vld [vmem:[#allocation12 + $0x78] sm:$0xff] }
 0x145   :  { %1169 = vmatpush.msra.mxu2 %v3666_v41  ;;  %v5591_v41 = vld [vmem:[#allocation49_spill] sm:$0xff]  ;;  %5628 = vst [vmem:[#allocation69_spill] sm:$0xff] %v4258_v48  ;;  %v4261_v15 = vld [vmem:[#allocation12 + $0x80] sm:$0xff] }
 0x146   :  { %v4138_v39 = vadd.f32 %v893_v3, %v892_v4  ;;  %1189 = vmatpush.msra.mxu3 %v5589_v17  ;;  %1209 = vmatpush.msrb.mxu0 %v4141_v46  ;;  %5629 = vst [vmem:[#allocation63_spill] sm:$0xff] %v4261_v15  ;;  %v4264_v4 = vld [vmem:[#allocation12 + $0x60] sm:$0xff]  ;;  %v4267_v3 = vld [vmem:[#allocation12 + $0x68] sm:$0xff] }
 0x147   :  { %1170 = vmatpush.msra.mxu2 %v5590_v24  ;;  %5631 = vst [vmem:[#allocation84_spill] sm:$0xff] %v4267_v3  ;;  %v4270_v17 = vld [vmem:[#allocation12 + $0x48] sm:$0xff]  ;;  %v4273_v24 = vld [vmem:[#allocation12 + $0x50] sm:$0xff] }
 0x148   :  { %971 = vmatmul.f32.vlgmr.msrb.gmra.mxu1 %v4138_v39  ;;  %991 = vmatmul.f32.vlgmr.msrb.gmra.mxu2 %v4138_v39  ;;  %5632 = vst [vmem:[#allocation85_spill] sm:$0xff] %v4270_v17 }
 0x149   :  { %1011 = vmatmul.f32.vlgmr.msrb.gmra.mxu3 %v4138_v39  ;;  %1223 = vmatpush.msrb.mxu1 %v4148_v23  ;;  %5633 = vst [vmem:[#allocation86_spill] sm:$0xff] %v4273_v24 }
 0x14a   :  { %1171 = vmatpush.msra.mxu2 %v5591_v41  ;;  %1190 = vmatpush.msra.mxu3 %v5592_v45  ;;  %v4276_v41 = vld [vmem:[#allocation12 + $0x30] sm:$0xff]  ;;  %v4279_v45 = vld [vmem:[#allocation12 + $0x38] sm:$0xff] }
 0x14b   :  { %1224 = vmatpush.msrb.mxu1 %v4153_v7  ;;  %1210 = vmatpush.msrb.mxu0 %v5536_v20  ;;  %v5599_v20 = vld [vmem:[#allocation58_spill] sm:$0xff]  ;;  %5634 = vst [vmem:[#allocation87_spill] sm:$0xff] %v4276_v41 }
 0x14c   :  { %1172 = vmatpush.msra.mxu2 %v5593_v35  ;;  %1191 = vmatpush.msra.mxu3 %v5594_v22  ;;  %5618 = vst [vmem:[#allocation58_spill] sm:$0xff] %v4226_v12  ;;  %v4282_v35 = vld [vmem:[#allocation12 + $0x18] sm:$0xff]  ;;  %v4285_v22 = vld [vmem:[#allocation12 + $0x20] sm:$0xff] }
 0x14d   :  { %1225 = vmatpush.msrb.mxu1 %v4159_v32  ;;  %1211 = vmatpush.msrb.mxu0 %v5540_v44  ;;  %v5601_v44 = vld [vmem:[#allocation54_spill] sm:$0xff]  ;;  %5635 = vst [vmem:[#allocation88_spill] sm:$0xff] %v4279_v45 }
 0x14e   :  { %1173 = vmatpush.msra.mxu2 %v5596_v21  ;;  %1192 = vmatpush.msra.mxu3 %v5597_v9  ;;  %5620 = vst [vmem:[#allocation54_spill] sm:$0xff] %v4233_v33  ;;  %v4288_v21 = vld [vmem:[#allocation12] sm:$0xff]  ;;  %v4291_v9 = vld [vmem:[#allocation12 + $0x8] sm:$0xff] }
 0x14f   :  { %1226 = vmatpush.msrb.mxu1 %v4165_v34  ;;  %1212 = vmatpush.msrb.mxu0 %v5542_v11  ;;  %v5605_v11 = vld [vmem:[#allocation42_spill] sm:$0xff]  ;;  %5636 = vst [vmem:[#allocation89_spill] sm:$0xff] %v4282_v35 }
 0x150   :  { %1174 = vmatpush.msra.mxu2 %v5599_v20  ;;  %1193 = vmatpush.msra.mxu3 %v5521_v62  ;;  %v5606_v62 = vld [vmem:[#allocation67_spill] sm:$0xff]  ;;  %5637 = vst [vmem:[#allocation90_spill] sm:$0xff] %v4285_v22  ;;  %v258_v20 = vadd.f32 %v3906_v18, %v3894_v26  ;;  %v5641_v26 = vld [vmem:[#allocation82_spill] sm:$0xff] }
 0x151   :  { %1227 = vmatpush.msrb.mxu1 %v5529_v50  ;;  %1213 = vmatpush.msrb.mxu0 %v5545_v47  ;;  %v5607_v50 = vld [vmem:[#allocation60_spill] sm:$0xff]  ;;  %v5608_v47 = vld [vmem:[#allocation47_spill] sm:$0xff]  ;;  %5625 = vst [vmem:[#allocation67_spill] sm:$0xff] %v4249_v42 }
 0x152   :  { %1175 = vmatpush.msra.mxu2 %v5600_v6  ;;  %1194 = vmatpush.msra.mxu3 %v5601_v44  ;;  %5627 = vst [vmem:[#allocation47_spill] sm:$0xff] %v4255_v59  ;;  %v5640_v6 = vld [vmem:[#allocation27_spill] sm:$0xff] }
 0x153   :  { %1228 = vmatpush.msrb.mxu1 %v5602_v37  ;;  %1214 = vmatpush.msrb.mxu0 %v5547_v57  ;;  %v5611_v57 = vld [vmem:[#allocation66_spill] sm:$0xff]  ;;  %5638 = vst [vmem:[#allocation91_spill] sm:$0xff] %v4288_v21  ;;  %v299_v44 = vadd.f32 %v5640_v6, %v3885_v10 }
 0x154   :  { %1176 = vmatpush.msra.mxu2 %v5603_v16  ;;  %1195 = vmatpush.msra.mxu3 %v5604_v61  ;;  %5630 = vst [vmem:[#allocation66_spill] sm:$0xff] %v4264_v4 }
 0x155   :  { %1229 = vmatpush.msrb.mxu1 %v5605_v11  ;;  %1215 = vmatpush.msrb.mxu0 %v5551_v1  ;;  %v4195_v1 = vld [vmem:[#allocation12 + $0x170] sm:$0xff]  ;;  %5639 = vst [vmem:[#allocation92_spill] sm:$0xff] %v4291_v9 }
 0x156   :  { %1177 = vmatpush.msra.mxu2 %v5606_v62  ;;  %1196 = vmatpush.msra.mxu3 %v5607_v50 }
 0x157   :  { %1230 = vmatpush.msrb.mxu1 %v5608_v47  ;;  %1216 = vmatpush.msrb.mxu0 %v5552_v51  ;;  %v4198_v51 = vld [vmem:[#allocation12 + $0x150] sm:$0xff] }
 0x158   :  { %1178 = vmatpush.msra.mxu2 %v5609_v31  ;;  %1197 = vmatpush.msra.mxu3 %v5610_v63 }
 0x159   :  { %1231 = vmatpush.msrb.mxu1 %v5541_v49  ;;  %1217 = vmatpush.msrb.mxu0 %v5553_v54  ;;  %v4202_v49 = vld [vmem:[#allocation12 + $0x158] sm:$0xff] }
 0x15a   :  { %1198 = vmatpush.msra.mxu3 %v5611_v57  ;;  %1351 = vmatpush.msrb.mxu2 %v4190_v28  ;;  %v4205_v54 = vld [vmem:[#allocation12 + $0x138] sm:$0xff] }
 0x15b   :  { %1232 = vmatpush.msrb.mxu1 %v5543_v19  ;;  %1218 = vmatpush.msrb.mxu0 %v5555_v8  ;;  %5612 = vst [vmem:[#allocation49_spill] sm:$0xff] %v4205_v54  ;;  %v4209_v19 = vld [vmem:[#allocation12 + $0x140] sm:$0xff] }
 0x15c   :  { %1371 = vmatpush.msrb.mxu3 %v4195_v1  ;;  %1352 = vmatpush.msrb.mxu2 %v4198_v51  ;;  %5613 = vst [vmem:[#allocation43_spill] sm:$0xff] %v4209_v19  ;;  %v4212_v8 = vld [vmem:[#allocation12 + $0x120] sm:$0xff] }
 0x15d   :  { %1233 = vmatpush.msrb.mxu1 %v5546_v52  ;;  %5614 = vst [vmem:[#allocation53_spill] sm:$0xff] %v4212_v8  ;;  %v4216_v52 = vld [vmem:[#allocation12 + $0x128] sm:$0xff] }
 0x15e   :  { %1372 = vmatpush.msrb.mxu3 %v4202_v49  ;;  %1353 = vmatpush.msrb.mxu2 %v4205_v54  ;;  %5615 = vst [vmem:[#allocation44_spill] sm:$0xff] %v4216_v52 }
 0x15f   :  { %1234 = vmatpush.msrb.mxu1 %v3762_v27  ;;  %v4223_v27 = vld [vmem:[#allocation12 + $0x110] sm:$0xff] }
 0x160   :  { %1373 = vmatpush.msrb.mxu3 %v4209_v19  ;;  %1354 = vmatpush.msrb.mxu2 %v4212_v8  ;;  %5617 = vst [vmem:[#allocation48_spill] sm:$0xff] %v4223_v27 }
 0x161   :  { %1235 = vmatpush.msrb.mxu1 %v3772_v29  ;;  %v4230_v29 = vld [vmem:[#allocation12 + $0xf8] sm:$0xff] }
 0x162   :  { %1374 = vmatpush.msrb.mxu3 %v4216_v52  ;;  %1355 = vmatpush.msrb.mxu2 %v4219_v58  ;;  %5619 = vst [vmem:[#allocation61_spill] sm:$0xff] %v4230_v29 }
 0x163   :  { %1236 = vmatpush.msrb.mxu1 %v3778_v14  ;;  %v4237_v14 = vld [vmem:[#allocation12 + $0xe0] sm:$0xff] }
 0x164   :  { %1375 = vmatpush.msrb.mxu3 %v4223_v27  ;;  %1356 = vmatpush.msrb.mxu2 %v4226_v12  ;;  %5621 = vst [vmem:[#allocation39_spill] sm:$0xff] %v4237_v14 }
 0x165   :  { %1237 = vmatpush.msrb.mxu1 %v3783_v2  ;;  %v4246_v2 = vld [vmem:[#allocation12 + $0xa8] sm:$0xff] }
 0x166   :  { %1376 = vmatpush.msrb.mxu3 %v4230_v29  ;;  %1357 = vmatpush.msrb.mxu2 %v4233_v33  ;;  %5624 = vst [vmem:[#allocation42_spill] sm:$0xff] %v4246_v2 }
 0x167   :  { %1238 = vmatpush.msrb.mxu1 %v3791_v56  ;;  %v4252_v56 = vld [vmem:[#allocation12 + $0x90] sm:$0xff] }
 0x168   :  { %1377 = vmatpush.msrb.mxu3 %v4237_v14  ;;  %1358 = vmatpush.msrb.mxu2 %v4240_v38  ;;  %5626 = vst [vmem:[#allocation60_spill] sm:$0xff] %v4252_v56 }
 0x16a   :  { %1378 = vmatpush.msrb.mxu3 %v4243_v53  ;;  %1359 = vmatpush.msrb.mxu2 %v4246_v2 }
 0x16c   :  { %1379 = vmatpush.msrb.mxu3 %v4249_v42  ;;  %1360 = vmatpush.msrb.mxu2 %v4252_v56 }
 0x16e   :  { %1380 = vmatpush.msrb.mxu3 %v4255_v59  ;;  %1361 = vmatpush.msrb.mxu2 %v4258_v48 }
 0x170   :  { %1381 = vmatpush.msrb.mxu3 %v4261_v15  ;;  %1362 = vmatpush.msrb.mxu2 %v4264_v4 }
 0x172   :  { %1382 = vmatpush.msrb.mxu3 %v4267_v3  ;;  %1363 = vmatpush.msrb.mxu2 %v4270_v17 }
 0x174   :  { %1383 = vmatpush.msrb.mxu3 %v4273_v24  ;;  %1364 = vmatpush.msrb.mxu2 %v4276_v41 }
 0x176   :  { %1384 = vmatpush.msrb.mxu3 %v4279_v45  ;;  %1365 = vmatpush.msrb.mxu2 %v4282_v35 }
 0x178   :  { %1385 = vmatpush.msrb.mxu3 %v4285_v22  ;;  %1366 = vmatpush.msrb.mxu2 %v4288_v21 }
 0x17a   :  { %1386 = vmatpush.msrb.mxu3 %v4291_v9 }
 0x1bb   :  { %v912_v37 = vpop.f32.mrf.mxu2  ;;  %v932_v16 = vpop.f32.mrf.mxu3 }
 0x1bc   :  { %v1027_v61 = vadd.f32 %v912_v37, %v258_v20  ;;  %v1047_v11 = vadd.f32 %v932_v16, %v299_v44 }
 0x1be   :  { %v2650_v62 = vmul.f32 -1.442695, %v1027_v61  ;;  %v2651_v50 = vmul.f32 -1.442695, %v1047_v11 }
 0x1c0   :  { %2732 = vpow2.f32 %v2650_v62 }
 0x1c1   :  { %2734 = vpow2.f32 %v2651_v50 }
 0x1c5   :  { %v972_v47 = vpop.f32.mrf.mxu1 }
 0x1c6   :  { %v2733_v31 = vpop.eup %2732  ;;  %v1075_v63 = vadd.f32 %v972_v47, %v4052_v5 }
 0x1c7   :  { %v2735_v57 = vpop.eup %2734  ;;  %v1031_v9 = vadd.f32 1.0, %v2733_v31 }
 0x1c8   :  { %v1051_v21 = vadd.f32 1.0, %v2735_v57  ;;  %v2652_v22 = vmul.f32 -1.442695, %v1075_v63  ;;  %v952_v63 = vpop.f32.mrf.mxu0 }
 0x1c9   :  { %2736 = vrcp.f32 %v1031_v9  ;;  %v1043_v5 = vand.u32 2147483648, %v1031_v9  ;;  %v1041_v31 = vand.u32 2147483647, %v1031_v9  ;;  %vm1037_vm2 = vweird.f32 %v1031_v9 }
 0x1ca   :  { %2738 = vrcp.f32 %v1051_v21  ;;  %vm1057_vm6 = vweird.f32 %v1051_v21 }
 0x1cb   :  { %2740 = vpow2.f32 %v2652_v22  ;;  %v992_v10 = vpop.f32.mrf.mxu2  ;;  %vm1042_vm4 = vcmp.eq.f32.partialorder %v1041_v31, 8.507059e+37 }
 0x1cc   :  { %v1095_v18 = vadd.f32 %v992_v10, %v5641_v26  ;;  %v1044_v10 = vor.u32 1.1754944e-38, %v1043_v5 }
 0x1ce   :  { %v2653_v20 = vmul.f32 -1.442695, %v1095_v18  ;;  %v1067_v18 = vadd.f32 %v4089_v30, %v952_v63 }
 0x1cf   :  { %v2737_v6 = vpop.eup %2736 }
 0x1d0   :  { %v2739_v44 = vpop.eup %2738  ;;  %v1033_v37 = vmul.f32 %v2737_v6, %v1031_v9  ;;  %2742 = vpow2.f32 %v2653_v20  ;;  %vm1038_vm1 = vweird.f32 %v2737_v6 }
 0x1d1   :  { %v2741_v16 = vpop.eup %2740  ;;  %v1053_v61 = vmul.f32 %v2739_v44, %v1051_v21  ;;  %vm1039_vm3 = vmor %vm1037_vm2, %vm1038_vm1  ;;  %vm1058_vm5 = vweird.f32 %v2739_v44 }
 0x1d2   :  { %v1034_v11 = vsub.f32 1.0, %v1033_v37  ;;  %v1079_v62 = vadd.f32 1.0, %v2741_v16  ;;  %vm1059_vm7 = vmor %vm1057_vm6, %vm1058_vm5 }
 0x1d3   :  { %v1054_v50 = vsub.f32 1.0, %v1053_v61 }
 0x1d4   :  { %v1035_v47 = vmul.f32 %v2737_v6, %v1034_v11  ;;  %2744 = vrcp.f32 %v1079_v62  ;;  %v1063_v11 = vand.u32 2147483648, %v1051_v21  ;;  %v1089_v31 = vand.u32 2147483647, %v1079_v62 }
 0x1d5   :  { %v1055_v22 = vmul.f32 %v2739_v44, %v1054_v50  ;;  %v1061_v50 = vand.u32 2147483647, %v1051_v21  ;;  %vm1085_vm10 = vweird.f32 %v1079_v62 }
 0x1d6   :  { %v2743_v57 = vpop.eup %2742  ;;  %v1036_v35 = vadd.f32 %v2737_v6, %v1035_v47  ;;  %v5642_v47 = vld [vmem:[#allocation28_spill] sm:$0xff]  ;;  %v1064_v17 = vor.u32 1.1754944e-38, %v1063_v11  ;;  %vm1090_vm12 = vcmp.eq.f32.partialorder %v1089_v31, 8.507059e+37 }
 0x1d7   :  { %v1099_v26 = vadd.f32 1.0, %v2743_v57  ;;  %v1056_v16 = vadd.f32 %v2739_v44, %v1055_v22  ;;  %v1091_v57 = vand.u32 2147483648, %v1079_v62  ;;  %vm1062_vm9 = vcmp.eq.f32.partialorder %v1061_v50, 8.507059e+37  ;;  %v1012_v22 = vpop.f32.mrf.mxu3 }
 0x1d8   :  { %v1040_v20 = vsel %vm1039_vm3, %v2737_v6, %v1036_v35 }
 0x1d9   :  { %v1045_v37 = vsel %vm1042_vm4, %v1044_v10, %v1040_v20  ;;  %2746 = vrcp.f32 %v1099_v26  ;;  %v1060_v5 = vsel %vm1059_vm7, %v2739_v44, %v1056_v16  ;;  %v1092_v21 = vor.u32 1.1754944e-38, %v1091_v57 }
 0x1da   :  { %v2745_v61 = vpop.eup %2744  ;;  %v1068_v45 = vmul.f32 %v1067_v18, %v1045_v37  ;;  %v1065_v10 = vsel %vm1062_vm9, %v1064_v17, %v1060_v5  ;;  %vm1105_vm14 = vweird.f32 %v1099_v26  ;;  %v5643_v5 = vld [vmem:[#allocation83_spill] sm:$0xff] }
 0x1db   :  { %v1081_v41 = vmul.f32 %v2745_v61, %v1079_v62  ;;  %vm1086_vm8 = vweird.f32 %v2745_v61  ;;  %v1073_v50 = vmul.f32 %v1065_v10, %v4102_v40  ;;  %v1109_v62 = vand.u32 2147483647, %v1099_v26  ;;  %v4310_v40 = vld [vmem:[#allocation12 + $0x178] sm:$0xff] }
 0x1dc   :  { %v1069_v9 = vadd.f32 %v1068_v45, %v5642_v47  ;;  %vm1087_vm11 = vmor %vm1085_vm10, %vm1086_vm8  ;;  %v1071_v45 = vsub.f32 1.0, %v1065_v10 }
 0x1dd   :  { %v1082_v24 = vsub.f32 1.0, %v1081_v41  ;;  %v1115_v41 = vadd.f32 %v4098_v13, %v1012_v22  ;;  %vm1110_vm0 = vcmp.eq.f32.partialorder %v1109_v62, 8.507059e+37  ;;  %v4320_v22 = vld [vmem:[#allocation13 + $0x150] sm:$0xff]  ;;  %v4371_v62 = vld [vmem:[#allocation13 + $0xc0] sm:$0xff] }
 0x1de   :  { %2748 = vtanh.f32 %v1069_v9  ;;  %v1111_v9 = vand.u32 2147483648, %v1099_v26 }
 0x1df   :  { %v2747_v35 = vpop.eup %2746  ;;  %v1083_v6 = vmul.f32 %v2745_v61, %v1082_v24 }
 0x1e0   :  { %v1101_v63 = vmul.f32 %v2747_v35, %v1099_v26  ;;  %vm1106_vm13 = vweird.f32 %v2747_v35  ;;  %v1112_v31 = vor.u32 1.1754944e-38, %v1111_v9  ;;  %v4363_v9 = vld [vmem:[#allocation13 + $0xd8] sm:$0xff] }
 0x1e1   :  { %v1084_v18 = vadd.f32 %v2745_v61, %v1083_v6  ;;  %vm1107_vm15 = vmor %vm1105_vm14, %vm1106_vm13 }
 0x1e2   :  { %v1102_v20 = vsub.f32 1.0, %v1101_v63  ;;  %v4313_v63 = vld [vmem:[#allocation13 + $0x168] sm:$0xff] }
 0x1e3   :  { %v1088_v37 = vsel %vm1087_vm11, %v2745_v61, %v1084_v18  ;;  %v4324_v18 = vld [vmem:[#allocation12 + $0x148] sm:$0xff] }
 0x1e4   :  { %v2749_v44 = vpop.eup %2748  ;;  %v1103_v16 = vmul.f32 %v2747_v35, %v1102_v20  ;;  %v1093_v11 = vsel %vm1090_vm12, %v1092_v21, %v1088_v37  ;;  %v4327_v21 = vld [vmem:[#allocation13 + $0x138] sm:$0xff] }
 0x1e5   :  { %v1116_v24 = vmul.f32 %v1115_v41, %v1093_v11  ;;  %v1072_v47 = vmul.f32 %v2749_v44, %v1071_v45  ;;  %v4332_v45 = vld [vmem:[#allocation12 + $0x130] sm:$0xff]  ;;  %v4335_v44 = vld [vmem:[#allocation13 + $0x120] sm:$0xff]  ;;  %v4341_v11 = vld [vmem:[#allocation12 + $0x118] sm:$0xff] }
 0x1e6   :  { %v1104_v17 = vadd.f32 %v2747_v35, %v1103_v16 }
 0x1e7   :  { %v1117_v6 = vadd.f32 %v1116_v24, %v5643_v5  ;;  %v4305_v57 = vadd.f32 %v1073_v50, %v1072_v47  ;;  %v4344_v24 = vld [vmem:[#allocation13 + $0x108] sm:$0xff]  ;;  %v4355_v47 = vld [vmem:[#allocation13 + $0xf0] sm:$0xff]  ;;  %v4374_v5 = vld [vmem:[#allocation12 + $0xb8] sm:$0xff] }
 0x1e8   :  { %v1108_v61 = vsel %vm1107_vm15, %v2747_v35, %v1104_v17  ;;  %v4317_v35 = vld [vmem:[#allocation12 + $0x160] sm:$0xff]  ;;  %v4358_v50 = vld [vmem:[#allocation12 + $0xe8] sm:$0xff]  ;;  %v4366_v17 = vld [vmem:[#allocation12 + $0xd0] sm:$0xff] }
 0x1e9   :  { %2750 = vtanh.f32 %v1117_v6  ;;  %1139 = vmatmul.f32.vlgmr.msra.gmra.mxu0 %v4305_v57  ;;  %1159 = vmatmul.f32.vlgmr.msra.gmra.mxu1 %v4305_v57  ;;  %v1113_v26 = vsel %vm1110_vm0, %v1112_v31, %v1108_v61  ;;  %v4377_v6 = vld [vmem:[#allocation13 + $0xc8] sm:$0xff]  ;;  %v4384_v31 = vld [vmem:[#allocation12 + $0xa0] sm:$0xff] }
 0x1ea   :  { %1179 = vmatmul.f32.vlgmr.msra.gmra.mxu2 %v4305_v57  ;;  %1391 = vmatpush.msra.mxu0 %v4310_v40  ;;  %v1119_v10 = vsub.f32 1.0, %v1113_v26  ;;  %v1121_v41 = vmul.f32 %v1113_v26, %v4138_v39  ;;  %v4351_v39 = vld [vmem:[#allocation12 + $0x100] sm:$0xff]  ;;  %v4381_v61 = vld [vmem:[#allocation13 + $0xa8] sm:$0xff]  ;;  %v4387_v26 = vld [vmem:[#allocation13 + $0xb0] sm:$0xff] }
 0x1eb   :  { %1411 = vmatpush.msra.mxu1 %v4313_v63  ;;  %1431 = vmatpush.msra.mxu2 %v4109_v36 }
 0x1ec   :  { %1392 = vmatpush.msra.mxu0 %v4317_v35 }
 0x1ed   :  { %1412 = vmatpush.msra.mxu1 %v4320_v22  ;;  %1432 = vmatpush.msra.mxu2 %v4114_v60 }
 0x1ee   :  { %1393 = vmatpush.msra.mxu0 %v4324_v18 }
 0x1ef   :  { %v2751_v20 = vpop.eup %2750  ;;  %1413 = vmatpush.msra.mxu1 %v4327_v21  ;;  %1433 = vmatpush.msra.mxu2 %v4119_v43 }
 0x1f0   :  { %v1120_v37 = vmul.f32 %v2751_v20, %v1119_v10  ;;  %1394 = vmatpush.msra.mxu0 %v4332_v45  ;;  %v4390_v10 = vld [vmem:[#allocation13 + $0x118] sm:$0xff]  ;;  %v4393_v20 = vld [vmem:[#allocation13 + $0x90] sm:$0xff] }
 0x1f1   :  { %1414 = vmatpush.msra.mxu1 %v4335_v44  ;;  %1434 = vmatpush.msra.mxu2 %v4124_v25  ;;  %5644 = vst [vmem:[#allocation27_spill] sm:$0xff] %v4390_v10 }
 0x1f2   :  { %v4339_v16 = vadd.f32 %v1121_v41, %v1120_v37  ;;  %1395 = vmatpush.msra.mxu0 %v4341_v11  ;;  %5645 = vst [vmem:[#allocation82_spill] sm:$0xff] %v4393_v20  ;;  %v4396_v37 = vld [vmem:[#allocation12 + $0x88] sm:$0xff]  ;;  %v4399_v41 = vld [vmem:[#allocation13 + $0x98] sm:$0xff] }
 0x1f3   :  { %1415 = vmatpush.msra.mxu1 %v4344_v24  ;;  %1435 = vmatpush.msra.mxu2 %v4129_v0  ;;  %5646 = vst [vmem:[#allocation28_spill] sm:$0xff] %v4396_v37 }
 0x1f4   :  { %1199 = vmatmul.f32.vlgmr.msra.gmra.mxu3 %v4339_v16  ;;  %1219 = vmatmul.f32.vlgmr.msrb.gmra.mxu0 %v4339_v16  ;;  %5647 = vst [vmem:[#allocation83_spill] sm:$0xff] %v4399_v41 }
 0x1f5   :  { %1239 = vmatmul.f32.vlgmr.msrb.gmra.mxu1 %v4339_v16  ;;  %1396 = vmatpush.msra.mxu0 %v4351_v39 }
 0x1f6   :  { %1451 = vmatpush.msra.mxu3 %v4148_v23  ;;  %1416 = vmatpush.msra.mxu1 %v4355_v47 }
 0x1f7   :  { %1397 = vmatpush.msra.mxu0 %v4358_v50  ;;  %1436 = vmatpush.msra.mxu2 %v4134_v55 }
 0x1f8   :  { %1452 = vmatpush.msra.mxu3 %v4153_v7  ;;  %1417 = vmatpush.msra.mxu1 %v4363_v9 }
 0x1f9   :  { %1398 = vmatpush.msra.mxu0 %v4366_v17  ;;  %1437 = vmatpush.msra.mxu2 %v4141_v46 }
 0x1fa   :  { %1453 = vmatpush.msra.mxu3 %v4159_v32  ;;  %1418 = vmatpush.msra.mxu1 %v4371_v62  ;;  %v4405_v32 = vld [vmem:[#allocation13 + $0x78] sm:$0xff] }
 0x1fb   :  { %1399 = vmatpush.msra.mxu0 %v4374_v5  ;;  %1438 = vmatpush.msra.mxu2 %v4377_v6  ;;  %5649 = vst [vmem:[#allocation94_spill] sm:$0xff] %v4405_v32 }
 0x1fc   :  { %1454 = vmatpush.msra.mxu3 %v4165_v34  ;;  %1419 = vmatpush.msra.mxu1 %v4381_v61  ;;  %v4402_v34 = vld [vmem:[#allocation13 + $0x100] sm:$0xff] }
 0x1fd   :  { %1400 = vmatpush.msra.mxu0 %v4384_v31  ;;  %1439 = vmatpush.msra.mxu2 %v4387_v26  ;;  %5648 = vst [vmem:[#allocation93_spill] sm:$0xff] %v4402_v34 }
 0x1fe   :  { %1455 = vmatpush.msra.mxu3 %v4390_v10  ;;  %1420 = vmatpush.msra.mxu1 %v4393_v20  ;;  %v4408_v10 = vld [vmem:[#allocation12 + $0x70] sm:$0xff]  ;;  %v4411_v20 = vld [vmem:[#allocation13 + $0x80] sm:$0xff] }
 0x1ff   :  { %1401 = vmatpush.msra.mxu0 %v4396_v37  ;;  %1440 = vmatpush.msra.mxu2 %v4399_v41  ;;  %5650 = vst [vmem:[#allocation95_spill] sm:$0xff] %v4408_v10  ;;  %v4414_v37 = vld [vmem:[#allocation13 + $0xe8] sm:$0xff]  ;;  %v4417_v41 = vld [vmem:[#allocation13 + $0x60] sm:$0xff] }
 0x200   :  { %1456 = vmatpush.msra.mxu3 %v4402_v34  ;;  %1421 = vmatpush.msra.mxu1 %v4405_v32  ;;  %5651 = vst [vmem:[#allocation96_spill] sm:$0xff] %v4411_v20  ;;  %v4420_v34 = vld [vmem:[#allocation12 + $0x58] sm:$0xff]  ;;  %v4423_v32 = vld [vmem:[#allocation13 + $0x68] sm:$0xff] }
 0x201   :  { %1402 = vmatpush.msra.mxu0 %v4408_v10  ;;  %1441 = vmatpush.msra.mxu2 %v4411_v20  ;;  %5652 = vst [vmem:[#allocation97_spill] sm:$0xff] %v4414_v37  ;;  %v4426_v10 = vld [vmem:[#allocation13 + $0xd0] sm:$0xff]  ;;  %v4429_v20 = vld [vmem:[#allocation13 + $0x48] sm:$0xff] }
 0x202   :  { %1457 = vmatpush.msra.mxu3 %v4414_v37  ;;  %5653 = vst [vmem:[#allocation98_spill] sm:$0xff] %v4417_v41  ;;  %1422 = vmatpush.msra.mxu1 %v4417_v41  ;;  %v4432_v37 = vld [vmem:[#allocation12 + $0x40] sm:$0xff]  ;;  %v4435_v41 = vld [vmem:[#allocation13 + $0x50] sm:$0xff] }
 0x203   :  { %5654 = vst [vmem:[#allocation99_spill] sm:$0xff] %v4420_v34  ;;  %1403 = vmatpush.msra.mxu0 %v4420_v34  ;;  %1442 = vmatpush.msra.mxu2 %v4423_v32  ;;  %v4438_v34 = vld [vmem:[#allocation13 + $0xb8] sm:$0xff] }
 0x204   :  { %5655 = vst [vmem:[#allocation100_spill] sm:$0xff] %v4423_v32  ;;  %1458 = vmatpush.msra.mxu3 %v4426_v10  ;;  %1423 = vmatpush.msra.mxu1 %v4429_v20  ;;  %v4441_v32 = vld [vmem:[#allocation13 + $0x30] sm:$0xff] }
 0x205   :  { %5656 = vst [vmem:[#allocation101_spill] sm:$0xff] %v4426_v10  ;;  %1404 = vmatpush.msra.mxu0 %v4432_v37  ;;  %1443 = vmatpush.msra.mxu2 %v4435_v41  ;;  %v4444_v10 = vld [vmem:[#allocation12 + $0x28] sm:$0xff] }
 0x206   :  { %5657 = vst [vmem:[#allocation102_spill] sm:$0xff] %v4429_v20  ;;  %1459 = vmatpush.msra.mxu3 %v4438_v34  ;;  %1424 = vmatpush.msra.mxu1 %v4441_v32  ;;  %v4447_v20 = vld [vmem:[#allocation13 + $0x38] sm:$0xff] }
 0x207   :  { %5658 = vst [vmem:[#allocation103_spill] sm:$0xff] %v4432_v37  ;;  %1405 = vmatpush.msra.mxu0 %v4444_v10  ;;  %1444 = vmatpush.msra.mxu2 %v4447_v20  ;;  %v4450_v37 = vld [vmem:[#allocation13 + $0xa0] sm:$0xff] }
 0x208   :  { %5659 = vst [vmem:[#allocation104_spill] sm:$0xff] %v4435_v41  ;;  %1460 = vmatpush.msra.mxu3 %v4450_v37  ;;  %v4453_v41 = vld [vmem:[#allocation13 + $0x18] sm:$0xff] }
 0x209   :  { %5660 = vst [vmem:[#allocation105_spill] sm:$0xff] %v4438_v34  ;;  %1425 = vmatpush.msra.mxu1 %v4453_v41  ;;  %v4456_v34 = vld [vmem:[#allocation12 + $0x10] sm:$0xff] }
 0x20a   :  { %5661 = vst [vmem:[#allocation106_spill] sm:$0xff] %v4441_v32  ;;  %1406 = vmatpush.msra.mxu0 %v4456_v34  ;;  %v4459_v32 = vld [vmem:[#allocation13 + $0x20] sm:$0xff] }
 0x20b   :  { %5662 = vst [vmem:[#allocation107_spill] sm:$0xff] %v4444_v10  ;;  %1445 = vmatpush.msra.mxu2 %v4459_v32  ;;  %v4462_v10 = vld [vmem:[#allocation13 + $0x88] sm:$0xff] }
 0x20c   :  { %5663 = vst [vmem:[#allocation108_spill] sm:$0xff] %v4447_v20  ;;  %1461 = vmatpush.msra.mxu3 %v4462_v10  ;;  %v4465_v20 = vld [vmem:[#allocation13] sm:$0xff]  ;;  %1579 = vmatpush.msrb.mxu0 %v4190_v28 }
 0x20d   :  { %5664 = vst [vmem:[#allocation109_spill] sm:$0xff] %v4450_v37  ;;  %1426 = vmatpush.msra.mxu1 %v4465_v20  ;;  %v4468_v37 = vld [vmem:[#allocation13 + $0x8] sm:$0xff] }
 0x20e   :  { %5665 = vst [vmem:[#allocation110_spill] sm:$0xff] %v4453_v41  ;;  %1446 = vmatpush.msra.mxu2 %v4468_v37  ;;  %v4472_v41 = vld [vmem:[#allocation13 + $0x70] sm:$0xff]  ;;  %1580 = vmatpush.msrb.mxu0 %v4198_v51 }
 0x20f   :  { %5666 = vst [vmem:[#allocation111_spill] sm:$0xff] %v4456_v34  ;;  %1462 = vmatpush.msra.mxu3 %v4472_v41  ;;  %1599 = vmatpush.msrb.mxu1 %v4195_v1  ;;  %v4477_v34 = vld [vmem:[#allocation13 + $0x58] sm:$0xff] }
 0x210   :  { %5667 = vst [vmem:[#allocation112_spill] sm:$0xff] %v4459_v32  ;;  %1581 = vmatpush.msrb.mxu0 %v4205_v54  ;;  %v5688_v54 = vld [vmem:[#allocation33_spill] sm:$0xff] }
 0x211   :  { %5668 = vst [vmem:[#allocation113_spill] sm:$0xff] %v4462_v10  ;;  %1463 = vmatpush.msra.mxu3 %v4477_v34  ;;  %1600 = vmatpush.msrb.mxu1 %v4202_v49  ;;  %v4482_v10 = vld [vmem:[#allocation13 + $0x40] sm:$0xff] }
 0x212   :  { %5669 = vst [vmem:[#allocation114_spill] sm:$0xff] %v4465_v20  ;;  %1582 = vmatpush.msrb.mxu0 %v4212_v8 }
 0x213   :  { %5670 = vst [vmem:[#allocation115_spill] sm:$0xff] %v4468_v37  ;;  %1464 = vmatpush.msra.mxu3 %v4482_v10  ;;  %1601 = vmatpush.msrb.mxu1 %v4209_v19 }
 0x214   :  { %5671 = vst [vmem:[#allocation116_spill] sm:$0xff] %v4472_v41  ;;  %v4487_v41 = vld [vmem:[#allocation13 + $0x28] sm:$0xff]  ;;  %1583 = vmatpush.msrb.mxu0 %v4219_v58 }
 0x215   :  { %5672 = vst [vmem:[#allocation117_spill] sm:$0xff] %v4477_v34  ;;  %1465 = vmatpush.msra.mxu3 %v4487_v41  ;;  %1602 = vmatpush.msrb.mxu1 %v4216_v52  ;;  %v4492_v34 = vld [vmem:[#allocation13 + $0x10] sm:$0xff] }
 0x216   :  { %5673 = vst [vmem:[#allocation118_spill] sm:$0xff] %v4482_v10  ;;  %1584 = vmatpush.msrb.mxu0 %v4226_v12  ;;  %v5686_v12 = vld [vmem:[#allocation80_spill] sm:$0xff] }
 0x217   :  { %5674 = vst [vmem:[#allocation119_spill] sm:$0xff] %v4487_v41  ;;  %1466 = vmatpush.msra.mxu3 %v4492_v34  ;;  %1603 = vmatpush.msrb.mxu1 %v4223_v27  ;;  %v5687_v27 = vld [vmem:[#allocation71_spill] sm:$0xff] }
 0x218   :  { %5675 = vst [vmem:[#allocation120_spill] sm:$0xff] %v4492_v34  ;;  %1585 = vmatpush.msrb.mxu0 %v4233_v33  ;;  %v5676_v34 = vld [vmem:[#allocation85_spill] sm:$0xff] }
 0x219   :  { %1604 = vmatpush.msrb.mxu1 %v4230_v29  ;;  %v5685_v33 = vld [vmem:[#allocation25_spill] sm:$0xff] }
 0x21a   :  { %1586 = vmatpush.msrb.mxu0 %v4240_v38  ;;  %v5677_v38 = vld [vmem:[#allocation86_spill] sm:$0xff] }
 0x21b   :  { %1605 = vmatpush.msrb.mxu1 %v4237_v14  ;;  %v5684_v14 = vld [vmem:[#allocation51_spill] sm:$0xff] }
 0x21c   :  { %1587 = vmatpush.msrb.mxu0 %v4246_v2  ;;  %v5679_v2 = vld [vmem:[#allocation88_spill] sm:$0xff] }
 0x21d   :  { %1606 = vmatpush.msrb.mxu1 %v4243_v53  ;;  %v5678_v53 = vld [vmem:[#allocation87_spill] sm:$0xff] }
 0x21e   :  { %1588 = vmatpush.msrb.mxu0 %v4252_v56  ;;  %v5681_v56 = vld [vmem:[#allocation90_spill] sm:$0xff] }
 0x21f   :  { %1607 = vmatpush.msrb.mxu1 %v4249_v42  ;;  %v5680_v42 = vld [vmem:[#allocation89_spill] sm:$0xff] }
 0x220   :  { %1589 = vmatpush.msrb.mxu0 %v4258_v48  ;;  %v5683_v48 = vld [vmem:[#allocation92_spill] sm:$0xff] }
 0x221   :  { %1608 = vmatpush.msrb.mxu1 %v4255_v59  ;;  %v5682_v59 = vld [vmem:[#allocation91_spill] sm:$0xff] }
 0x222   :  { %1590 = vmatpush.msrb.mxu0 %v4264_v4 }
 0x223   :  { %1609 = vmatpush.msrb.mxu1 %v4261_v15 }
 0x224   :  { %1591 = vmatpush.msrb.mxu0 %v5676_v34 }
 0x225   :  { %1610 = vmatpush.msrb.mxu1 %v4267_v3 }
 0x226   :  { %1592 = vmatpush.msrb.mxu0 %v5678_v53 }
 0x227   :  { %1611 = vmatpush.msrb.mxu1 %v5677_v38 }
 0x228   :  { %1593 = vmatpush.msrb.mxu0 %v5680_v42 }
 0x229   :  { %1612 = vmatpush.msrb.mxu1 %v5679_v2 }
 0x22a   :  { %1594 = vmatpush.msrb.mxu0 %v5682_v59 }
 0x22b   :  { %1613 = vmatpush.msrb.mxu1 %v5681_v56 }
 0x22d   :  { %1614 = vmatpush.msrb.mxu1 %v5683_v48 }
 0x266   :  { %v1140_v15 = vpop.f32.mrf.mxu0  ;;  %v1160_v4 = vpop.f32.mrf.mxu1 }
 0x267   :  { %v1255_v3 = vadd.f32 %v1140_v15, %v5684_v14  ;;  %v1275_v34 = vadd.f32 %v1160_v4, %v5685_v33 }
 0x269   :  { %v2654_v41 = vmul.f32 -1.442695, %v1255_v3  ;;  %v2655_v38 = vmul.f32 -1.442695, %v1275_v34 }
 0x26b   :  { %2752 = vpow2.f32 %v2654_v41 }
 0x26c   :  { %2754 = vpow2.f32 %v2655_v38 }
 0x271   :  { %v2753_v53 = vpop.eup %2752  ;;  %v1220_v2 = vpop.f32.mrf.mxu0 }
 0x272   :  { %v2755_v29 = vpop.eup %2754  ;;  %v1259_v42 = vadd.f32 1.0, %v2753_v53  ;;  %v1323_v56 = vadd.f32 %v1220_v2, %v5686_v12 }
 0x273   :  { %v1279_v10 = vadd.f32 1.0, %v2755_v29 }
 0x274   :  { %2756 = vrcp.f32 %v1259_v42  ;;  %v2657_v48 = vmul.f32 -1.442695, %v1323_v56  ;;  %v1271_v53 = vand.u32 2147483648, %v1259_v42  ;;  %v1269_v29 = vand.u32 2147483647, %v1259_v42  ;;  %v1180_v56 = vpop.f32.mrf.mxu2 }
 0x275   :  { %2758 = vrcp.f32 %v1279_v10  ;;  %vm1265_vm2 = vweird.f32 %v1259_v42  ;;  %v1291_v8 = vand.u32 2147483648, %v1279_v10  ;;  %vm1285_vm6 = vweird.f32 %v1279_v10 }
 0x276   :  { %2760 = vpow2.f32 %v2657_v48  ;;  %v1272_v48 = vor.u32 1.1754944e-38, %v1271_v53  ;;  %vm1270_vm4 = vcmp.eq.f32.partialorder %v1269_v29, 8.507059e+37  ;;  %v1289_v19 = vand.u32 2147483647, %v1279_v10 }
 0x277   :  { %v1200_v59 = vpop.f32.mrf.mxu3  ;;  %v1292_v53 = vor.u32 1.1754944e-38, %v1291_v8 }
 0x278   :  { %v1303_v14 = vadd.f32 %v1200_v59, %v5687_v27  ;;  %vm1290_vm8 = vcmp.eq.f32.partialorder %v1289_v19, 8.507059e+37 }
 0x27a   :  { %v2757_v15 = vpop.eup %2756  ;;  %v2656_v33 = vmul.f32 -1.442695, %v1303_v14 }
 0x27b   :  { %v2759_v4 = vpop.eup %2758  ;;  %v1261_v34 = vmul.f32 %v2757_v15, %v1259_v42  ;;  %vm1266_vm1 = vweird.f32 %v2757_v15 }
 0x27c   :  { %v1281_v3 = vmul.f32 %v2759_v4, %v1279_v10  ;;  %2762 = vpow2.f32 %v2656_v33  ;;  %v2761_v38 = vpop.eup %2760  ;;  %vm1267_vm3 = vmor %vm1265_vm2, %vm1266_vm1  ;;  %v1295_v33 = vadd.f32 %v4089_v30, %v1180_v56  ;;  %vm1286_vm5 = vweird.f32 %v2759_v4 }
 0x27d   :  { %v1262_v41 = vsub.f32 1.0, %v1261_v34  ;;  %v4522_v52 = vadd.f32 1.0, %v2761_v38  ;;  %vm1287_vm7 = vmor %vm1285_vm6, %vm1286_vm5 }
 0x27e   :  { %v1282_v58 = vsub.f32 1.0, %v1281_v3 }
 0x27f   :  { %v1263_v12 = vmul.f32 %v2757_v15, %v1262_v41  ;;  %2764 = vrcp.f32 %v4522_v52  ;;  %vm1333_vm14 = vweird.f32 %v4522_v52 }
 0x280   :  { %v1283_v2 = vmul.f32 %v2759_v4, %v1282_v58 }
 0x281   :  { %v1264_v27 = vadd.f32 %v2757_v15, %v1263_v12 }
 0x282   :  { %v2763_v59 = vpop.eup %2762  ;;  %v1284_v38 = vadd.f32 %v2759_v4, %v1283_v2 }
 0x283   :  { %v1268_v14 = vsel %vm1267_vm3, %v2757_v15, %v1264_v27  ;;  %v1307_v34 = vadd.f32 1.0, %v2763_v59 }
 0x284   :  { %v1273_v3 = vsel %vm1270_vm4, %v1272_v48, %v1268_v14  ;;  %v1288_v42 = vsel %vm1287_vm7, %v2759_v4, %v1284_v38  ;;  %v1240_v38 = vpop.f32.mrf.mxu1 }
 0x285   :  { %v1296_v41 = vmul.f32 %v1295_v33, %v1273_v3  ;;  %2766 = vrcp.f32 %v1307_v34  ;;  %v2765_v58 = vpop.eup %2764  ;;  %v1293_v29 = vsel %vm1290_vm8, %v1292_v53, %v1288_v42  ;;  %v1317_v14 = vand.u32 2147483647, %v1307_v34 }
 0x286   :  { %v1329_v15 = vmul.f32 %v2765_v58, %v4522_v52  ;;  %v1299_v59 = vsub.f32 1.0, %v1293_v29  ;;  %v1319_v33 = vand.u32 2147483648, %v1307_v34  ;;  %vm1313_vm10 = vweird.f32 %v1307_v34 }
 0x287   :  { %v1297_v12 = vadd.f32 %v1296_v41, %v5688_v54  ;;  %v1301_v54 = vmul.f32 %v1293_v29, %v4305_v57  ;;  %vm1318_vm12 = vcmp.eq.f32.partialorder %v1317_v14, 8.507059e+37  ;;  %vm1334_vm13 = vweird.f32 %v2765_v58  ;;  %v5699_v14 = vld [vmem:[#allocation27_spill] sm:$0xff] }
 0x288   :  { %v1330_v2 = vsub.f32 1.0, %v1329_v15  ;;  %v1320_v19 = vor.u32 1.1754944e-38, %v1319_v33  ;;  %vm1335_vm15 = vmor %vm1333_vm14, %vm1334_vm13  ;;  %v5700_v33 = vld [vmem:[#allocation100_spill] sm:$0xff] }
 0x289   :  { %2768 = vtanh.f32 %v1297_v12  ;;  %v1343_v12 = vadd.f32 %v4098_v13, %v1240_v38  ;;  %v1337_v13 = vand.u32 2147483647, %v4522_v52  ;;  %v5705_v38 = vld [vmem:[#allocation103_spill] sm:$0xff] }
 0x28a   :  { %v1331_v4 = vmul.f32 %v2765_v58, %v1330_v2 }
 0x28b   :  { %v2767_v30 = vpop.eup %2766  ;;  %vm1338_vm0 = vcmp.eq.f32.partialorder %v1337_v13, 8.507059e+37  ;;  %v5714_v13 = vld [vmem:[#allocation109_spill] sm:$0xff] }
 0x28c   :  { %v1309_v56 = vmul.f32 %v2767_v30, %v1307_v34  ;;  %vm1314_vm9 = vweird.f32 %v2767_v30  ;;  %v1332_v57 = vadd.f32 %v2765_v58, %v1331_v4  ;;  %v1339_v34 = vand.u32 2147483648, %v4522_v52  ;;  %v5704_v4 = vld [vmem:[#allocation104_spill] sm:$0xff] }
 0x28d   :  { %vm1315_vm11 = vmor %vm1313_vm10, %vm1314_vm9 }
 0x28e   :  { %v1310_v27 = vsub.f32 1.0, %v1309_v56  ;;  %v1336_v56 = vsel %vm1335_vm15, %v2765_v58, %v1332_v57  ;;  %v1340_v2 = vor.u32 1.1754944e-38, %v1339_v34  ;;  %v5711_v57 = vld [vmem:[#allocation101_spill] sm:$0xff]  ;;  %v5712_v34 = vld [vmem:[#allocation111_spill] sm:$0xff] }
 0x28f   :  { %v2769_v48 = vpop.eup %2768 }
 0x290   :  { %v1311_v3 = vmul.f32 %v2767_v30, %v1310_v27  ;;  %v1300_v10 = vmul.f32 %v2769_v48, %v1299_v59  ;;  %v5694_v27 = vld [vmem:[#allocation94_spill] sm:$0xff]  ;;  %v5696_v59 = vld [vmem:[#allocation96_spill] sm:$0xff]  ;;  %v5697_v48 = vld [vmem:[#allocation95_spill] sm:$0xff] }
 0x292   :  { %v1312_v41 = vadd.f32 %v2767_v30, %v1311_v3  ;;  %v4529_v8 = vadd.f32 %v1301_v54, %v1300_v10  ;;  %v5701_v3 = vld [vmem:[#allocation99_spill] sm:$0xff]  ;;  %v5702_v10 = vld [vmem:[#allocation102_spill] sm:$0xff]  ;;  %v5703_v54 = vld [vmem:[#allocation93_spill] sm:$0xff] }
 0x294   :  { %v1316_v42 = vsel %vm1315_vm11, %v2767_v30, %v1312_v41  ;;  %1367 = vmatmul.f32.vlgmr.msrb.gmra.mxu2 %v4529_v8  ;;  %1387 = vmatmul.f32.vlgmr.msrb.gmra.mxu3 %v4529_v8  ;;  %v5689_v30 = vld [vmem:[#allocation81_spill] sm:$0xff]  ;;  %v5706_v41 = vld [vmem:[#allocation106_spill] sm:$0xff] }
 0x295   :  { %v1321_v15 = vsel %vm1318_vm12, %v1320_v19, %v1316_v42  ;;  %1407 = vmatmul.f32.vlgmr.msra.gmra.mxu0 %v4529_v8  ;;  %1619 = vmatpush.msrb.mxu2 %v4310_v40  ;;  %v5707_v19 = vld [vmem:[#allocation97_spill] sm:$0xff]  ;;  %v5709_v42 = vld [vmem:[#allocation107_spill] sm:$0xff] }
 0x296   :  { %v1344_v53 = vmul.f32 %v1343_v12, %v1321_v15  ;;  %1639 = vmatpush.msrb.mxu3 %v4313_v63  ;;  %1659 = vmatpush.msra.mxu0 %v4109_v36  ;;  %v1341_v36 = vsel %vm1338_vm0, %v1340_v2, %v1336_v56  ;;  %v5708_v12 = vld [vmem:[#allocation108_spill] sm:$0xff]  ;;  %v5710_v15 = vld [vmem:[#allocation110_spill] sm:$0xff]  ;;  %v5717_v56 = vld [vmem:[#allocation43_spill] sm:$0xff] }
 0x297   :  { %1620 = vmatpush.msrb.mxu2 %v4317_v35  ;;  %v1349_v58 = vmul.f32 %v1341_v36, %v4339_v16  ;;  %v5693_v16 = vld [vmem:[#allocation28_spill] sm:$0xff] }
 0x298   :  { %v1345_v29 = vadd.f32 %v1344_v53, %v5689_v30  ;;  %1640 = vmatpush.msrb.mxu3 %v4320_v22  ;;  %1660 = vmatpush.msra.mxu0 %v4114_v60  ;;  %v1347_v60 = vsub.f32 1.0, %v1341_v36  ;;  %v5713_v53 = vld [vmem:[#allocation105_spill] sm:$0xff]  ;;  %v5718_v2 = vld [vmem:[#allocation116_spill] sm:$0xff] }
 0x299   :  { %1621 = vmatpush.msrb.mxu2 %v4324_v18  ;;  %v5715_v30 = vld [vmem:[#allocation113_spill] sm:$0xff] }
 0x29a   :  { %2770 = vtanh.f32 %v1345_v29  ;;  %1641 = vmatpush.msrb.mxu3 %v4327_v21  ;;  %1661 = vmatpush.msra.mxu0 %v4119_v43  ;;  %v5716_v29 = vld [vmem:[#allocation49_spill] sm:$0xff] }
 0x29b   :  { %1622 = vmatpush.msrb.mxu2 %v4332_v45  ;;  %v5719_v36 = vld [vmem:[#allocation53_spill] sm:$0xff] }
 0x29c   :  { %1642 = vmatpush.msrb.mxu3 %v4335_v44  ;;  %1662 = vmatpush.msra.mxu0 %v4124_v25 }
 0x29d   :  { %1623 = vmatpush.msrb.mxu2 %v4341_v11 }
 0x29e   :  { %1643 = vmatpush.msrb.mxu3 %v4344_v24  ;;  %1663 = vmatpush.msra.mxu0 %v4129_v0  ;;  %v5690_v0 = vld [vmem:[#allocation82_spill] sm:$0xff] }
 0x29f   :  { %1624 = vmatpush.msrb.mxu2 %v4351_v39 }
 0x2a0   :  { %v2771_v52 = vpop.eup %2770  ;;  %1644 = vmatpush.msrb.mxu3 %v4355_v47  ;;  %1664 = vmatpush.msra.mxu0 %v4134_v55  ;;  %v5691_v55 = vld [vmem:[#allocation41_spill] sm:$0xff] }
 0x2a1   :  { %v1348_v43 = vmul.f32 %v2771_v52, %v1347_v60  ;;  %1625 = vmatpush.msrb.mxu2 %v4358_v50  ;;  %v5720_v60 = vld [vmem:[#allocation44_spill] sm:$0xff] }
 0x2a2   :  { %1645 = vmatpush.msrb.mxu3 %v4363_v9  ;;  %1665 = vmatpush.msra.mxu0 %v4141_v46  ;;  %v5692_v46 = vld [vmem:[#allocation83_spill] sm:$0xff]  ;;  %v5723_v52 = vld [vmem:[#allocation48_spill] sm:$0xff] }
 0x2a3   :  { %v4561_v25 = vadd.f32 %v1349_v58, %v1348_v43  ;;  %1626 = vmatpush.msrb.mxu2 %v4366_v17  ;;  %v5726_v43 = vld [vmem:[#allocation61_spill] sm:$0xff]  ;;  %v5727_v58 = vld [vmem:[#allocation119_spill] sm:$0xff] }
 0x2a4   :  { %1646 = vmatpush.msrb.mxu3 %v4371_v62  ;;  %1666 = vmatpush.msra.mxu0 %v4377_v6 }
 0x2a5   :  { %1427 = vmatmul.f32.vlgmr.msra.gmra.mxu1 %v4561_v25  ;;  %1447 = vmatmul.f32.vlgmr.msra.gmra.mxu2 %v4561_v25 }
 0x2a6   :  { %1467 = vmatmul.f32.vlgmr.msra.gmra.mxu3 %v4561_v25  ;;  %1679 = vmatpush.msra.mxu1 %v4148_v23  ;;  %v5695_v23 = vld [vmem:[#allocation46_spill] sm:$0xff] }
 0x2a7   :  { %1627 = vmatpush.msrb.mxu2 %v4374_v5  ;;  %1647 = vmatpush.msrb.mxu3 %v4381_v61 }
 0x2a8   :  { %1680 = vmatpush.msra.mxu1 %v4153_v7  ;;  %1667 = vmatpush.msra.mxu0 %v4387_v26  ;;  %v5698_v7 = vld [vmem:[#allocation98_spill] sm:$0xff] }
 0x2a9   :  { %1628 = vmatpush.msrb.mxu2 %v4384_v31  ;;  %1648 = vmatpush.msrb.mxu3 %v5690_v0 }
 0x2aa   :  { %1681 = vmatpush.msra.mxu1 %v5691_v55  ;;  %1668 = vmatpush.msra.mxu0 %v5692_v46  ;;  %v5728_v55 = vld [vmem:[#allocation54_spill] sm:$0xff] }
 0x2ab   :  { %1629 = vmatpush.msrb.mxu2 %v5693_v16  ;;  %1649 = vmatpush.msrb.mxu3 %v5694_v27 }
 0x2ac   :  { %1682 = vmatpush.msra.mxu1 %v5695_v23  ;;  %1669 = vmatpush.msra.mxu0 %v5696_v59  ;;  %v5729_v23 = vld [vmem:[#allocation39_spill] sm:$0xff] }
 0x2ad   :  { %1630 = vmatpush.msrb.mxu2 %v5697_v48  ;;  %1650 = vmatpush.msrb.mxu3 %v5698_v7 }
 0x2ae   :  { %1683 = vmatpush.msra.mxu1 %v5699_v14  ;;  %1670 = vmatpush.msra.mxu0 %v5700_v33 }
 0x2af   :  { %1631 = vmatpush.msrb.mxu2 %v5701_v3  ;;  %1651 = vmatpush.msrb.mxu3 %v5702_v10 }
 0x2b0   :  { %1684 = vmatpush.msra.mxu1 %v5703_v54  ;;  %1671 = vmatpush.msra.mxu0 %v5704_v4 }
 0x2b1   :  { %1632 = vmatpush.msrb.mxu2 %v5705_v38  ;;  %1652 = vmatpush.msrb.mxu3 %v5706_v41 }
 0x2b2   :  { %1685 = vmatpush.msra.mxu1 %v5707_v19  ;;  %1672 = vmatpush.msra.mxu0 %v5708_v12 }
 0x2b3   :  { %1633 = vmatpush.msrb.mxu2 %v5709_v42  ;;  %1653 = vmatpush.msrb.mxu3 %v5710_v15 }
 0x2b4   :  { %1686 = vmatpush.msra.mxu1 %v5711_v57  ;;  %1673 = vmatpush.msra.mxu0 %v4459_v32  ;;  %v5752_v32 = vld [vmem:[#allocation78_spill] sm:$0xff] }
 0x2b5   :  { %1634 = vmatpush.msrb.mxu2 %v5712_v34  ;;  %1654 = vmatpush.msrb.mxu3 %v4465_v20  ;;  %v5751_v20 = vld [vmem:[#allocation57_spill] sm:$0xff]  ;;  %v5754_v34 = vld [vmem:[#allocation59_spill] sm:$0xff] }
 0x2b6   :  { %1687 = vmatpush.msra.mxu1 %v5713_v53  ;;  %1674 = vmatpush.msra.mxu0 %v4468_v37 }
 0x2b7   :  { %1805 = vmatpush.msra.mxu2 %v4190_v28  ;;  %1825 = vmatpush.msra.mxu3 %v4195_v1  ;;  %v5721_v28 = vld [vmem:[#allocation117_spill] sm:$0xff]  ;;  %v5722_v1 = vld [vmem:[#allocation55_spill] sm:$0xff] }
 0x2b8   :  { %1688 = vmatpush.msra.mxu1 %v5714_v13 }
 0x2b9   :  { %1806 = vmatpush.msra.mxu2 %v4198_v51  ;;  %1826 = vmatpush.msra.mxu3 %v4202_v49  ;;  %v5724_v51 = vld [vmem:[#allocation118_spill] sm:$0xff] }
 0x2ba   :  { %1689 = vmatpush.msra.mxu1 %v5715_v30  ;;  %v5725_v49 = vld [vmem:[#allocation58_spill] sm:$0xff] }
 0x2bb   :  { %1807 = vmatpush.msra.mxu2 %v5716_v29  ;;  %1827 = vmatpush.msra.mxu3 %v5717_v56  ;;  %v5730_v29 = vld [vmem:[#allocation120_spill] sm:$0xff]  ;;  %v5731_v56 = vld [vmem:[#allocation65_spill] sm:$0xff] }
 0x2bc   :  { %1690 = vmatpush.msra.mxu1 %v5718_v2 }
 0x2bd   :  { %1808 = vmatpush.msra.mxu2 %v5719_v36  ;;  %1828 = vmatpush.msra.mxu3 %v5720_v60  ;;  %v5732_v36 = vld [vmem:[#allocation56_spill] sm:$0xff]  ;;  %v5733_v60 = vld [vmem:[#allocation42_spill] sm:$0xff] }
 0x2be   :  { %1691 = vmatpush.msra.mxu1 %v5721_v28  ;;  %v5750_v28 = vld [vmem:[#allocation35_spill] sm:$0xff] }
 0x2bf   :  { %1809 = vmatpush.msra.mxu2 %v5722_v1  ;;  %1829 = vmatpush.msra.mxu3 %v5723_v52  ;;  %v5734_v1 = vld [vmem:[#allocation67_spill] sm:$0xff]  ;;  %v5735_v52 = vld [vmem:[#allocation60_spill] sm:$0xff] }
 0x2c0   :  { %1692 = vmatpush.msra.mxu1 %v5724_v51  ;;  %v5749_v51 = vld [vmem:[#allocation26_spill] sm:$0xff] }
 0x2c1   :  { %1810 = vmatpush.msra.mxu2 %v5725_v49  ;;  %1830 = vmatpush.msra.mxu3 %v5726_v43  ;;  %v5736_v49 = vld [vmem:[#allocation47_spill] sm:$0xff]  ;;  %v5737_v43 = vld [vmem:[#allocation69_spill] sm:$0xff] }
 0x2c2   :  { %1693 = vmatpush.msra.mxu1 %v5727_v58  ;;  %v5738_v58 = vld [vmem:[#allocation63_spill] sm:$0xff] }
 0x2c3   :  { %1811 = vmatpush.msra.mxu2 %v5728_v55  ;;  %1831 = vmatpush.msra.mxu3 %v5729_v23  ;;  %v5739_v55 = vld [vmem:[#allocation66_spill] sm:$0xff]  ;;  %v5740_v23 = vld [vmem:[#allocation84_spill] sm:$0xff] }
 0x2c4   :  { %1694 = vmatpush.msra.mxu1 %v5730_v29  ;;  %v5741_v29 = vld [vmem:[#allocation85_spill] sm:$0xff] }
 0x2c5   :  { %1812 = vmatpush.msra.mxu2 %v5731_v56  ;;  %1832 = vmatpush.msra.mxu3 %v5732_v36  ;;  %v5742_v56 = vld [vmem:[#allocation86_spill] sm:$0xff]  ;;  %v5743_v36 = vld [vmem:[#allocation87_spill] sm:$0xff] }
 0x2c7   :  { %1813 = vmatpush.msra.mxu2 %v5733_v60  ;;  %1833 = vmatpush.msra.mxu3 %v5734_v1  ;;  %v5744_v60 = vld [vmem:[#allocation88_spill] sm:$0xff]  ;;  %v5745_v1 = vld [vmem:[#allocation89_spill] sm:$0xff] }
 0x2c9   :  { %1814 = vmatpush.msra.mxu2 %v5735_v52  ;;  %1834 = vmatpush.msra.mxu3 %v5736_v49  ;;  %v5746_v52 = vld [vmem:[#allocation90_spill] sm:$0xff]  ;;  %v5747_v49 = vld [vmem:[#allocation91_spill] sm:$0xff] }
 0x2cb   :  { %1815 = vmatpush.msra.mxu2 %v5737_v43  ;;  %1835 = vmatpush.msra.mxu3 %v5738_v58  ;;  %v5748_v43 = vld [vmem:[#allocation92_spill] sm:$0xff] }
 0x2cd   :  { %1816 = vmatpush.msra.mxu2 %v5739_v55  ;;  %1836 = vmatpush.msra.mxu3 %v5740_v23 }
 0x2cf   :  { %1817 = vmatpush.msra.mxu2 %v5741_v29  ;;  %1837 = vmatpush.msra.mxu3 %v5742_v56 }
 0x2d1   :  { %1818 = vmatpush.msra.mxu2 %v5743_v36  ;;  %1838 = vmatpush.msra.mxu3 %v5744_v60 }
 0x2d3   :  { %1819 = vmatpush.msra.mxu2 %v5745_v1  ;;  %1839 = vmatpush.msra.mxu3 %v5746_v52 }
 0x2d5   :  { %1820 = vmatpush.msra.mxu2 %v5747_v49  ;;  %1840 = vmatpush.msra.mxu3 %v5748_v43 }
 0x317   :  { %v1368_v58 = vpop.f32.mrf.mxu2  ;;  %v1388_v55 = vpop.f32.mrf.mxu3 }
 0x318   :  { %v1483_v23 = vadd.f32 %v1368_v58, %v5749_v51  ;;  %v1503_v29 = vadd.f32 %v1388_v55, %v5750_v28 }
 0x31a   :  { %v2658_v2 = vmul.f32 -1.442695, %v1483_v23  ;;  %v2659_v56 = vmul.f32 -1.442695, %v1503_v29 }
 0x31c   :  { %2772 = vpow2.f32 %v2658_v2 }
 0x31d   :  { %2774 = vpow2.f32 %v2659_v56 }
 0x322   :  { %v2773_v36 = vpop.eup %2772  ;;  %v1428_v60 = vpop.f32.mrf.mxu1 }
 0x323   :  { %v2775_v37 = vpop.eup %2774  ;;  %v1487_v1 = vadd.f32 1.0, %v2773_v36  ;;  %v1531_v52 = vadd.f32 %v1428_v60, %v5751_v20  ;;  %v1408_v60 = vpop.f32.mrf.mxu0 }
 0x324   :  { %v1507_v30 = vadd.f32 1.0, %v2775_v37 }
 0x325   :  { %2776 = vrcp.f32 %v1487_v1  ;;  %v2660_v49 = vmul.f32 -1.442695, %v1531_v52  ;;  %v1499_v15 = vand.u32 2147483648, %v1487_v1  ;;  %v1497_v37 = vand.u32 2147483647, %v1487_v1 }
 0x326   :  { %2778 = vrcp.f32 %v1507_v30  ;;  %vm1493_vm2 = vweird.f32 %v1487_v1  ;;  %vm1513_vm6 = vweird.f32 %v1507_v30  ;;  %v1517_v12 = vand.u32 2147483647, %v1507_v30 }
 0x327   :  { %2780 = vpow2.f32 %v2660_v49  ;;  %vm1498_vm4 = vcmp.eq.f32.partialorder %v1497_v37, 8.507059e+37 }
 0x328   :  { %v1448_v43 = vpop.f32.mrf.mxu2  ;;  %vm1518_vm8 = vcmp.eq.f32.partialorder %v1517_v12, 8.507059e+37 }
 0x329   :  { %v1551_v51 = vadd.f32 %v1448_v43, %v5752_v32  ;;  %v1500_v43 = vor.u32 1.1754944e-38, %v1499_v15 }
 0x32b   :  { %v2777_v58 = vpop.eup %2776  ;;  %v2661_v28 = vmul.f32 -1.442695, %v1551_v51  ;;  %v4648_v51 = vld [vmem:[%s5249_s7] ss:$0 sm:$0xff] }
 0x32c   :  { %v2779_v55 = vpop.eup %2778  ;;  %v1489_v23 = vmul.f32 %v2777_v58, %v1487_v1  ;;  %vm1494_vm1 = vweird.f32 %v2777_v58  ;;  %5753 = vst [vmem:[#allocation51_spill] sm:$0xff] %v4648_v51 }
 0x32d   :  { %v1509_v2 = vmul.f32 %v2779_v55, %v1507_v30  ;;  %2782 = vpow2.f32 %v2661_v28  ;;  %v2781_v29 = vpop.eup %2780  ;;  %vm1495_vm3 = vmor %vm1493_vm2, %vm1494_vm1  ;;  %v1523_v28 = vadd.f32 %v4648_v51, %v1408_v60  ;;  %vm1514_vm5 = vweird.f32 %v2779_v55 }
 0x32e   :  { %v1490_v56 = vsub.f32 1.0, %v1489_v23  ;;  %v1535_v13 = vadd.f32 1.0, %v2781_v29  ;;  %vm1515_vm7 = vmor %vm1513_vm6, %vm1514_vm5 }
 0x32f   :  { %v1510_v36 = vsub.f32 1.0, %v1509_v2 }
 0x330   :  { %v1491_v20 = vmul.f32 %v2777_v58, %v1490_v56  ;;  %2784 = vrcp.f32 %v1535_v13  ;;  %vm1541_vm10 = vweird.f32 %v1535_v13 }
 0x331   :  { %v1511_v52 = vmul.f32 %v2779_v55, %v1510_v36  ;;  %v1519_v36 = vand.u32 2147483648, %v1507_v30 }
 0x332   :  { %v1492_v49 = vadd.f32 %v2777_v58, %v1491_v20 }
 0x333   :  { %v2783_v32 = vpop.eup %2782  ;;  %v1512_v56 = vadd.f32 %v2779_v55, %v1511_v52  ;;  %v1520_v42 = vor.u32 1.1754944e-38, %v1519_v36  ;;  %v1545_v52 = vand.u32 2147483647, %v1535_v13 }
 0x334   :  { %v1496_v23 = vsel %vm1495_vm3, %v2777_v58, %v1492_v49  ;;  %v1555_v2 = vadd.f32 1.0, %v2783_v32  ;;  %v1547_v58 = vand.u32 2147483648, %v1535_v13 }
 0x335   :  { %v1501_v29 = vsel %vm1498_vm4, %v1500_v43, %v1496_v23  ;;  %v1516_v53 = vsel %vm1515_vm7, %v2779_v55, %v1512_v56  ;;  %v1468_v43 = vpop.f32.mrf.mxu3  ;;  %vm1546_vm12 = vcmp.eq.f32.partialorder %v1545_v52, 8.507059e+37 }
 0x336   :  { %2786 = vrcp.f32 %v1555_v2  ;;  %v1524_v20 = vmul.f32 %v1523_v28, %v1501_v29  ;;  %v2785_v1 = vpop.eup %2784  ;;  %v1521_v49 = vsel %vm1518_vm8, %v1520_v42, %v1516_v53  ;;  %v1548_v23 = vor.u32 1.1754944e-38, %v1547_v58  ;;  %v5755_v58 = vld [vmem:[#allocation79_spill] sm:$0xff] }
 0x337   :  { %v1537_v15 = vmul.f32 %v2785_v1, %v1535_v13  ;;  %vm1542_vm9 = vweird.f32 %v2785_v1  ;;  %v1527_v29 = vsub.f32 1.0, %v1521_v49  ;;  %v1529_v12 = vmul.f32 %v1521_v49, %v4529_v8  ;;  %v4667_v49 = vld [vmem:[#allocation13 + $0x170] sm:$0xff] }
 0x338   :  { %v1525_v41 = vadd.f32 %v1524_v20, %v5754_v34  ;;  %vm1543_vm11 = vmor %vm1541_vm10, %vm1542_vm9  ;;  %v1567_v36 = vand.u32 2147483648, %v1555_v2  ;;  %vm1561_vm14 = vweird.f32 %v1555_v2 }
 0x339   :  { %v1538_v4 = vsub.f32 1.0, %v1537_v15  ;;  %v1565_v15 = vand.u32 2147483647, %v1555_v2 }
 0x33a   :  { %2788 = vtanh.f32 %v1525_v41  ;;  %v4655_v41 = vld [vmem:[%s5250_s8] ss:$0 sm:$0xff]  ;;  %v1568_v8 = vor.u32 1.1754944e-38, %v1567_v36 }
 0x33b   :  { %v1539_v60 = vmul.f32 %v2785_v1, %v1538_v4  ;;  %v1571_v4 = vadd.f32 %v4655_v41, %v1468_v43  ;;  %vm1566_vm0 = vcmp.eq.f32.partialorder %v1565_v15, 8.507059e+37  ;;  %v4817_v36 = vld [vmem:[#allocation12 + $0x78] sm:$0xff]  ;;  %v4823_v15 = vld [vmem:[#allocation12 + $0x60] sm:$0xff] }
 0x33c   :  { %v2787_v37 = vpop.eup %2786 }
 0x33d   :  { %v1557_v32 = vmul.f32 %v2787_v37, %v1555_v2  ;;  %v1540_v28 = vadd.f32 %v2785_v1, %v1539_v60  ;;  %vm1562_vm13 = vweird.f32 %v2787_v37 }
 0x33e   :  { %vm1563_vm15 = vmor %vm1561_vm14, %vm1562_vm13 }
 0x33f   :  { %v1558_v30 = vsub.f32 1.0, %v1557_v32  ;;  %v1544_v55 = vsel %vm1543_vm11, %v2785_v1, %v1540_v28  ;;  %v4672_v32 = vld [vmem:[#allocation13 + $0x158] sm:$0xff]  ;;  %v4783_v28 = vld [vmem:[#allocation12 + $0x110] sm:$0xff] }
 0x340   :  { %v2789_v34 = vpop.eup %2788  ;;  %v1549_v53 = vsel %vm1546_vm12, %v1548_v23, %v1544_v55  ;;  %v4787_v23 = vld [vmem:[#allocation12 + $0xf0] sm:$0xff]  ;;  %v4796_v55 = vld [vmem:[#allocation12 + $0xe0] sm:$0xff] }
 0x341   :  { %v1559_v42 = vmul.f32 %v2787_v37, %v1558_v30  ;;  %v1528_v56 = vmul.f32 %v2789_v34, %v1527_v29  ;;  %v1572_v13 = vmul.f32 %v1571_v4, %v1549_v53  ;;  %v5772_v30 = vld [vmem:[#allocation120_spill] sm:$0xff]  ;;  %v4790_v29 = vld [vmem:[#allocation12 + $0xf8] sm:$0xff]  ;;  %v4799_v4 = vld [vmem:[#allocation12 + $0xc0] sm:$0xff] }
 0x342   :  { %v4793_v34 = vld [vmem:[#allocation12 + $0xd8] sm:$0xff]  ;;  %v4808_v53 = vld [vmem:[#allocation12 + $0xb0] sm:$0xff] }
 0x343   :  { %v4659_v20 = vadd.f32 %v1529_v12, %v1528_v56  ;;  %v1560_v1 = vadd.f32 %v2787_v37, %v1559_v42  ;;  %v1573_v60 = vadd.f32 %v1572_v13, %v5755_v58  ;;  %v4802_v12 = vld [vmem:[#allocation12 + $0xc8] sm:$0xff]  ;;  %v4811_v56 = vld [vmem:[#allocation12 + $0x90] sm:$0xff]  ;;  %v4814_v13 = vld [vmem:[#allocation12 + $0x98] sm:$0xff] }
 0x344   :  { %v4805_v42 = vld [vmem:[#allocation12 + $0xa8] sm:$0xff] }
 0x345   :  { %1595 = vmatmul.f32.vlgmr.msrb.gmra.mxu0 %v4659_v20  ;;  %1615 = vmatmul.f32.vlgmr.msrb.gmra.mxu1 %v4659_v20  ;;  %v1564_v52 = vsel %vm1563_vm15, %v2787_v37, %v1560_v1  ;;  %2790 = vtanh.f32 %v1573_v60  ;;  %v4820_v1 = vld [vmem:[#allocation12 + $0x80] sm:$0xff]  ;;  %v4826_v58 = vld [vmem:[#allocation12 + $0x68] sm:$0xff] }
 0x346   :  { %1635 = vmatmul.f32.vlgmr.msrb.gmra.mxu2 %v4659_v20  ;;  %1845 = vmatpush.msrb.mxu0 %v4310_v40  ;;  %v1569_v2 = vsel %vm1566_vm0, %v1568_v8, %v1564_v52  ;;  %v4677_v40 = vld [vmem:[#allocation13 + $0x140] sm:$0xff]  ;;  %v4829_v60 = vld [vmem:[#allocation12 + $0x48] sm:$0xff]  ;;  %v4832_v52 = vld [vmem:[#allocation12 + $0x50] sm:$0xff] }
 0x347   :  { %1865 = vmatpush.msrb.mxu1 %v4313_v63  ;;  %1885 = vmatpush.msrb.mxu2 %v4667_v49  ;;  %v1575_v37 = vsub.f32 1.0, %v1569_v2  ;;  %v4835_v8 = vld [vmem:[#allocation12 + $0x30] sm:$0xff] }
 0x348   :  { %1846 = vmatpush.msrb.mxu0 %v4317_v35  ;;  %v1577_v35 = vmul.f32 %v1569_v2, %v4561_v25  ;;  %v4749_v25 = vld [vmem:[#allocation12 + $0x168] sm:$0xff]  ;;  %v4838_v2 = vld [vmem:[#allocation12 + $0x38] sm:$0xff] }
 0x349   :  { %1866 = vmatpush.msrb.mxu1 %v4320_v22  ;;  %1886 = vmatpush.msrb.mxu2 %v4672_v32  ;;  %v4683_v22 = vld [vmem:[#allocation13 + $0x128] sm:$0xff]  ;;  %5773 = vst [vmem:[#allocation25_spill] sm:$0xff] %v4838_v2 }
 0x34a   :  { %1847 = vmatpush.msrb.mxu0 %v4324_v18 }
 0x34b   :  { %1867 = vmatpush.msrb.mxu1 %v4327_v21  ;;  %1887 = vmatpush.msrb.mxu2 %v4677_v40  ;;  %v2791_v63 = vpop.eup %2790  ;;  %v4690_v21 = vld [vmem:[#allocation13 + $0x110] sm:$0xff] }
 0x34c   :  { %1848 = vmatpush.msrb.mxu0 %v4332_v45  ;;  %v1576_v43 = vmul.f32 %v2791_v63, %v1575_v37  ;;  %v4698_v45 = vld [vmem:[#allocation13 + $0x178] sm:$0xff]  ;;  %v4844_v63 = vld [vmem:[#allocation12 + $0x20] sm:$0xff] }
 0x34d   :  { %1868 = vmatpush.msrb.mxu1 %v4335_v44  ;;  %1888 = vmatpush.msrb.mxu2 %v4683_v22  ;;  %v4703_v44 = vld [vmem:[#allocation13 + $0xf8] sm:$0xff]  ;;  %5775 = vst [vmem:[#allocation71_spill] sm:$0xff] %v4844_v63 }
 0x34e   :  { %1849 = vmatpush.msrb.mxu0 %v4341_v11  ;;  %v4687_v18 = vadd.f32 %v1577_v35, %v1576_v43  ;;  %v4706_v11 = vld [vmem:[#allocation13 + $0x160] sm:$0xff]  ;;  %v4841_v37 = vld [vmem:[#allocation12 + $0x18] sm:$0xff]  ;;  %v4850_v35 = vld [vmem:[#allocation12 + $0x8] sm:$0xff] }
 0x34f   :  { %1869 = vmatpush.msrb.mxu1 %v4344_v24  ;;  %1889 = vmatpush.msrb.mxu2 %v4690_v21  ;;  %v4711_v24 = vld [vmem:[#allocation13 + $0xe0] sm:$0xff]  ;;  %5774 = vst [vmem:[#allocation80_spill] sm:$0xff] %v4841_v37 }
 0x350   :  { %1850 = vmatpush.msrb.mxu0 %v4351_v39  ;;  %1655 = vmatmul.f32.vlgmr.msrb.gmra.mxu3 %v4687_v18  ;;  %v4714_v39 = vld [vmem:[#allocation13 + $0x148] sm:$0xff]  ;;  %v4847_v43 = vld [vmem:[#allocation12] sm:$0xff]  ;;  %5777 = vst [vmem:[#allocation81_spill] sm:$0xff] %v4850_v35 }
 0x351   :  { %1675 = vmatmul.f32.vlgmr.msra.gmra.mxu0 %v4687_v18  ;;  %1695 = vmatmul.f32.vlgmr.msra.gmra.mxu1 %v4687_v18  ;;  %5776 = vst [vmem:[#allocation33_spill] sm:$0xff] %v4847_v43 }
 0x352   :  { %1851 = vmatpush.msrb.mxu0 %v4358_v50  ;;  %1905 = vmatpush.msrb.mxu3 %v4698_v45  ;;  %v5756_v50 = vld [vmem:[#allocation107_spill] sm:$0xff] }
 0x353   :  { %1870 = vmatpush.msrb.mxu1 %v4355_v47  ;;  %1890 = vmatpush.msrb.mxu2 %v4703_v44  ;;  %v4720_v47 = vld [vmem:[#allocation13 + $0x130] sm:$0xff] }
 0x354   :  { %1852 = vmatpush.msrb.mxu0 %v4366_v17  ;;  %1906 = vmatpush.msrb.mxu3 %v4706_v11  ;;  %v5758_v17 = vld [vmem:[#allocation105_spill] sm:$0xff] }
 0x355   :  { %1871 = vmatpush.msrb.mxu1 %v4363_v9  ;;  %1891 = vmatpush.msrb.mxu2 %v4711_v24  ;;  %v5757_v9 = vld [vmem:[#allocation104_spill] sm:$0xff] }
 0x356   :  { %1853 = vmatpush.msrb.mxu0 %v4374_v5  ;;  %1907 = vmatpush.msrb.mxu3 %v4714_v39  ;;  %v5760_v5 = vld [vmem:[#allocation111_spill] sm:$0xff] }
 0x357   :  { %1872 = vmatpush.msrb.mxu1 %v4371_v62  ;;  %1892 = vmatpush.msrb.mxu2 %v4377_v6  ;;  %v5759_v62 = vld [vmem:[#allocation106_spill] sm:$0xff]  ;;  %v5761_v6 = vld [vmem:[#allocation108_spill] sm:$0xff] }
 0x358   :  { %1854 = vmatpush.msrb.mxu0 %v4384_v31  ;;  %1908 = vmatpush.msrb.mxu3 %v4720_v47  ;;  %v5763_v31 = vld [vmem:[#allocation110_spill] sm:$0xff] }
 0x359   :  { %1873 = vmatpush.msrb.mxu1 %v4381_v61  ;;  %1893 = vmatpush.msrb.mxu2 %v4387_v26  ;;  %v5762_v61 = vld [vmem:[#allocation109_spill] sm:$0xff]  ;;  %v5764_v26 = vld [vmem:[#allocation112_spill] sm:$0xff] }
 0x35a   :  { %1855 = vmatpush.msrb.mxu0 %v5693_v16  ;;  %1909 = vmatpush.msrb.mxu3 %v5699_v14  ;;  %v5767_v16 = vld [vmem:[#allocation115_spill] sm:$0xff]  ;;  %v5769_v14 = vld [vmem:[#allocation117_spill] sm:$0xff] }
 0x35b   :  { %1874 = vmatpush.msrb.mxu1 %v5690_v0  ;;  %1894 = vmatpush.msrb.mxu2 %v5692_v46  ;;  %v5765_v0 = vld [vmem:[#allocation113_spill] sm:$0xff]  ;;  %v5766_v46 = vld [vmem:[#allocation114_spill] sm:$0xff] }
 0x35c   :  { %1856 = vmatpush.msrb.mxu0 %v5697_v48  ;;  %1910 = vmatpush.msrb.mxu3 %v5703_v54  ;;  %v4759_v48 = vld [vmem:[#allocation12 + $0x150] sm:$0xff]  ;;  %v4773_v54 = vld [vmem:[#allocation12 + $0x120] sm:$0xff] }
 0x35d   :  { %1875 = vmatpush.msrb.mxu1 %v5694_v27  ;;  %1895 = vmatpush.msrb.mxu2 %v5696_v59  ;;  %v4755_v27 = vld [vmem:[#allocation12 + $0x170] sm:$0xff]  ;;  %v5768_v59 = vld [vmem:[#allocation116_spill] sm:$0xff] }
 0x35e   :  { %1857 = vmatpush.msrb.mxu0 %v5701_v3  ;;  %1911 = vmatpush.msrb.mxu3 %v5707_v19  ;;  %v4769_v3 = vld [vmem:[#allocation12 + $0x140] sm:$0xff] }
 0x35f   :  { %1876 = vmatpush.msrb.mxu1 %v5698_v7  ;;  %1896 = vmatpush.msrb.mxu2 %v5700_v33  ;;  %v4762_v7 = vld [vmem:[#allocation12 + $0x158] sm:$0xff]  ;;  %v5771_v19 = vld [vmem:[#allocation119_spill] sm:$0xff] }
 0x360   :  { %1858 = vmatpush.msrb.mxu0 %v5705_v38  ;;  %1912 = vmatpush.msrb.mxu3 %v5711_v57  ;;  %v4766_v33 = vld [vmem:[#allocation12 + $0x138] sm:$0xff]  ;;  %v4776_v38 = vld [vmem:[#allocation12 + $0x128] sm:$0xff] }
 0x361   :  { %1877 = vmatpush.msrb.mxu1 %v5702_v10  ;;  %1897 = vmatpush.msrb.mxu2 %v5757_v9  ;;  %v5770_v10 = vld [vmem:[#allocation118_spill] sm:$0xff]  ;;  %v4780_v57 = vld [vmem:[#allocation12 + $0x108] sm:$0xff] }
 0x362   :  { %1859 = vmatpush.msrb.mxu0 %v5756_v50  ;;  %1913 = vmatpush.msrb.mxu3 %v5758_v17  ;;  %v5778_v17 = vld [vmem:[#allocation29_spill] sm:$0xff] }
 0x363   :  { %1878 = vmatpush.msrb.mxu1 %v5759_v62  ;;  %1898 = vmatpush.msrb.mxu2 %v5761_v6 }
 0x364   :  { %1860 = vmatpush.msrb.mxu0 %v5760_v5  ;;  %1914 = vmatpush.msrb.mxu3 %v5762_v61  ;;  %v5779_v5 = vld [vmem:[#allocation31_spill] sm:$0xff] }
 0x365   :  { %1879 = vmatpush.msrb.mxu1 %v5763_v31  ;;  %1899 = vmatpush.msrb.mxu2 %v5764_v26 }
 0x366   :  { %2031 = vmatpush.msra.mxu0 %v4749_v25  ;;  %1915 = vmatpush.msrb.mxu3 %v5765_v0 }
 0x367   :  { %1880 = vmatpush.msrb.mxu1 %v5766_v46  ;;  %1900 = vmatpush.msrb.mxu2 %v5767_v16 }
 0x368   :  { %1916 = vmatpush.msrb.mxu3 %v5768_v59  ;;  %2032 = vmatpush.msra.mxu0 %v4759_v48 }
 0x369   :  { %2051 = vmatpush.msra.mxu1 %v4755_v27 }
 0x36a   :  { %1917 = vmatpush.msrb.mxu3 %v5769_v14  ;;  %2033 = vmatpush.msra.mxu0 %v4766_v33  ;;  %v5780_v14 = vld [vmem:[#allocation75_spill] sm:$0xff] }
 0x36b   :  { %2052 = vmatpush.msra.mxu1 %v4762_v7 }
 0x36c   :  { %1918 = vmatpush.msrb.mxu3 %v5770_v10  ;;  %2034 = vmatpush.msra.mxu0 %v4773_v54 }
 0x36d   :  { %2053 = vmatpush.msra.mxu1 %v4769_v3 }
 0x36e   :  { %1919 = vmatpush.msrb.mxu3 %v5771_v19  ;;  %2035 = vmatpush.msra.mxu0 %v4780_v57 }
 0x36f   :  { %2054 = vmatpush.msra.mxu1 %v4776_v38 }
 0x370   :  { %1920 = vmatpush.msrb.mxu3 %v5772_v30  ;;  %2036 = vmatpush.msra.mxu0 %v4787_v23 }
 0x371   :  { %2055 = vmatpush.msra.mxu1 %v4783_v28 }
 0x372   :  { %2037 = vmatpush.msra.mxu0 %v4793_v34 }
 0x373   :  { %2056 = vmatpush.msra.mxu1 %v4790_v29 }
 0x374   :  { %2038 = vmatpush.msra.mxu0 %v4799_v4 }
 0x375   :  { %2057 = vmatpush.msra.mxu1 %v4796_v55 }
 0x376   :  { %2039 = vmatpush.msra.mxu0 %v4805_v42 }
 0x377   :  { %2058 = vmatpush.msra.mxu1 %v4802_v12 }
 0x378   :  { %2040 = vmatpush.msra.mxu0 %v4811_v56 }
 0x379   :  { %2059 = vmatpush.msra.mxu1 %v4808_v53 }
 0x37a   :  { %2041 = vmatpush.msra.mxu0 %v4817_v36 }
 0x37b   :  { %2060 = vmatpush.msra.mxu1 %v4814_v13 }
 0x37c   :  { %2042 = vmatpush.msra.mxu0 %v4823_v15 }
 0x37d   :  { %2061 = vmatpush.msra.mxu1 %v4820_v1 }
 0x37e   :  { %2043 = vmatpush.msra.mxu0 %v4829_v60 }
 0x37f   :  { %2062 = vmatpush.msra.mxu1 %v4826_v58 }
 0x380   :  { %2044 = vmatpush.msra.mxu0 %v4835_v8 }
 0x381   :  { %2063 = vmatpush.msra.mxu1 %v4832_v52 }
 0x382   :  { %2045 = vmatpush.msra.mxu0 %v4841_v37 }
 0x383   :  { %2064 = vmatpush.msra.mxu1 %v4838_v2 }
 0x384   :  { %2046 = vmatpush.msra.mxu0 %v4847_v43 }
 0x385   :  { %2065 = vmatpush.msra.mxu1 %v4844_v63 }
 0x387   :  { %2066 = vmatpush.msra.mxu1 %v4850_v35  ;;  %v5781_v35 = vld [vmem:[#allocation40_spill] sm:$0xff] }
 0x3c2   :  { %v1596_v50 = vpop.f32.mrf.mxu0  ;;  %v1616_v9 = vpop.f32.mrf.mxu1 }
 0x3c3   :  { %v1709_v62 = vadd.f32 %v1596_v50, %v5778_v17  ;;  %v1729_v6 = vadd.f32 %v1616_v9, %v5779_v5 }
 0x3c5   :  { %v2662_v61 = vmul.f32 -1.442695, %v1709_v62  ;;  %v2663_v31 = vmul.f32 -1.442695, %v1729_v6 }
 0x3c7   :  { %2792 = vpow2.f32 %v2662_v61 }
 0x3c8   :  { %2794 = vpow2.f32 %v2663_v31 }
 0x3cd   :  { %v2793_v26 = vpop.eup %2792 }
 0x3ce   :  { %v2795_v0 = vpop.eup %2794  ;;  %v1713_v46 = vadd.f32 1.0, %v2793_v26  ;;  %v1676_v16 = vpop.f32.mrf.mxu0 }
 0x3cf   :  { %v1733_v59 = vadd.f32 1.0, %v2795_v0  ;;  %v1777_v10 = vadd.f32 %v1676_v16, %v5780_v14 }
 0x3d0   :  { %2796 = vrcp.f32 %v1713_v46  ;;  %v1725_v43 = vand.u32 2147483648, %v1713_v46  ;;  %v1723_v14 = vand.u32 2147483647, %v1713_v46  ;;  %vm1719_vm2 = vweird.f32 %v1713_v46 }
 0x3d1   :  { %2798 = vrcp.f32 %v1733_v59  ;;  %v2665_v19 = vmul.f32 -1.442695, %v1777_v10  ;;  %v1745_v37 = vand.u32 2147483648, %v1733_v59  ;;  %vm1739_vm6 = vweird.f32 %v1733_v59 }
 0x3d2   :  { %vm1724_vm4 = vcmp.eq.f32.partialorder %v1723_v14, 8.507059e+37 }
 0x3d3   :  { %2800 = vpow2.f32 %v2665_v19  ;;  %v1656_v30 = vpop.f32.mrf.mxu3  ;;  %v1636_v19 = vpop.f32.mrf.mxu2 }
 0x3d4   :  { %v1757_v50 = vadd.f32 %v1656_v30, %v5781_v35  ;;  %v1726_v35 = vor.u32 1.1754944e-38, %v1725_v43 }
 0x3d6   :  { %v2797_v17 = vpop.eup %2796  ;;  %v2664_v5 = vmul.f32 -1.442695, %v1757_v50 }
 0x3d7   :  { %v2799_v9 = vpop.eup %2798  ;;  %v1715_v62 = vmul.f32 %v2797_v17, %v1713_v46  ;;  %vm1720_vm1 = vweird.f32 %v2797_v17  ;;  %v5782_v46 = vld [vmem:[#allocation50_spill] sm:$0xff] }
 0x3d8   :  { %v1735_v6 = vmul.f32 %v2799_v9, %v1733_v59  ;;  %2802 = vpow2.f32 %v2664_v5  ;;  %vm1721_vm3 = vmor %vm1719_vm2, %vm1720_vm1  ;;  %vm1740_vm5 = vweird.f32 %v2799_v9 }
 0x3d9   :  { %v2801_v61 = vpop.eup %2800  ;;  %v1716_v31 = vsub.f32 1.0, %v1715_v62  ;;  %v1749_v62 = vadd.f32 %v4648_v51, %v1636_v19  ;;  %vm1741_vm7 = vmor %vm1739_vm6, %vm1740_vm5 }
 0x3da   :  { %v1736_v26 = vsub.f32 1.0, %v1735_v6  ;;  %v4857_v0 = vadd.f32 1.0, %v2801_v61 }
 0x3db   :  { %v1717_v16 = vmul.f32 %v2797_v17, %v1716_v31 }
 0x3dc   :  { %v1737_v10 = vmul.f32 %v2799_v9, %v1736_v26  ;;  %2804 = vrcp.f32 %v4857_v0  ;;  %v1743_v26 = vand.u32 2147483647, %v1733_v59  ;;  %vm1787_vm14 = vweird.f32 %v4857_v0 }
 0x3dd   :  { %v1718_v63 = vadd.f32 %v2797_v17, %v1717_v16 }
 0x3de   :  { %v2803_v30 = vpop.eup %2802  ;;  %v1738_v61 = vadd.f32 %v2799_v9, %v1737_v10  ;;  %vm1744_vm8 = vcmp.eq.f32.partialorder %v1743_v26, 8.507059e+37 }
 0x3df   :  { %v1722_v50 = vsel %vm1721_vm3, %v2797_v17, %v1718_v63  ;;  %v1761_v6 = vadd.f32 1.0, %v2803_v30  ;;  %v1746_v63 = vor.u32 1.1754944e-38, %v1745_v37  ;;  %v1696_v37 = vpop.f32.mrf.mxu1 }
 0x3e0   :  { %v1727_v5 = vsel %vm1724_vm4, %v1726_v35, %v1722_v50  ;;  %v1742_v43 = vsel %vm1741_vm7, %v2799_v9, %v1738_v61 }
 0x3e1   :  { %v1750_v31 = vmul.f32 %v1749_v62, %v1727_v5  ;;  %2806 = vrcp.f32 %v1761_v6  ;;  %v1747_v14 = vsel %vm1744_vm8, %v1746_v63, %v1742_v43  ;;  %v1773_v59 = vand.u32 2147483648, %v1761_v6 }
 0x3e2   :  { %v4861_v16 = vpop.eup %2804  ;;  %v1753_v30 = vsub.f32 1.0, %v1747_v14  ;;  %v1755_v51 = vmul.f32 %v1747_v14, %v4659_v20  ;;  %v1771_v9 = vand.u32 2147483647, %v1761_v6  ;;  %vm1767_vm10 = vweird.f32 %v1761_v6  ;;  %v4874_v20 = vld [vmem:[#allocation12 + $0x178] sm:$0xff] }
 0x3e3   :  { %v1751_v2 = vadd.f32 %v1750_v31, %v5782_v46  ;;  %v1783_v17 = vmul.f32 %v4861_v16, %v4857_v0  ;;  %v1774_v46 = vor.u32 1.1754944e-38, %v1773_v59  ;;  %v1797_v43 = vadd.f32 %v4655_v41, %v1696_v37  ;;  %v4911_v37 = vld [vmem:[#allocation13 + $0x120] sm:$0xff] }
 0x3e4   :  { %vm1772_vm12 = vcmp.eq.f32.partialorder %v1771_v9, 8.507059e+37  ;;  %vm1788_vm13 = vweird.f32 %v4861_v16  ;;  %v1793_v14 = vand.u32 2147483648, %v4857_v0 }
 0x3e5   :  { %2808 = vtanh.f32 %v1751_v2  ;;  %v1784_v35 = vsub.f32 1.0, %v1783_v17  ;;  %vm4893_vm15 = vmor %vm1787_vm14, %vm1788_vm13 }
 0x3e6   :  { %v1794_v9 = vor.u32 1.1754944e-38, %v1793_v14  ;;  %v4929_v14 = vld [vmem:[#allocation12 + $0xe8] sm:$0xff] }
 0x3e7   :  { %v2807_v10 = vpop.eup %2806  ;;  %v1785_v2 = vmul.f32 %v4861_v16, %v1784_v35  ;;  %v1791_v35 = vand.u32 2147483647, %v4857_v0 }
 0x3e8   :  { %v1763_v19 = vmul.f32 %v2807_v10, %v1761_v6  ;;  %vm1768_vm9 = vweird.f32 %v2807_v10  ;;  %v4879_v6 = vld [vmem:[#allocation13 + $0x168] sm:$0xff] }
 0x3e9   :  { %vm1769_vm11 = vmor %vm1767_vm10, %vm1768_vm9  ;;  %v1786_v17 = vadd.f32 %v4861_v16, %v1785_v2  ;;  %v4908_v2 = vld [vmem:[#allocation12 + $0x130] sm:$0xff]  ;;  %vm1792_vm0 = vcmp.eq.f32.partialorder %v1791_v35, 8.507059e+37 }
 0x3ea   :  { %v1764_v62 = vsub.f32 1.0, %v1763_v19  ;;  %v4884_v19 = vld [vmem:[#allocation12 + $0x160] sm:$0xff] }
 0x3eb   :  { %v2809_v50 = vpop.eup %2808  ;;  %v1790_v0 = vsel %vm4893_vm15, %v4861_v16, %v1786_v17 }
 0x3ec   :  { %v1754_v5 = vmul.f32 %v2809_v50, %v1753_v30  ;;  %v1765_v31 = vmul.f32 %v2807_v10, %v1764_v62  ;;  %v4889_v30 = vld [vmem:[#allocation13 + $0x150] sm:$0xff]  ;;  %v5785_v62 = vld [vmem:[#allocation76_spill] sm:$0xff]  ;;  %v1795_v16 = vsel %vm1792_vm0, %v1794_v9, %v1790_v0  ;;  %v4933_v50 = vld [vmem:[#allocation13 + $0xd8] sm:$0xff] }
 0x3ed   :  { %v1803_v35 = vmul.f32 %v1795_v16, %v4687_v18  ;;  %v4942_v0 = vld [vmem:[#allocation13 + $0xc0] sm:$0xff]  ;;  %v4945_v9 = vld [vmem:[#allocation13 + $0xc8] sm:$0xff]  ;;  %v4948_v18 = vld [vmem:[#allocation12 + $0xb8] sm:$0xff] }
 0x3ee   :  { %v4868_v61 = vadd.f32 %v1755_v51, %v1754_v5  ;;  %v1766_v26 = vadd.f32 %v2807_v10, %v1765_v31  ;;  %v4898_v5 = vld [vmem:[#allocation12 + $0x148] sm:$0xff]  ;;  %v4904_v31 = vld [vmem:[#allocation13 + $0x138] sm:$0xff]  ;;  %5786 = vst [vmem:[#allocation82_spill] sm:$0xff] %v4945_v9 }
 0x3f0   :  { %1821 = vmatmul.f32.vlgmr.msra.gmra.mxu2 %v4868_v61  ;;  %1841 = vmatmul.f32.vlgmr.msra.gmra.mxu3 %v4868_v61  ;;  %v1770_v63 = vsel %vm1769_vm11, %v2807_v10, %v1766_v26  ;;  %v4915_v26 = vld [vmem:[#allocation12 + $0x118] sm:$0xff] }
 0x3f1   :  { %1861 = vmatmul.f32.vlgmr.msrb.gmra.mxu0 %v4868_v61  ;;  %2071 = vmatpush.msra.mxu2 %v4874_v20  ;;  %v1775_v51 = vsel %vm1772_vm12, %v1774_v46, %v1770_v63  ;;  %v4918_v46 = vld [vmem:[#allocation13 + $0x108] sm:$0xff]  ;;  %v1801_v63 = vsub.f32 1.0, %v1795_v16  ;;  %v4955_v16 = vld [vmem:[#allocation12 + $0xa0] sm:$0xff] }
 0x3f2   :  { %2091 = vmatpush.msra.mxu3 %v4879_v6  ;;  %2111 = vmatpush.msrb.mxu0 %v4667_v49  ;;  %v1798_v10 = vmul.f32 %v1797_v43, %v1775_v51  ;;  %v4922_v43 = vld [vmem:[#allocation12 + $0x100] sm:$0xff]  ;;  %v4925_v51 = vld [vmem:[#allocation13 + $0xf0] sm:$0xff]  ;;  %5787 = vst [vmem:[#allocation41_spill] sm:$0xff] %v4955_v16 }
 0x3f3   :  { %2072 = vmatpush.msra.mxu2 %v4884_v19 }
 0x3f4   :  { %2092 = vmatpush.msra.mxu3 %v4889_v30  ;;  %2112 = vmatpush.msrb.mxu0 %v4672_v32  ;;  %v1799_v59 = vadd.f32 %v1798_v10, %v5785_v62  ;;  %v4937_v62 = vld [vmem:[#allocation12 + $0xd0] sm:$0xff] }
 0x3f5   :  { %2073 = vmatpush.msra.mxu2 %v4898_v5 }
 0x3f6   :  { %2093 = vmatpush.msra.mxu3 %v4904_v31  ;;  %2113 = vmatpush.msrb.mxu0 %v4677_v40  ;;  %2810 = vtanh.f32 %v1799_v59 }
 0x3f7   :  { %2074 = vmatpush.msra.mxu2 %v4908_v2 }
 0x3f8   :  { %2094 = vmatpush.msra.mxu3 %v4911_v37  ;;  %2114 = vmatpush.msrb.mxu0 %v4683_v22 }
 0x3f9   :  { %2075 = vmatpush.msra.mxu2 %v4915_v26 }
 0x3fa   :  { %2095 = vmatpush.msra.mxu3 %v4918_v46  ;;  %2115 = vmatpush.msrb.mxu0 %v4690_v21 }
 0x3fb   :  { %2076 = vmatpush.msra.mxu2 %v4922_v43 }
 0x3fc   :  { %2096 = vmatpush.msra.mxu3 %v4925_v51  ;;  %2116 = vmatpush.msrb.mxu0 %v4703_v44  ;;  %v2811_v17 = vpop.eup %2810 }
 0x3fd   :  { %2077 = vmatpush.msra.mxu2 %v4929_v14  ;;  %v1802_v10 = vmul.f32 %v2811_v17, %v1801_v63  ;;  %v4958_v63 = vld [vmem:[#allocation13 + $0xa8] sm:$0xff]  ;;  %v4962_v17 = vld [vmem:[#allocation13 + $0xb0] sm:$0xff] }
 0x3fe   :  { %2097 = vmatpush.msra.mxu3 %v4933_v50  ;;  %2117 = vmatpush.msrb.mxu0 %v4711_v24  ;;  %5788 = vst [vmem:[#allocation83_spill] sm:$0xff] %v4958_v63 }
 0x3ff   :  { %2078 = vmatpush.msra.mxu2 %v4937_v62  ;;  %v4940_v59 = vadd.f32 %v1803_v35, %v1802_v10  ;;  %5789 = vst [vmem:[#allocation28_spill] sm:$0xff] %v4962_v17  ;;  %v4965_v10 = vld [vmem:[#allocation12 + $0x88] sm:$0xff]  ;;  %v4968_v35 = vld [vmem:[#allocation13 + $0x90] sm:$0xff] }
 0x400   :  { %2098 = vmatpush.msra.mxu3 %v4942_v0  ;;  %2118 = vmatpush.msrb.mxu0 %v4945_v9  ;;  %5790 = vst [vmem:[#allocation94_spill] sm:$0xff] %v4965_v10  ;;  %v4972_v9 = vld [vmem:[#allocation13 + $0x98] sm:$0xff] }
 0x401   :  { %2079 = vmatpush.msra.mxu2 %v4948_v18  ;;  %1881 = vmatmul.f32.vlgmr.msrb.gmra.mxu1 %v4940_v59  ;;  %5791 = vst [vmem:[#allocation46_spill] sm:$0xff] %v4968_v35 }
 0x402   :  { %1901 = vmatmul.f32.vlgmr.msrb.gmra.mxu2 %v4940_v59  ;;  %1921 = vmatmul.f32.vlgmr.msrb.gmra.mxu3 %v4940_v59  ;;  %5792 = vst [vmem:[#allocation96_spill] sm:$0xff] %v4972_v9 }
 0x403   :  { %2131 = vmatpush.msrb.mxu1 %v4698_v45  ;;  %2080 = vmatpush.msra.mxu2 %v4955_v16  ;;  %v4978_v16 = vld [vmem:[#allocation13 + $0x78] sm:$0xff] }
 0x404   :  { %2099 = vmatpush.msra.mxu3 %v4958_v63  ;;  %2119 = vmatpush.msrb.mxu0 %v4962_v17  ;;  %v4975_v63 = vld [vmem:[#allocation12 + $0x70] sm:$0xff]  ;;  %5794 = vst [vmem:[#allocation98_spill] sm:$0xff] %v4978_v16  ;;  %v4982_v17 = vld [vmem:[#allocation13 + $0x80] sm:$0xff] }
 0x405   :  { %2132 = vmatpush.msrb.mxu1 %v4706_v11  ;;  %2081 = vmatpush.msra.mxu2 %v4965_v10  ;;  %5793 = vst [vmem:[#allocation95_spill] sm:$0xff] %v4975_v63  ;;  %v4988_v10 = vld [vmem:[#allocation13 + $0x60] sm:$0xff] }
 0x406   :  { %2100 = vmatpush.msra.mxu3 %v4968_v35  ;;  %2120 = vmatpush.msrb.mxu0 %v4972_v9  ;;  %5795 = vst [vmem:[#allocation27_spill] sm:$0xff] %v4982_v17  ;;  %v4985_v35 = vld [vmem:[#allocation12 + $0x58] sm:$0xff] }
 0x407   :  { %2133 = vmatpush.msrb.mxu1 %v4714_v39  ;;  %2082 = vmatpush.msra.mxu2 %v4975_v63  ;;  %5796 = vst [vmem:[#allocation100_spill] sm:$0xff] %v4985_v35  ;;  %v4991_v9 = vld [vmem:[#allocation13 + $0x118] sm:$0xff]  ;;  %v4994_v63 = vld [vmem:[#allocation13 + $0x68] sm:$0xff] }
 0x408   :  { %2101 = vmatpush.msra.mxu3 %v4978_v16  ;;  %2121 = vmatpush.msrb.mxu0 %v4982_v17  ;;  %5797 = vst [vmem:[#allocation99_spill] sm:$0xff] %v4988_v10  ;;  %v4997_v16 = vld [vmem:[#allocation12 + $0x40] sm:$0xff]  ;;  %v5000_v17 = vld [vmem:[#allocation13 + $0x48] sm:$0xff] }
 0x409   :  { %2134 = vmatpush.msrb.mxu1 %v4720_v47  ;;  %2083 = vmatpush.msra.mxu2 %v4985_v35  ;;  %5798 = vst [vmem:[#allocation102_spill] sm:$0xff] %v4991_v9  ;;  %v5003_v35 = vld [vmem:[#allocation13 + $0x100] sm:$0xff] }
 0x40a   :  { %2102 = vmatpush.msra.mxu3 %v4988_v10  ;;  %5799 = vst [vmem:[#allocation93_spill] sm:$0xff] %v4994_v63  ;;  %2122 = vmatpush.msrb.mxu0 %v4994_v63  ;;  %v5006_v10 = vld [vmem:[#allocation13 + $0x50] sm:$0xff] }
 0x40b   :  { %2135 = vmatpush.msrb.mxu1 %v4991_v9  ;;  %5800 = vst [vmem:[#allocation103_spill] sm:$0xff] %v4997_v16  ;;  %2084 = vmatpush.msra.mxu2 %v4997_v16  ;;  %v5009_v9 = vld [vmem:[#allocation12 + $0x28] sm:$0xff]  ;;  %v5012_v63 = vld [vmem:[#allocation13 + $0x30] sm:$0xff] }
 0x40c   :  { %5801 = vst [vmem:[#allocation97_spill] sm:$0xff] %v5000_v17  ;;  %2103 = vmatpush.msra.mxu3 %v5000_v17  ;;  %2123 = vmatpush.msrb.mxu0 %v5006_v10  ;;  %v5015_v16 = vld [vmem:[#allocation13 + $0xe8] sm:$0xff]  ;;  %v5018_v17 = vld [vmem:[#allocation13 + $0x38] sm:$0xff] }
 0x40d   :  { %5802 = vst [vmem:[#allocation101_spill] sm:$0xff] %v5003_v35  ;;  %2136 = vmatpush.msrb.mxu1 %v5003_v35  ;;  %2085 = vmatpush.msra.mxu2 %v5009_v9  ;;  %v5021_v35 = vld [vmem:[#allocation12 + $0x10] sm:$0xff] }
 0x40e   :  { %5803 = vst [vmem:[#allocation49_spill] sm:$0xff] %v5006_v10  ;;  %2104 = vmatpush.msra.mxu3 %v5012_v63  ;;  %2124 = vmatpush.msrb.mxu0 %v5018_v17  ;;  %v5024_v10 = vld [vmem:[#allocation13 + $0x18] sm:$0xff] }
 0x40f   :  { %5804 = vst [vmem:[#allocation43_spill] sm:$0xff] %v5009_v9  ;;  %2137 = vmatpush.msrb.mxu1 %v5015_v16  ;;  %2086 = vmatpush.msra.mxu2 %v5021_v35  ;;  %v5027_v9 = vld [vmem:[#allocation13 + $0xd0] sm:$0xff] }
 0x410   :  { %5805 = vst [vmem:[#allocation53_spill] sm:$0xff] %v5012_v63  ;;  %2105 = vmatpush.msra.mxu3 %v5024_v10  ;;  %v5030_v63 = vld [vmem:[#allocation13 + $0x20] sm:$0xff] }
 0x411   :  { %5806 = vst [vmem:[#allocation44_spill] sm:$0xff] %v5015_v16  ;;  %2138 = vmatpush.msrb.mxu1 %v5027_v9  ;;  %2125 = vmatpush.msrb.mxu0 %v5030_v63  ;;  %v5033_v16 = vld [vmem:[#allocation13] sm:$0xff] }
 0x412   :  { %5807 = vst [vmem:[#allocation55_spill] sm:$0xff] %v5018_v17  ;;  %2106 = vmatpush.msra.mxu3 %v5033_v16  ;;  %2257 = vmatpush.msrb.mxu2 %v4749_v25  ;;  %v5037_v17 = vld [vmem:[#allocation13 + $0xb8] sm:$0xff]  ;;  %v5050_v25 = vld [vmem:[#allocation13 + $0x88] sm:$0xff] }
 0x413   :  { %5808 = vst [vmem:[#allocation48_spill] sm:$0xff] %v5021_v35  ;;  %2139 = vmatpush.msrb.mxu1 %v5037_v17  ;;  %v5040_v35 = vld [vmem:[#allocation13 + $0x8] sm:$0xff] }
 0x414   :  { %5809 = vst [vmem:[#allocation58_spill] sm:$0xff] %v5024_v10  ;;  %2126 = vmatpush.msrb.mxu0 %v5040_v35  ;;  %2277 = vmatpush.msrb.mxu3 %v4755_v27  ;;  %v5045_v10 = vld [vmem:[#allocation13 + $0xa0] sm:$0xff]  ;;  %v5060_v27 = vld [vmem:[#allocation13 + $0x58] sm:$0xff] }
 0x415   :  { %5810 = vst [vmem:[#allocation61_spill] sm:$0xff] %v5040_v35  ;;  %2258 = vmatpush.msrb.mxu2 %v4759_v48  ;;  %2140 = vmatpush.msrb.mxu1 %v5045_v10  ;;  %v5055_v35 = vld [vmem:[#allocation13 + $0x70] sm:$0xff]  ;;  %v5065_v48 = vld [vmem:[#allocation13 + $0x40] sm:$0xff] }
 0x416   :  { %2278 = vmatpush.msrb.mxu3 %v4762_v7  ;;  %5811 = vst [vmem:[#allocation54_spill] sm:$0xff] %v5060_v27  ;;  %v5070_v7 = vld [vmem:[#allocation13 + $0x28] sm:$0xff] }
 0x417   :  { %2259 = vmatpush.msrb.mxu2 %v4766_v33  ;;  %2141 = vmatpush.msrb.mxu1 %v5050_v25  ;;  %5812 = vst [vmem:[#allocation39_spill] sm:$0xff] %v5065_v48  ;;  %v5075_v33 = vld [vmem:[#allocation13 + $0x10] sm:$0xff] }
 0x418   :  { %2279 = vmatpush.msrb.mxu3 %v4769_v3  ;;  %5813 = vst [vmem:[#allocation65_spill] sm:$0xff] %v5070_v7  ;;  %v5815_v3 = vld [vmem:[#allocation25_spill] sm:$0xff] }
 0x419   :  { %2260 = vmatpush.msrb.mxu2 %v4773_v54  ;;  %2142 = vmatpush.msrb.mxu1 %v5055_v35  ;;  %5814 = vst [vmem:[#allocation56_spill] sm:$0xff] %v5075_v33  ;;  %v5816_v54 = vld [vmem:[#allocation80_spill] sm:$0xff] }
 0x41a   :  { %2280 = vmatpush.msrb.mxu3 %v4776_v38  ;;  %v5817_v38 = vld [vmem:[#allocation71_spill] sm:$0xff] }
 0x41b   :  { %2261 = vmatpush.msrb.mxu2 %v4780_v57  ;;  %2143 = vmatpush.msrb.mxu1 %v5060_v27  ;;  %v5818_v57 = vld [vmem:[#allocation33_spill] sm:$0xff] }
 0x41c   :  { %2281 = vmatpush.msrb.mxu3 %v4783_v28  ;;  %v5819_v28 = vld [vmem:[#allocation81_spill] sm:$0xff] }
 0x41d   :  { %2262 = vmatpush.msrb.mxu2 %v4787_v23  ;;  %2144 = vmatpush.msrb.mxu1 %v5065_v48 }
 0x41e   :  { %2282 = vmatpush.msrb.mxu3 %v4790_v29 }
 0x41f   :  { %2263 = vmatpush.msrb.mxu2 %v4793_v34  ;;  %2145 = vmatpush.msrb.mxu1 %v5070_v7  ;;  %v5820_v34 = vld [vmem:[#allocation52_spill] sm:$0xff] }
 0x420   :  { %2283 = vmatpush.msrb.mxu3 %v4796_v55 }
 0x421   :  { %2264 = vmatpush.msrb.mxu2 %v4799_v4  ;;  %2146 = vmatpush.msrb.mxu1 %v5075_v33  ;;  %v5821_v4 = vld [vmem:[#allocation38_spill] sm:$0xff] }
 0x422   :  { %2284 = vmatpush.msrb.mxu3 %v4802_v12 }
 0x423   :  { %2265 = vmatpush.msrb.mxu2 %v4805_v42 }
 0x424   :  { %2285 = vmatpush.msrb.mxu3 %v4808_v53 }
 0x425   :  { %2266 = vmatpush.msrb.mxu2 %v4811_v56 }
 0x426   :  { %2286 = vmatpush.msrb.mxu3 %v4814_v13 }
 0x427   :  { %2267 = vmatpush.msrb.mxu2 %v4817_v36 }
 0x428   :  { %2287 = vmatpush.msrb.mxu3 %v4820_v1 }
 0x429   :  { %2268 = vmatpush.msrb.mxu2 %v4823_v15 }
 0x42a   :  { %2288 = vmatpush.msrb.mxu3 %v4826_v58  ;;  %v5822_v58 = vld [vmem:[#allocation36_spill] sm:$0xff] }
 0x42b   :  { %2269 = vmatpush.msrb.mxu2 %v4829_v60 }
 0x42c   :  { %2289 = vmatpush.msrb.mxu3 %v4832_v52 }
 0x42d   :  { %2270 = vmatpush.msrb.mxu2 %v4835_v8 }
 0x42e   :  { %2290 = vmatpush.msrb.mxu3 %v5815_v3  ;;  %v5823_v3 = vld [vmem:[#allocation72_spill] sm:$0xff] }
 0x42f   :  { %2271 = vmatpush.msrb.mxu2 %v5816_v54 }
 0x430   :  { %2291 = vmatpush.msrb.mxu3 %v5817_v38 }
 0x431   :  { %2272 = vmatpush.msrb.mxu2 %v5818_v57 }
 0x432   :  { %2292 = vmatpush.msrb.mxu3 %v5819_v28 }
 0x473   :  { %v1822_v23 = vpop.f32.mrf.mxu2  ;;  %v1842_v29 = vpop.f32.mrf.mxu3 }
 0x474   :  { %v1935_v55 = vadd.f32 %v1822_v23, %v5820_v34  ;;  %v1955_v12 = vadd.f32 %v1842_v29, %v5821_v4 }
 0x476   :  { %v2666_v42 = vmul.f32 -1.442695, %v1935_v55  ;;  %v2667_v53 = vmul.f32 -1.442695, %v1955_v12 }
 0x478   :  { %2812 = vpow2.f32 %v2666_v42 }
 0x479   :  { %2814 = vpow2.f32 %v2667_v53 }
 0x47e   :  { %v2813_v56 = vpop.eup %2812  ;;  %v1882_v1 = vpop.f32.mrf.mxu1 }
 0x47f   :  { %v2815_v13 = vpop.eup %2814  ;;  %v1939_v36 = vadd.f32 1.0, %v2813_v56  ;;  %v1983_v60 = vadd.f32 %v1882_v1, %v5822_v58 }
 0x480   :  { %v1959_v15 = vadd.f32 1.0, %v2815_v13  ;;  %v1862_v13 = vpop.f32.mrf.mxu0 }
 0x481   :  { %2816 = vrcp.f32 %v1939_v36  ;;  %v2668_v52 = vmul.f32 -1.442695, %v1983_v60  ;;  %v1951_v4 = vand.u32 2147483648, %v1939_v36  ;;  %v1949_v56 = vand.u32 2147483647, %v1939_v36 }
 0x482   :  { %2818 = vrcp.f32 %v1959_v15  ;;  %vm1945_vm2 = vweird.f32 %v1939_v36  ;;  %vm1965_vm6 = vweird.f32 %v1959_v15 }
 0x483   :  { %2820 = vpow2.f32 %v2668_v52  ;;  %v1952_v60 = vor.u32 1.1754944e-38, %v1951_v4  ;;  %vm1950_vm4 = vcmp.eq.f32.partialorder %v1949_v56, 8.507059e+37 }
 0x485   :  { %v1902_v8 = vpop.f32.mrf.mxu2 }
 0x486   :  { %v2003_v54 = vadd.f32 %v1902_v8, %v5823_v3  ;;  %v5824_v8 = vld [vmem:[#allocation51_spill] sm:$0xff] }
 0x487   :  { %v2817_v38 = vpop.eup %2816  ;;  %v1975_v3 = vadd.f32 %v5824_v8, %v1862_v13 }
 0x488   :  { %v2819_v57 = vpop.eup %2818  ;;  %v1941_v28 = vmul.f32 %v2817_v38, %v1939_v36  ;;  %v2669_v23 = vmul.f32 -1.442695, %v2003_v54  ;;  %vm1946_vm1 = vweird.f32 %v2817_v38  ;;  %v5825_v36 = vld [vmem:[#allocation70_spill] sm:$0xff] }
 0x489   :  { %v1961_v29 = vmul.f32 %v2819_v57, %v1959_v15  ;;  %v2821_v34 = vpop.eup %2820  ;;  %vm1947_vm3 = vmor %vm1945_vm2, %vm1946_vm1  ;;  %vm1966_vm5 = vweird.f32 %v2819_v57 }
 0x48a   :  { %v1942_v55 = vsub.f32 1.0, %v1941_v28  ;;  %2822 = vpow2.f32 %v2669_v23  ;;  %v1987_v42 = vadd.f32 1.0, %v2821_v34  ;;  %vm1967_vm7 = vmor %vm1965_vm6, %vm1966_vm5 }
 0x48b   :  { %v1962_v12 = vsub.f32 1.0, %v1961_v29  ;;  %v1971_v29 = vand.u32 2147483648, %v1959_v15 }
 0x48c   :  { %v1943_v53 = vmul.f32 %v2817_v38, %v1942_v55  ;;  %2824 = vrcp.f32 %v1987_v42  ;;  %v1997_v13 = vand.u32 2147483647, %v1987_v42  ;;  %vm1993_vm10 = vweird.f32 %v1987_v42 }
 0x48d   :  { %v1963_v1 = vmul.f32 %v2819_v57, %v1962_v12  ;;  %v1969_v12 = vand.u32 2147483647, %v1959_v15  ;;  %v1972_v27 = vor.u32 1.1754944e-38, %v1971_v29 }
 0x48e   :  { %v1944_v58 = vadd.f32 %v2817_v38, %v1943_v53  ;;  %vm1998_vm12 = vcmp.eq.f32.partialorder %v1997_v13, 8.507059e+37  ;;  %v5855_v13 = vld [vmem:[#allocation56_spill] sm:$0xff] }
 0x48f   :  { %v1964_v33 = vadd.f32 %v2819_v57, %v1963_v1  ;;  %vm1970_vm8 = vcmp.eq.f32.partialorder %v1969_v12, 8.507059e+37 }
 0x490   :  { %v2823_v52 = vpop.eup %2822  ;;  %v1948_v54 = vsel %vm1947_vm3, %v2817_v38, %v1944_v58  ;;  %v1999_v38 = vand.u32 2147483648, %v1987_v42 }
 0x491   :  { %v1953_v28 = vsel %vm1950_vm4, %v1952_v60, %v1948_v54  ;;  %v2007_v23 = vadd.f32 1.0, %v2823_v52  ;;  %v1968_v4 = vsel %vm1967_vm7, %v2819_v57, %v1964_v33  ;;  %v1922_v60 = vpop.f32.mrf.mxu3 }
 0x492   :  { %v1976_v34 = vmul.f32 %v1975_v3, %v1953_v28  ;;  %v2825_v55 = vpop.eup %2824  ;;  %v1973_v1 = vsel %vm1970_vm8, %v1972_v27, %v1968_v4  ;;  %v2000_v15 = vor.u32 1.1754944e-38, %v1999_v38 }
 0x493   :  { %2826 = vrcp.f32 %v2007_v23  ;;  %v1989_v7 = vmul.f32 %v2825_v55, %v1987_v42  ;;  %vm1994_vm9 = vweird.f32 %v2825_v55  ;;  %v1979_v3 = vsub.f32 1.0, %v1973_v1 }
 0x494   :  { %v1977_v53 = vadd.f32 %v1976_v34, %v5825_v36  ;;  %vm1995_vm11 = vmor %vm1993_vm10, %vm1994_vm9  ;;  %v2019_v12 = vand.u32 2147483648, %v2007_v23  ;;  %v2017_v42 = vand.u32 2147483647, %v2007_v23  ;;  %vm2013_vm14 = vweird.f32 %v2007_v23 }
 0x495   :  { %v1990_v48 = vsub.f32 1.0, %v1989_v7  ;;  %v2023_v7 = vadd.f32 %v4655_v41, %v1922_v60  ;;  %v5857_v60 = vld [vmem:[#allocation23_spill] sm:$0xff] }
 0x496   :  { %2828 = vtanh.f32 %v1977_v53  ;;  %v5826_v53 = vld [vmem:[#allocation73_spill] sm:$0xff]  ;;  %vm2018_vm0 = vcmp.eq.f32.partialorder %v2017_v42, 8.507059e+37 }
 0x497   :  { %v1991_v56 = vmul.f32 %v2825_v55, %v1990_v48  ;;  %v1981_v48 = vmul.f32 %v1973_v1, %v4868_v61  ;;  %v2020_v61 = vor.u32 1.1754944e-38, %v2019_v12 }
 0x499   :  { %v2827_v58 = vpop.eup %2826  ;;  %v1992_v8 = vadd.f32 %v2825_v55, %v1991_v56  ;;  %v5854_v56 = vld [vmem:[#allocation65_spill] sm:$0xff] }
 0x49a   :  { %v2009_v52 = vmul.f32 %v2827_v58, %v2007_v23  ;;  %vm2014_vm13 = vweird.f32 %v2827_v58 }
 0x49b   :  { %v1996_v33 = vsel %vm1995_vm11, %v2825_v55, %v1992_v8  ;;  %vm2015_vm15 = vmor %vm2013_vm14, %vm2014_vm13 }
 0x49c   :  { %v2829_v54 = vpop.eup %2828  ;;  %v2010_v28 = vsub.f32 1.0, %v2009_v52  ;;  %v2001_v57 = vsel %vm1998_vm12, %v2000_v15, %v1996_v33 }
 0x49d   :  { %v1980_v29 = vmul.f32 %v2829_v54, %v1979_v3  ;;  %v2024_v27 = vmul.f32 %v2023_v7, %v2001_v57 }
 0x49e   :  { %v2011_v34 = vmul.f32 %v2827_v58, %v2010_v28  ;;  %v5858_v28 = vld [vmem:[#allocation62_spill] sm:$0xff] }
 0x49f   :  { %v5103_v36 = vadd.f32 %v1981_v48, %v1980_v29  ;;  %v2025_v4 = vadd.f32 %v2024_v27, %v5826_v53  ;;  %v5859_v29 = vld [vmem:[#allocation37_spill] sm:$0xff] }
 0x4a0   :  { %v2012_v38 = vadd.f32 %v2827_v58, %v2011_v34 }
 0x4a1   :  { %2047 = vmatmul.f32.vlgmr.msra.gmra.mxu0 %v5103_v36  ;;  %2067 = vmatmul.f32.vlgmr.msra.gmra.mxu1 %v5103_v36  ;;  %2830 = vtanh.f32 %v2025_v4 }
 0x4a2   :  { %2087 = vmatmul.f32.vlgmr.msra.gmra.mxu2 %v5103_v36  ;;  %v2016_v41 = vsel %vm2015_vm15, %v2827_v58, %v2012_v38  ;;  %2297 = vmatpush.msra.mxu0 %v4874_v20  ;;  %v5856_v58 = vld [vmem:[#allocation34_spill] sm:$0xff] }
 0x4a3   :  { %2317 = vmatpush.msra.mxu1 %v4879_v6  ;;  %2337 = vmatpush.msra.mxu2 %v4667_v49  ;;  %v2021_v23 = vsel %vm2018_vm0, %v2020_v61, %v2016_v41 }
 0x4a4   :  { %2298 = vmatpush.msra.mxu0 %v4884_v19  ;;  %v2027_v55 = vsub.f32 1.0, %v2021_v23  ;;  %v2029_v49 = vmul.f32 %v2021_v23, %v4940_v59  ;;  %v5833_v19 = vld [vmem:[#allocation46_spill] sm:$0xff]  ;;  %v5849_v59 = vld [vmem:[#allocation55_spill] sm:$0xff] }
 0x4a5   :  { %2318 = vmatpush.msra.mxu1 %v4889_v30  ;;  %2338 = vmatpush.msra.mxu2 %v4672_v32  ;;  %v5836_v30 = vld [vmem:[#allocation101_spill] sm:$0xff] }
 0x4a6   :  { %2299 = vmatpush.msra.mxu0 %v4898_v5  ;;  %v5837_v5 = vld [vmem:[#allocation98_spill] sm:$0xff] }
 0x4a7   :  { %2319 = vmatpush.msra.mxu1 %v4904_v31  ;;  %2339 = vmatpush.msra.mxu2 %v4677_v40  ;;  %v2831_v20 = vpop.eup %2830  ;;  %v5827_v40 = vld [vmem:[#allocation41_spill] sm:$0xff]  ;;  %v5838_v31 = vld [vmem:[#allocation100_spill] sm:$0xff] }
 0x4a8   :  { %2300 = vmatpush.msra.mxu0 %v4908_v2  ;;  %v2028_v6 = vmul.f32 %v2831_v20, %v2027_v55  ;;  %v5840_v2 = vld [vmem:[#allocation44_spill] sm:$0xff] }
 0x4a9   :  { %2320 = vmatpush.msra.mxu1 %v4911_v37  ;;  %2340 = vmatpush.msra.mxu2 %v4683_v22  ;;  %v5828_v22 = vld [vmem:[#allocation82_spill] sm:$0xff]  ;;  %v5841_v37 = vld [vmem:[#allocation99_spill] sm:$0xff] }
 0x4aa   :  { %2301 = vmatpush.msra.mxu0 %v4915_v26  ;;  %v5123_v32 = vadd.f32 %v2029_v49, %v2028_v6  ;;  %v5842_v26 = vld [vmem:[#allocation103_spill] sm:$0xff] }
 0x4ab   :  { %2321 = vmatpush.msra.mxu1 %v4918_v46  ;;  %2341 = vmatpush.msra.mxu2 %v4690_v21  ;;  %v5829_v21 = vld [vmem:[#allocation83_spill] sm:$0xff]  ;;  %v5843_v46 = vld [vmem:[#allocation93_spill] sm:$0xff] }
 0x4ac   :  { %2302 = vmatpush.msra.mxu0 %v4922_v43  ;;  %2107 = vmatmul.f32.vlgmr.msra.gmra.mxu3 %v5123_v32  ;;  %v5844_v43 = vld [vmem:[#allocation97_spill] sm:$0xff] }
 0x4ad   :  { %2127 = vmatmul.f32.vlgmr.msrb.gmra.mxu0 %v5123_v32  ;;  %2147 = vmatmul.f32.vlgmr.msrb.gmra.mxu1 %v5123_v32 }
 0x4ae   :  { %2303 = vmatpush.msra.mxu0 %v4929_v14  ;;  %2357 = vmatpush.msra.mxu3 %v4698_v45  ;;  %v5830_v45 = vld [vmem:[#allocation94_spill] sm:$0xff]  ;;  %v5846_v14 = vld [vmem:[#allocation49_spill] sm:$0xff] }
 0x4af   :  { %2322 = vmatpush.msra.mxu1 %v4925_v51  ;;  %2342 = vmatpush.msra.mxu2 %v4703_v44  ;;  %v5831_v44 = vld [vmem:[#allocation28_spill] sm:$0xff]  ;;  %v5845_v51 = vld [vmem:[#allocation43_spill] sm:$0xff] }
 0x4b0   :  { %2304 = vmatpush.msra.mxu0 %v4937_v62  ;;  %2358 = vmatpush.msra.mxu3 %v4706_v11  ;;  %v5832_v11 = vld [vmem:[#allocation102_spill] sm:$0xff]  ;;  %v5848_v62 = vld [vmem:[#allocation48_spill] sm:$0xff] }
 0x4b1   :  { %2323 = vmatpush.msra.mxu1 %v4933_v50  ;;  %2343 = vmatpush.msra.mxu2 %v4711_v24  ;;  %v5834_v24 = vld [vmem:[#allocation95_spill] sm:$0xff]  ;;  %v5847_v50 = vld [vmem:[#allocation53_spill] sm:$0xff] }
 0x4b2   :  { %2305 = vmatpush.msra.mxu0 %v4948_v18  ;;  %2359 = vmatpush.msra.mxu3 %v4714_v39  ;;  %v5835_v39 = vld [vmem:[#allocation96_spill] sm:$0xff]  ;;  %v5852_v18 = vld [vmem:[#allocation54_spill] sm:$0xff] }
 0x4b3   :  { %2324 = vmatpush.msra.mxu1 %v4942_v0  ;;  %2344 = vmatpush.msra.mxu2 %v5828_v22  ;;  %v5850_v0 = vld [vmem:[#allocation58_spill] sm:$0xff] }
 0x4b4   :  { %2306 = vmatpush.msra.mxu0 %v5827_v40  ;;  %2360 = vmatpush.msra.mxu3 %v4720_v47  ;;  %v5839_v47 = vld [vmem:[#allocation27_spill] sm:$0xff] }
 0x4b5   :  { %2325 = vmatpush.msra.mxu1 %v5829_v21  ;;  %2345 = vmatpush.msra.mxu2 %v5831_v44  ;;  %v5189_v44 = vld [vmem:[%s5249_s7] ss:$0 sm:$0xff] }
 0x4b6   :  { %2307 = vmatpush.msra.mxu0 %v5830_v45  ;;  %2361 = vmatpush.msra.mxu3 %v5832_v11 }
 0x4b7   :  { %2326 = vmatpush.msra.mxu1 %v5833_v19  ;;  %2346 = vmatpush.msra.mxu2 %v5835_v39 }
 0x4b8   :  { %2308 = vmatpush.msra.mxu0 %v5834_v24  ;;  %2362 = vmatpush.msra.mxu3 %v5836_v30 }
 0x4b9   :  { %2327 = vmatpush.msra.mxu1 %v5837_v5  ;;  %2347 = vmatpush.msra.mxu2 %v5839_v47 }
 0x4ba   :  { %2309 = vmatpush.msra.mxu0 %v5838_v31  ;;  %2363 = vmatpush.msra.mxu3 %v5840_v2  ;;  %v5860_v2 = vld [vmem:[#allocation74_spill] sm:$0xff] }
 0x4bb   :  { %2328 = vmatpush.msra.mxu1 %v5841_v37  ;;  %2348 = vmatpush.msra.mxu2 %v5843_v46 }
 0x4bc   :  { %2310 = vmatpush.msra.mxu0 %v5842_v26  ;;  %2364 = vmatpush.msra.mxu3 %v5027_v9  ;;  %v5851_v9 = vld [vmem:[#allocation61_spill] sm:$0xff] }
 0x4bd   :  { %2329 = vmatpush.msra.mxu1 %v5844_v43  ;;  %2349 = vmatpush.msra.mxu2 %v5846_v14 }
 0x4be   :  { %2311 = vmatpush.msra.mxu0 %v5845_v51  ;;  %2365 = vmatpush.msra.mxu3 %v5037_v17  ;;  %v5853_v17 = vld [vmem:[#allocation39_spill] sm:$0xff] }
 0x4bf   :  { %2330 = vmatpush.msra.mxu1 %v5847_v50  ;;  %2350 = vmatpush.msra.mxu2 %v5849_v59 }
 0x4c0   :  { %2312 = vmatpush.msra.mxu0 %v5848_v62  ;;  %2366 = vmatpush.msra.mxu3 %v5045_v10 }
 0x4c1   :  { %2331 = vmatpush.msra.mxu1 %v5850_v0  ;;  %2351 = vmatpush.msra.mxu2 %v5030_v63 }
 0x4c2   :  { %2367 = vmatpush.msra.mxu3 %v5050_v25 }
 0x4c3   :  { %2332 = vmatpush.msra.mxu1 %v5033_v16  ;;  %2352 = vmatpush.msra.mxu2 %v5851_v9 }
 0x4c4   :  { %2368 = vmatpush.msra.mxu3 %v5055_v35 }
 0x4c6   :  { %2369 = vmatpush.msra.mxu3 %v5852_v18 }
 0x4c8   :  { %2370 = vmatpush.msra.mxu3 %v5853_v17 }
 0x4ca   :  { %2371 = vmatpush.msra.mxu3 %v5854_v56 }
 0x4cc   :  { %2372 = vmatpush.msra.mxu3 %v5855_v13 }
 0x51e   :  { %v2048_v10 = vpop.f32.mrf.mxu0  ;;  %v2068_v1 = vpop.f32.mrf.mxu1 }
 0x51f   :  { %v2161_v63 = vadd.f32 %v2048_v10, %v5856_v58  ;;  %v2181_v25 = vadd.f32 %v2068_v1, %v5857_v60 }
 0x521   :  { %v2670_v52 = vmul.f32 -1.442695, %v2161_v63  ;;  %v2671_v16 = vmul.f32 -1.442695, %v2181_v25 }
 0x523   :  { %2832 = vpow2.f32 %v2670_v52  ;;  %v5202_v52 = vld [vmem:[%s5250_s8] ss:$0 sm:$0xff] }
 0x524   :  { %2834 = vpow2.f32 %v2671_v16 }
 0x525   :  { %v2088_v49 = vpop.f32.mrf.mxu2 }
 0x526   :  { %v2201_v11 = vadd.f32 %v5189_v44, %v2088_v49 }
 0x529   :  { %v2833_v8 = vpop.eup %2832 }
 0x52a   :  { %v2835_v35 = vpop.eup %2834  ;;  %v2165_v15 = vadd.f32 1.0, %v2833_v8  ;;  %v2128_v3 = vpop.f32.mrf.mxu0 }
 0x52b   :  { %v2185_v54 = vadd.f32 1.0, %v2835_v35  ;;  %v2229_v33 = vadd.f32 %v2128_v3, %v5858_v28  ;;  %v2148_v58 = vpop.f32.mrf.mxu1  ;;  %v5861_v28 = vld [vmem:[#allocation68_spill] sm:$0xff] }
 0x52c   :  { %2836 = vrcp.f32 %v2165_v15  ;;  %v2177_v61 = vand.u32 2147483648, %v2165_v15  ;;  %v2175_v20 = vand.u32 2147483647, %v2165_v15  ;;  %vm2171_vm2 = vweird.f32 %v2165_v15 }
 0x52d   :  { %2838 = vrcp.f32 %v2185_v54  ;;  %v2673_v7 = vmul.f32 -1.442695, %v2229_v33  ;;  %v2197_v5 = vand.u32 2147483648, %v2185_v54  ;;  %vm2191_vm6 = vweird.f32 %v2185_v54 }
 0x52e   :  { %v2178_v22 = vor.u32 1.1754944e-38, %v2177_v61  ;;  %vm2176_vm4 = vcmp.eq.f32.partialorder %v2175_v20, 8.507059e+37  ;;  %v2195_v31 = vand.u32 2147483647, %v2185_v54  ;;  %v2494_v61 = vld [vmem:[#allocation15 + $0x58] sm:$0xff]  ;;  %v2513_v20 = vld [vmem:[#allocation16 + $0x70] sm:$0xff] }
 0x52f   :  { %2840 = vpow2.f32 %v2673_v7  ;;  %v2108_v57 = vpop.f32.mrf.mxu3  ;;  %v2198_v46 = vor.u32 1.1754944e-38, %v2197_v5  ;;  %v2511_v5 = vld [vmem:[#allocation16 + $0x60] sm:$0xff] }
 0x530   :  { %v2209_v48 = vadd.f32 %v2108_v57, %v5859_v29  ;;  %vm2196_vm8 = vcmp.eq.f32.partialorder %v2195_v31, 8.507059e+37  ;;  %v2489_v31 = vld [vmem:[#allocation15 + $0x30] sm:$0xff] }
 0x532   :  { %v2837_v34 = vpop.eup %2836  ;;  %v2672_v42 = vmul.f32 -1.442695, %v2209_v48 }
 0x533   :  { %v2839_v27 = vpop.eup %2838  ;;  %v2167_v12 = vmul.f32 %v2837_v34, %v2165_v15  ;;  %vm2172_vm1 = vweird.f32 %v2837_v34 }
 0x534   :  { %v2187_v53 = vmul.f32 %v2839_v27, %v2185_v54  ;;  %2842 = vpow2.f32 %v2672_v42  ;;  %vm2173_vm3 = vmor %vm2171_vm2, %vm2172_vm1  ;;  %vm2192_vm5 = vweird.f32 %v2839_v27 }
 0x535   :  { %v2841_v4 = vpop.eup %2840  ;;  %v2168_v38 = vsub.f32 1.0, %v2167_v12  ;;  %vm2193_vm7 = vmor %vm2191_vm6, %vm2192_vm5 }
 0x536   :  { %v2188_v41 = vsub.f32 1.0, %v2187_v53  ;;  %v5183_v23 = vadd.f32 1.0, %v2841_v4  ;;  %v2498_v53 = vld [vmem:[#allocation15 + $0x78] sm:$0xff]  ;;  %v2497_v4 = vld [vmem:[#allocation15 + $0x70] sm:$0xff] }
 0x537   :  { %v2169_v55 = vmul.f32 %v2837_v34, %v2168_v38  ;;  %2535 = vmatpush.msrb.mxu1 %v2498_v53  ;;  %v2496_v38 = vld [vmem:[#allocation15 + $0x68] sm:$0xff] }
 0x538   :  { %v2189_v6 = vmul.f32 %v2839_v27, %v2188_v41  ;;  %2844 = vrcp.f32 %v5183_v23  ;;  %v2245_v15 = vand.u32 2147483648, %v5183_v23  ;;  %vm2239_vm14 = vweird.f32 %v5183_v23  ;;  %v2495_v41 = vld [vmem:[#allocation15 + $0x60] sm:$0xff] }
 0x539   :  { %v2170_v40 = vadd.f32 %v2837_v34, %v2169_v55  ;;  %v2243_v54 = vand.u32 2147483647, %v5183_v23  ;;  %2536 = vmatpush.msrb.mxu1 %v2497_v4  ;;  %v2492_v55 = vld [vmem:[#allocation15 + $0x48] sm:$0xff] }
 0x53a   :  { %v2843_v21 = vpop.eup %2842  ;;  %v2190_v39 = vadd.f32 %v2839_v27, %v2189_v6  ;;  %v2246_v57 = vor.u32 1.1754944e-38, %v2245_v15 }
 0x53b   :  { %v2174_v45 = vsel %vm2173_vm3, %v2837_v34, %v2170_v40  ;;  %v2213_v24 = vadd.f32 1.0, %v2843_v21  ;;  %vm2244_vm0 = vcmp.eq.f32.partialorder %v2243_v54, 8.507059e+37  ;;  %2537 = vmatpush.msrb.mxu1 %v2496_v38  ;;  %v2491_v40 = vld [vmem:[#allocation15 + $0x40] sm:$0xff] }
 0x53c   :  { %v2179_v19 = vsel %vm2176_vm4, %v2178_v22, %v2174_v45  ;;  %v2194_v26 = vsel %vm2193_vm7, %v2839_v27, %v2190_v39  ;;  %v5862_v22 = vld [vmem:[#allocation24_spill] sm:$0xff]  ;;  %v5863_v45 = vld [vmem:[#allocation30_spill] sm:$0xff]  ;;  %v2499_v38 = vld [vmem:[#allocation16] sm:$0xff] }
 0x53d   :  { %v2202_v30 = vmul.f32 %v2201_v11, %v2179_v19  ;;  %2846 = vrcp.f32 %v2213_v24  ;;  %v2199_v51 = vsel %vm2196_vm8, %v2198_v46, %v2194_v26  ;;  %v2225_v18 = vand.u32 2147483648, %v2213_v24  ;;  %2538 = vmatpush.msrb.mxu1 %v2495_v41  ;;  %v2512_v19 = vld [vmem:[#allocation16 + $0x68] sm:$0xff]  ;;  %v2487_v26 = vld [vmem:[#allocation15 + $0x20] sm:$0xff] }
 0x53e   :  { %v2845_v47 = vpop.eup %2844  ;;  %v2205_v59 = vsub.f32 1.0, %v2199_v51  ;;  %v2207_v56 = vmul.f32 %v2199_v51, %v5103_v36  ;;  %v2223_v10 = vand.u32 2147483647, %v2213_v24  ;;  %vm2219_vm10 = vweird.f32 %v2213_v24  ;;  %v2508_v46 = vld [vmem:[#allocation16 + $0x48] sm:$0xff] }
 0x53f   :  { %v2203_v37 = vadd.f32 %v2202_v30, %v5860_v2  ;;  %v2235_v43 = vmul.f32 %v2845_v47, %v5183_v23  ;;  %v2226_v25 = vor.u32 1.1754944e-38, %v2225_v18  ;;  %v2249_v36 = vadd.f32 %v5202_v52, %v2148_v58  ;;  %2539 = vmatpush.msrb.mxu1 %v2494_v61  ;;  %v2493_v23 = vld [vmem:[#allocation15 + $0x50] sm:$0xff]  ;;  %v2488_v2 = vld [vmem:[#allocation15 + $0x28] sm:$0xff]  ;;  %v2483_v58 = vld [vmem:[#allocation15] sm:$0xff] }
 0x540   :  { %vm2224_vm12 = vcmp.eq.f32.partialorder %v2223_v10, 8.507059e+37  ;;  %vm2240_vm13 = vweird.f32 %v2845_v47  ;;  %v5864_v18 = vld [vmem:[#allocation32_spill] sm:$0xff]  ;;  %v2505_v10 = vld [vmem:[#allocation16 + $0x30] sm:$0xff] }
 0x541   :  { %2848 = vtanh.f32 %v2203_v37  ;;  %v2236_v62 = vsub.f32 1.0, %v2235_v43  ;;  %vm2241_vm15 = vmor %vm2239_vm14, %vm2240_vm13  ;;  %2540 = vmatpush.msrb.mxu1 %v2493_v23  ;;  %v2509_v37 = vld [vmem:[#allocation16 + $0x50] sm:$0xff]  ;;  %v2486_v43 = vld [vmem:[#allocation15 + $0x18] sm:$0xff] }
 0x543   :  { %v2847_v14 = vpop.eup %2846  ;;  %v2237_v1 = vmul.f32 %v2845_v47, %v2236_v62  ;;  %2541 = vmatpush.msrb.mxu1 %v2492_v55 }
 0x544   :  { %v2215_v50 = vmul.f32 %v2847_v14, %v2213_v24  ;;  %vm2220_vm9 = vweird.f32 %v2847_v14  ;;  %v2490_v24 = vld [vmem:[#allocation15 + $0x38] sm:$0xff] }
 0x545   :  { %vm2221_vm11 = vmor %vm2219_vm10, %vm2220_vm9  ;;  %v2238_v8 = vadd.f32 %v2845_v47, %v2237_v1  ;;  %2542 = vmatpush.msrb.mxu1 %v2491_v40 }
 0x546   :  { %v2216_v9 = vsub.f32 1.0, %v2215_v50 }
 0x547   :  { %v2849_v0 = vpop.eup %2848  ;;  %v2242_v7 = vsel %vm2241_vm15, %v2845_v47, %v2238_v8  ;;  %2543 = vmatpush.msrb.mxu1 %v2490_v24  ;;  %v2510_v47 = vld [vmem:[#allocation16 + $0x58] sm:$0xff]  ;;  %v2503_v8 = vld [vmem:[#allocation16 + $0x20] sm:$0xff]  ;;  %v5866_v24 = vld [vmem:[#allocation77_spill] sm:$0xff] }
 0x548   :  { %v2206_v17 = vmul.f32 %v2849_v0, %v2205_v59  ;;  %v2217_v13 = vmul.f32 %v2847_v14, %v2216_v9  ;;  %v2247_v29 = vsel %vm2244_vm0, %v2246_v57, %v2242_v7  ;;  %v2485_v0 = vld [vmem:[#allocation15 + $0x10] sm:$0xff] }
 0x549   :  { %v2253_v48 = vsub.f32 1.0, %v2247_v29  ;;  %v2255_v12 = vmul.f32 %v2247_v29, %v5123_v32  ;;  %v2514_v32 = vld [vmem:[#allocation16 + $0x78] sm:$0xff]  ;;  %2544 = vmatpush.msrb.mxu1 %v2489_v31  ;;  %v2501_v57 = vld [vmem:[#allocation16 + $0x10] sm:$0xff]  ;;  %v2500_v29 = vld [vmem:[#allocation16 + $0x8] sm:$0xff] }
 0x54a   :  { %v5195_v63 = vadd.f32 %v2207_v56, %v2206_v17  ;;  %v2218_v60 = vadd.f32 %v2847_v14, %v2217_v13  ;;  %2515 = vmatpush.msrb.mxu0 %v2514_v32  ;;  %v2506_v56 = vld [vmem:[#allocation16 + $0x38] sm:$0xff]  ;;  %v2484_v13 = vld [vmem:[#allocation15 + $0x8] sm:$0xff] }
 0x54b   :  { %2545 = vmatpush.msrb.mxu1 %v2488_v2 }
 0x54c   :  { %2273 = vmatmul.f32.vlgmr.msrb.gmra.mxu2 %v5195_v63  ;;  %2293 = vmatmul.f32.vlgmr.msrb.gmra.mxu3 %v5195_v63  ;;  %v2222_v16 = vsel %vm2221_vm11, %v2847_v14, %v2218_v60  ;;  %v2507_v14 = vld [vmem:[#allocation16 + $0x40] sm:$0xff]  ;;  %v2504_v60 = vld [vmem:[#allocation16 + $0x28] sm:$0xff] }
 0x54d   :  { %2313 = vmatmul.f32.vlgmr.msra.gmra.mxu0 %v5195_v63  ;;  %v2227_v35 = vsel %vm2224_vm12, %v2226_v25, %v2222_v16  ;;  %2546 = vmatpush.msrb.mxu1 %v2487_v26 }
 0x54e   :  { %v2250_v3 = vmul.f32 %v2249_v36, %v2227_v35  ;;  %2516 = vmatpush.msrb.mxu0 %v2513_v20  ;;  %v5865_v36 = vld [vmem:[#allocation64_spill] sm:$0xff] }
 0x54f   :  { %2547 = vmatpush.msrb.mxu1 %v2486_v43 }
 0x550   :  { %v2251_v33 = vadd.f32 %v2250_v3, %v5861_v28  ;;  %2517 = vmatpush.msrb.mxu0 %v2512_v19  ;;  %v2502_v28 = vld [vmem:[#allocation16 + $0x18] sm:$0xff] }
 0x551   :  { %2548 = vmatpush.msrb.mxu1 %v2485_v0 }
 0x552   :  { %2850 = vtanh.f32 %v2251_v33  ;;  %2518 = vmatpush.msrb.mxu0 %v2511_v5 }
 0x553   :  { %2549 = vmatpush.msrb.mxu1 %v2484_v13 }
 0x554   :  { %2519 = vmatpush.msrb.mxu0 %v2510_v47 }
 0x555   :  { %2550 = vmatpush.msrb.mxu1 %v2483_v58 }
 0x556   :  { %2520 = vmatpush.msrb.mxu0 %v2509_v37 }
 0x558   :  { %v2851_v34 = vpop.eup %2850  ;;  %2521 = vmatpush.msrb.mxu0 %v2508_v46 }
 0x559   :  { %v2254_v27 = vmul.f32 %v2851_v34, %v2253_v48 }
 0x55a   :  { %2522 = vmatpush.msrb.mxu0 %v2507_v14 }
 0x55b   :  { %v5211_v42 = vadd.f32 %v2255_v12, %v2254_v27 }
 0x55c   :  { %2523 = vmatpush.msrb.mxu0 %v2506_v56 }
 0x55d   :  { %2333 = vmatmul.f32.vlgmr.msra.gmra.mxu1 %v5211_v42  ;;  %2353 = vmatmul.f32.vlgmr.msra.gmra.mxu2 %v5211_v42 }
 0x55e   :  { %2373 = vmatmul.f32.vlgmr.msra.gmra.mxu3 %v5211_v42  ;;  %2524 = vmatpush.msrb.mxu0 %v2505_v10 }
 0x560   :  { %2525 = vmatpush.msrb.mxu0 %v2504_v60 }
 0x562   :  { %2526 = vmatpush.msrb.mxu0 %v2503_v8 }
 0x564   :  { %2527 = vmatpush.msrb.mxu0 %v2502_v28 }
 0x566   :  { %2528 = vmatpush.msrb.mxu0 %v2501_v57 }
 0x568   :  { %2529 = vmatpush.msrb.mxu0 %v2500_v29 }
 0x56a   :  { %2530 = vmatpush.msrb.mxu0 %v2499_v38 }
 0x5ca   :  { %v2314_v41 = vpop.f32.mrf.mxu0 }
 0x5cb   :  { %v2427_v20 = vadd.f32 %v5189_v44, %v2314_v41 }
 0x5cf   :  { %v2274_v6 = vpop.f32.mrf.mxu2  ;;  %v2294_v49 = vpop.f32.mrf.mxu3 }
 0x5d0   :  { %v2387_v21 = vadd.f32 %v2274_v6, %v5862_v22  ;;  %v2407_v11 = vadd.f32 %v2294_v49, %v5863_v45 }
 0x5d2   :  { %v2674_v39 = vmul.f32 -1.442695, %v2387_v21  ;;  %v2675_v30 = vmul.f32 -1.442695, %v2407_v11 }
 0x5d4   :  { %2852 = vpow2.f32 %v2674_v39 }
 0x5d5   :  { %2854 = vpow2.f32 %v2675_v30 }
 0x5da   :  { %v2853_v51 = vpop.eup %2852  ;;  %v2334_v59 = vpop.f32.mrf.mxu1 }
 0x5db   :  { %v2855_v50 = vpop.eup %2854  ;;  %v2391_v62 = vadd.f32 1.0, %v2853_v51  ;;  %v2435_v17 = vadd.f32 %v2334_v59, %v5864_v18 }
 0x5dc   :  { %v5218_v9 = vadd.f32 1.0, %v2855_v50 }
 0x5dd   :  { %2856 = vrcp.f32 %v2391_v62  ;;  %v2676_v1 = vmul.f32 -1.442695, %v2435_v17  ;;  %v2403_v34 = vand.u32 2147483648, %v2391_v62  ;;  %v2401_v53 = vand.u32 2147483647, %v2391_v62 }
 0x5de   :  { %2858 = vrcp.f32 %v5218_v9  ;;  %vm2397_vm2 = vweird.f32 %v2391_v62  ;;  %v2423_v45 = vand.u32 2147483648, %v5218_v9  ;;  %vm2417_vm6 = vweird.f32 %v5218_v9 }
 0x5df   :  { %2860 = vpow2.f32 %v2676_v1  ;;  %v2404_v32 = vor.u32 1.1754944e-38, %v2403_v34  ;;  %vm2402_vm4 = vcmp.eq.f32.partialorder %v2401_v53, 8.507059e+37  ;;  %v2421_v11 = vand.u32 2147483647, %v5218_v9 }
 0x5e0   :  { %v2354_v25 = vpop.f32.mrf.mxu2  ;;  %v2424_v5 = vor.u32 1.1754944e-38, %v2423_v45 }
 0x5e1   :  { %v2455_v16 = vadd.f32 %v2354_v25, %v5865_v36  ;;  %vm2422_vm8 = vcmp.eq.f32.partialorder %v2421_v11, 8.507059e+37  ;;  %v2374_v26 = vpop.f32.mrf.mxu3 }
 0x5e3   :  { %v2857_v35 = vpop.eup %2856  ;;  %v2677_v54 = vmul.f32 -1.442695, %v2455_v16  ;;  %v5867_v16 = vld [vmem:[#allocation45_spill] sm:$0xff] }
 0x5e4   :  { %v2859_v15 = vpop.eup %2858  ;;  %v2393_v3 = vmul.f32 %v2857_v35, %v2391_v62  ;;  %vm2398_vm1 = vweird.f32 %v2857_v35 }
 0x5e5   :  { %v2413_v33 = vmul.f32 %v2859_v15, %v5218_v9  ;;  %2862 = vpow2.f32 %v2677_v54  ;;  %v2861_v48 = vpop.eup %2860  ;;  %vm2399_vm3 = vmor %vm2397_vm2, %vm2398_vm1  ;;  %vm2418_vm5 = vweird.f32 %v2859_v15  ;;  %v2475_v9 = vadd.f32 %v5202_v52, %v2374_v26 }
 0x5e6   :  { %v2394_v7 = vsub.f32 1.0, %v2393_v3  ;;  %v2439_v4 = vadd.f32 1.0, %v2861_v48  ;;  %vm2419_vm7 = vmor %vm2417_vm6, %vm2418_vm5  ;;  %vm2573_vm1 = vcmask 7168  }
 0x5e7   :  { %v2414_v27 = vsub.f32 1.0, %v2413_v33 }
 0x5e8   :  { %v2395_v12 = vmul.f32 %v2857_v35, %v2394_v7  ;;  %2864 = vrcp.f32 %v2439_v4  ;;  %v2451_v47 = vand.u32 2147483648, %v2439_v4  ;;  %v2449_v43 = vand.u32 2147483647, %v2439_v4  ;;  %v2709_v7 = vld [vmem:[%s5253_s11] ss:$0 sm:$0xff] }
 0x5e9   :  { %v2415_v61 = vmul.f32 %v2859_v15, %v2414_v27  ;;  %vm2445_vm10 = vweird.f32 %v2439_v4  ;;  %v2710_v27 = vld [vmem:[%s5254_s12] ss:$0 sm:$0xff] }
 0x5ea   :  { %v2396_v23 = vadd.f32 %v2857_v35, %v2395_v12  ;;  %v2452_v0 = vor.u32 1.1754944e-38, %v2451_v47  ;;  %vm2450_vm12 = vcmp.eq.f32.partialorder %v2449_v43, 8.507059e+37 }
 0x5eb   :  { %v2863_v55 = vpop.eup %2862  ;;  %v2416_v40 = vadd.f32 %v2859_v15, %v2415_v61 }
 0x5ec   :  { %v2400_v6 = vsel %vm2399_vm3, %v2857_v35, %v2396_v23  ;;  %v2459_v22 = vadd.f32 1.0, %v2863_v55 }
 0x5ed   :  { %v2405_v49 = vsel %vm2402_vm4, %v2404_v32, %v2400_v6  ;;  %v2420_v44 = vsel %vm2419_vm7, %v2859_v15, %v2416_v40 }
 0x5ee   :  { %v2428_v21 = vmul.f32 %v2427_v20, %v2405_v49  ;;  %2866 = vrcp.f32 %v2459_v22  ;;  %v2865_v19 = vpop.eup %2864  ;;  %v2425_v2 = vsel %vm2422_vm8, %v2424_v5, %v2420_v44  ;;  %v2471_v1 = vand.u32 2147483648, %v2459_v22 }
 0x5ef   :  { %v2441_v30 = vmul.f32 %v2865_v19, %v2439_v4  ;;  %vm2446_vm9 = vweird.f32 %v2865_v19  ;;  %v2431_v50 = vsub.f32 1.0, %v2425_v2  ;;  %v2433_v56 = vmul.f32 %v2425_v2, %v5195_v63  ;;  %v2711_v4 = vld [vmem:[#allocation4] ss:$0 sm:$0xff] }
 0x5f0   :  { %v2429_v39 = vadd.f32 %v2428_v21, %v5866_v24  ;;  %vm2447_vm11 = vmor %vm2445_vm10, %vm2446_vm9  ;;  %vm2465_vm14 = vweird.f32 %v2459_v22  ;;  %v2469_v36 = vand.u32 2147483647, %v2459_v22  ;;  %v2472_v52 = vor.u32 1.1754944e-38, %v2471_v1 }
 0x5f1   :  { %v2442_v31 = vsub.f32 1.0, %v2441_v30 }
 0x5f2   :  { %2868 = vtanh.f32 %v2429_v39  ;;  %vm2470_vm0 = vcmp.eq.f32.partialorder %v2469_v36, 8.507059e+37 }
 0x5f3   :  { %v2443_v46 = vmul.f32 %v2865_v19, %v2442_v31 }
 0x5f4   :  { %v2867_v37 = vpop.eup %2866 }
 0x5f5   :  { %v2461_v51 = vmul.f32 %v2867_v37, %v2459_v22  ;;  %v2444_v14 = vadd.f32 %v2865_v19, %v2443_v46  ;;  %vm2466_vm13 = vweird.f32 %v2867_v37 }
 0x5f6   :  { %vm2467_vm15 = vmor %vm2465_vm14, %vm2466_vm13 }
 0x5f7   :  { %v2462_v59 = vsub.f32 1.0, %v2461_v51  ;;  %v2448_v18 = vsel %vm2447_vm11, %v2865_v19, %v2444_v14 }
 0x5f8   :  { %v2869_v62 = vpop.eup %2868  ;;  %v2453_v10 = vsel %vm2450_vm12, %v2452_v0, %v2448_v18 }
 0x5f9   :  { %v2432_v17 = vmul.f32 %v2869_v62, %v2431_v50  ;;  %v2463_v13 = vmul.f32 %v2867_v37, %v2462_v59  ;;  %v2476_v58 = vmul.f32 %v2475_v9, %v2453_v10 }
 0x5fb   :  { %v2434_v60 = vadd.f32 %v2433_v56, %v2432_v17  ;;  %v2464_v25 = vadd.f32 %v2867_v37, %v2463_v13  ;;  %v2477_v8 = vadd.f32 %v2476_v58, %v5867_v16 }
 0x5fd   :  { %2551 = vmatmul.f32.vlgmr.msrb.gmra.mxu1 %v2434_v60  ;;  %v2468_v35 = vsel %vm2467_vm15, %v2867_v37, %v2464_v25  ;;  %2870 = vtanh.f32 %v2477_v8 }
 0x5fe   :  { %v2473_v15 = vsel %vm2470_vm0, %v2472_v52, %v2468_v35 }
 0x5ff   :  { %v2479_v3 = vsub.f32 1.0, %v2473_v15  ;;  %v2481_v28 = vmul.f32 %v2473_v15, %v5211_v42 }
 0x603   :  { %v2871_v63 = vpop.eup %2870 }
 0x604   :  { %v2480_v54 = vmul.f32 %v2871_v63, %v2479_v3 }
 0x606   :  { %v2482_v33 = vadd.f32 %v2481_v28, %v2480_v54 }
 0x608   :  { %2531 = vmatmul.f32.vlgmr.msrb.gmra.mxu0 %v2482_v33 }
 0x67a   :  { %v2552_v57 = vpop.f32.mrf.mxu1 }
 0x685   :  { %v2532_v29 = vpop.f32.mrf.mxu0 }
 0x686   :  { %v2553_v48 = vadd.f32 %v2552_v57, %v2532_v29 }
 0x688   :  { %v2559_v34 = vadd.f32 %v2709_v7, %v2553_v48 }
 0x68a   :  { %v2560_v12 = vmax.f32 %v2559_v34, 0.0 }
 0x68c   :  { %v2565_v53 = vmul.f32 %v2710_v27, %v2560_v12 }
 0x68e   :  { %2566 = vadd.xlane.f32.xlu0 %v2565_v53 }
 0x701   :  { %v2567_v38 = vpop.xlane.xlu0 %2566 }
 0x702   :  { %v2572_v42 = vadd.f32 %v2711_v4, %v2567_v38 }
 0x704   :  { %2574 = vst.msk [vmem:[%s5256_s14] sm:$0xff] %vm2573_vm1, %v2572_v42 }
 0x705   :  { %2579 = vsyncpa [#allocation6], 1 }
 0x706   :  { %2580 = vsyncpa [#allocation8], 1 }
 0x707   :  { %2581 = vsyncpa [#allocation11], 1 }
 0x708   :  { %2582 = vsyncpa [#allocation14], 1 }
 0x709   :  { %2583 = vsyncpa [#allocation17], 1 }

</bundles_post_ra>
